<compile_context>
chip_gen: v7x
topology: tpu7x:2x2x1
jax: 0.10.0
libtpu: 0.0.40
codegen_flags: <defaults>
</compile_context>

<pallas_src>
import math
import numpy as np

import jax
import jax.numpy as jnp
from jax.experimental import pallas as pl
from jax.experimental.pallas import tpu as pltpu  # noqa: F401  (kept for parity / future tuning)

# ---------------- model hyper-parameters (small, consistent with module) ----
DIM = 32          # model dim
FF_DIM = 64       # feed-forward hidden dim
NUM_HEAD = 4
NUM_LAYERS = 2
MAX_LEN = 16
EPS = 1e-6
D_K = DIM // NUM_HEAD
# HIGHEST keeps the kernel within 1e-3 of the f32 reference (review correctness
# concern); MXU work is negligible at this size so this costs ~nothing.
HI = jax.lax.Precision.HIGHEST


# ---------------- positional encoding (plain numpy glue, matches torch ref) -
def positional_encoding_1d(position, d_model):
    pos = np.arange(position)[:, None]                       # (P, 1)
    i = np.arange(d_model)[None, :]                          # (1, D)
    angle_rates = 1.0 / np.power(10000.0, 2 * (i // 2) / np.float32(d_model))
    angle_rads = pos * angle_rates                           # (P, D)
    angle_rads[:, 0::2] = np.sin(angle_rads[:, 0::2])
    angle_rads[:, 1::2] = np.cos(angle_rads[:, 1::2])
    return jnp.asarray(angle_rads[None, ...], dtype=jnp.float32)  # (1, P, D)


# ---------------- in-kernel helpers -----------------------------------------
def _norm(x, alpha, bias):
    """Matches torch Norm: (x - mean) / (std_unbiased + eps) * alpha + bias."""
    mu = jnp.mean(x, axis=-1, keepdims=True)
    d = x - mu
    var = jnp.sum(d * d, axis=-1, keepdims=True) / (x.shape[-1] - 1)
    return alpha * (d / (jnp.sqrt(var) + EPS)) + bias


# ---------------- the single fused Pallas kernel -----------------------------
def fused_encoder_kernel(x_ref, pos_ref, mask_ref,
                         wqkv_ref, wo_ref, w1_ref, w2_ref, vec_ref, fin_ref,
                         o_ref):
    """Whole TransformerEncode forward on the flattened (B*T, D) batch.

    Single invocation (no grid): everything lives in VMEM, layers are
    statically unrolled, no HBM round-trips for the activation.
    """
    x = x_ref[...] + pos_ref[...]            # (BT, D) fused positional add
    mask = mask_ref[...]                     # (BT, BT) additive block-diag mask

    for l in range(NUM_LAYERS):              # static unroll over layers
        vec = vec_ref[l]                     # (8, 3*DIM) packed small params
        bqkv = vec[0]                        # (3*DIM,) = [bq*scale | bk | bv]
        bo = vec[1, :DIM]
        c1 = vec[2, :FF_DIM]
        c2 = vec[3, :DIM]
        a1 = vec[4, :DIM]
        g1 = vec[5, :DIM]
        a2 = vec[6, :DIM]
        g2 = vec[7, :DIM]

        # ---- norm1 + fused QKV projection (scale folded into Wq / bq) ------
        x1 = _norm(x, a1, g1)
        qkv = jnp.dot(x1, wqkv_ref[l], preferred_element_type=jnp.float32,
                      precision=HI) + bqkv   # (BT, 3*DIM)

        # ---- multi-head self-attention over all B*T rows --------------------
        # Cross-batch scores are masked out additively, so one set of matmuls
        # per head covers the whole batch.  Head outputs are folded straight
        # into the output projection (block-row of Wo): no concatenate, no
        # explicit transpose (dot_general contracts the last dims directly).
        wo = wo_ref[l]                       # (DIM, DIM)
        attn = None
        for h in range(NUM_HEAD):            # static unroll over heads
            lo = h * D_K
            qh = qkv[:, lo:lo + D_K]                         # (BT, d_k)
            kh = qkv[:, DIM + lo:DIM + lo + D_K]             # (BT, d_k)
            vh = qkv[:, 2 * DIM + lo:2 * DIM + lo + D_K]     # (BT, d_k)
            s = jax.lax.dot_general(qh, kh, (((1,), (1,)), ((), ())),
                                    preferred_element_type=jnp.float32,
                                    precision=HI)            # (BT, BT)
            s = s + mask                                     # kill cross-batch
            s = s - jnp.max(s, axis=-1, keepdims=True)
            p = jnp.exp(s)
            p = p / jnp.sum(p, axis=-1, keepdims=True)       # softmax
            oh = jnp.dot(p, vh, preferred_element_type=jnp.float32,
                         precision=HI)                       # (BT, d_k)
            contrib = jnp.dot(oh, wo[lo:lo + D_K, :],
                              preferred_element_type=jnp.float32,
                              precision=HI)                  # (BT, DIM)
            attn = contrib if attn is None else attn + contrib
        x = x + attn + bo                    # residual 1 (+ out-proj bias)

        # ---- norm2 + feed-forward -------------------------------------------
        x2 = _norm(x, a2, g2)
        h1 = jnp.maximum(
            jnp.dot(x2, w1_ref[l], preferred_element_type=jnp.float32,
                    precision=HI) + c1, 0.0)                 # ReLU
        ff = jnp.dot(h1, w2_ref[l], preferred_element_type=jnp.float32,
                     precision=HI) + c2
        x = x + ff                           # residual 2

    fin = fin_ref[...]                       # (2, DIM) = [alpha; bias]
    o_ref[...] = _norm(x, fin[0], fin[1])    # final norm


# ---------------- host-side parameter packing ---------------------------------
def _pack_layer(p):
    a1, g1, wq, bq, wk, bk, wv, bv, wo, bo, a2, g2, w1, c1, w2, c2 = p
    scale = 1.0 / math.sqrt(D_K)
    wqkv = jnp.concatenate([wq * scale, wk, wv], axis=1)          # (D, 3D)
    bqkv = jnp.concatenate([bq * scale, bk, bv], axis=1)[0]       # (3D,)
    vec = jnp.zeros((8, 3 * DIM), jnp.float32)
    vec = vec.at[0, :].set(bqkv)
    vec = vec.at[1, :DIM].set(bo[0])
    vec = vec.at[2, :FF_DIM].set(c1[0])
    vec = vec.at[3, :DIM].set(c2[0])
    vec = vec.at[4, :DIM].set(a1[0])
    vec = vec.at[5, :DIM].set(g1[0])
    vec = vec.at[6, :DIM].set(a2[0])
    vec = vec.at[7, :DIM].set(g2[0])
    return wqkv, wo, w1, w2, vec


def pack_params(params):
    """Pack the torch-style per-layer params into 6 contiguous arrays."""
    layer_params, (na, nb) = params
    packed = [_pack_layer(p) for p in layer_params]
    wqkv_all = jnp.stack([p[0] for p in packed])     # (L, D, 3D)
    wo_all = jnp.stack([p[1] for p in packed])       # (L, D, D)
    w1_all = jnp.stack([p[2] for p in packed])       # (L, D, FF)
    w2_all = jnp.stack([p[3] for p in packed])       # (L, FF, D)
    vec_all = jnp.stack([p[4] for p in packed])      # (L, 8, 3D)
    fin = jnp.concatenate([na, nb], axis=0)          # (2, D)
    return wqkv_all, wo_all, w1_all, w2_all, vec_all, fin


# ---------------- wrapper ------------------------------------------------------
@jax.jit
def transformer_encode(x, packed):
    """Full TransformerEncode forward (inference) as one fused pallas_call."""
    wqkv_all, wo_all, w1_all, w2_all, vec_all, fin = packed
    B, T, D = x.shape
    BT = B * T

    # Constants (folded under jit): flattened positional encoding and the
    # additive block-diagonal mask that keeps attention within each batch
    # element after flattening (B, T) -> B*T rows.
    pe = positional_encoding_1d(MAX_LEN, DIM)[:, :T, :]            # (1, T, D)
    pos_flat = jnp.tile(pe, (B, 1, 1)).reshape(BT, D)
    bid = np.arange(BT) // T
    mask = jnp.asarray(np.where(bid[:, None] == bid[None, :], 0.0, -1e30),
                       dtype=jnp.float32)                          # (BT, BT)

    # No grid: single invocation, all operands resident in VMEM (total
    # footprint is a few tens of KB).
    # NOTE: on v7x (2 TensorCores) a 2-way "parallel" batch split / core_map
    # over a 2-core mesh would keep the second core busy; on v5e/v6e (1 TC)
    # the single grid point is optimal.
    out_flat = pl.pallas_call(
        fused_encoder_kernel,
        out_shape=jax.ShapeDtypeStruct((BT, D), jnp.float32),
    )(x.reshape(BT, D), pos_flat, mask,
      wqkv_all, wo_all, w1_all, w2_all, vec_all, fin)
    return out_flat.reshape(B, T, D)


# ---------------- deterministic parameter init --------------------------------
def init_layer_params(key):
    ks = jax.random.split(key, 12)

    def lin(kw, kb, din, dout):
        w = jax.random.normal(kw, (din, dout), jnp.float32) * (1.0 / math.sqrt(din))
        b = jax.random.normal(kb, (1, dout), jnp.float32) * 0.02
        return w, b

    wq, bq = lin(ks[0], ks[1], DIM, DIM)
    wk, bk = lin(ks[2], ks[3], DIM, DIM)
    wv, bv = lin(ks[4], ks[5], DIM, DIM)
    wo, bo = lin(ks[6], ks[7], DIM, DIM)
    w1, c1 = lin(ks[8], ks[9], DIM, FF_DIM)
    w2, c2 = lin(ks[10], ks[11], FF_DIM, DIM)
    a1 = jnp.ones((1, DIM), jnp.float32)
    g1 = jnp.zeros((1, DIM), jnp.float32)
    a2 = jnp.ones((1, DIM), jnp.float32)
    g2 = jnp.zeros((1, DIM), jnp.float32)
    return (a1, g1, wq, bq, wk, bk, wv, bv, wo, bo, a2, g2, w1, c1, w2, c2)


def init_params(key):
    keys = jax.random.split(key, NUM_LAYERS + 1)
    layer_params = [init_layer_params(keys[i]) for i in range(NUM_LAYERS)]
    na = jnp.ones((1, DIM), jnp.float32)
    nb = jnp.zeros((1, DIM), jnp.float32)
    return layer_params, (na, nb)


# ---------------- pure-JAX reference (for correctness check) ------------------
def ref_norm(x, alpha, bias):
    mu = jnp.mean(x, axis=-1, keepdims=True)
    var = jnp.sum((x - mu) ** 2, axis=-1, keepdims=True) / (x.shape[-1] - 1)
    return alpha * ((x - mu) / (jnp.sqrt(var) + EPS)) + bias


def ref_layer(x, p):
    a1, g1, wq, bq, wk, bk, wv, bv, wo, bo, a2, g2, w1, c1, w2, c2 = p
    B, T, D = x.shape
    x1 = ref_norm(x, a1, g1)
    q = jnp.einsum('btd,de->bte', x1, wq, precision=HI) + bq
    k = jnp.einsum('btd,de->bte', x1, wk, precision=HI) + bk
    v = jnp.einsum('btd,de->bte', x1, wv, precision=HI) + bv

    def split(t):
        return t.reshape(B, T, NUM_HEAD, D_K).transpose(0, 2, 1, 3)

    qh, kh, vh = split(q), split(k), split(v)
    s = jnp.einsum('bhtd,bhsd->bhts', qh, kh, precision=HI) / math.sqrt(D_K)
    a = jax.nn.softmax(s, axis=-1)
    o = jnp.einsum('bhts,bhsd->bhtd', a, vh, precision=HI)
    o = o.transpose(0, 2, 1, 3).reshape(B, T, D)
    o = jnp.einsum('btd,de->bte', o, wo, precision=HI) + bo
    x = x + o
    x2 = ref_norm(x, a2, g2)
    h1 = jax.nn.relu(jnp.einsum('btd,df->btf', x2, w1, precision=HI) + c1)
    ff = jnp.einsum('btf,fd->btd', h1, w2, precision=HI) + c2
    return x + ff


def ref_transformer_encode(x, params):
    layer_params, (na, nb) = params
    seq_len = x.shape[1]
    x = x + positional_encoding_1d(MAX_LEN, DIM)[:, :seq_len, :]
    for lp in layer_params:
        x = ref_layer(x, lp)
    return ref_norm(x, na, nb)


# ---------------- main ----------------------------------------------------------
if __name__ == "__main__":
    key = jax.random.PRNGKey(0)
    k_x, k_p = jax.random.split(key)

    B, T = 2, 8
    x = jax.random.normal(k_x, (B, T, DIM), jnp.float32)
    params = init_params(k_p)
    packed = pack_params(params)

    out = jax.block_until_ready(transformer_encode(x, packed))
    ref = jax.block_until_ready(ref_transformer_encode(x, params))

    assert out.shape == (B, T, DIM) and out.dtype == jnp.float32
    assert bool(jnp.all(jnp.isfinite(out)))
    np.testing.assert_allclose(np.asarray(out), np.asarray(ref), rtol=1e-3, atol=1e-3)

    print("KERNEL_OK")
</pallas_src>

<mosaic_0001>
module attributes {stable_mosaic.version = 11 : i64} {
  func.func @fused_encoder_kernel(%arg0: memref<16x32xf32, #tpu.memory_space<vmem>>, %arg1: memref<16x32xf32, #tpu.memory_space<vmem>>, %arg2: memref<16x16xf32, #tpu.memory_space<vmem>>, %arg3: memref<2x32x96xf32, #tpu.memory_space<vmem>>, %arg4: memref<2x32x32xf32, #tpu.memory_space<vmem>>, %arg5: memref<2x32x64xf32, #tpu.memory_space<vmem>>, %arg6: memref<2x64x32xf32, #tpu.memory_space<vmem>>, %arg7: memref<2x8x96xf32, #tpu.memory_space<vmem>>, %arg8: memref<2x32xf32, #tpu.memory_space<vmem>>, %arg9: memref<16x32xf32, #tpu.memory_space<vmem>>) attributes {dimension_semantics = [], scalar_prefetch = 0 : i64, scratch_operands = 0 : i64, tpu.core_type = #tpu.core_type<tc>} {
    %c0 = arith.constant 0 : index
    %c0_0 = arith.constant 0 : index
    %0 = vector.load %arg0[%c0, %c0_0] : memref<16x32xf32, #tpu.memory_space<vmem>>, vector<16x32xf32>
    %c0_1 = arith.constant 0 : index
    %c0_2 = arith.constant 0 : index
    %1 = vector.load %arg1[%c0_1, %c0_2] : memref<16x32xf32, #tpu.memory_space<vmem>>, vector<16x32xf32>
    %2 = arith.addf %0, %1 : vector<16x32xf32>
    %c0_3 = arith.constant 0 : index
    %c0_4 = arith.constant 0 : index
    %3 = vector.load %arg2[%c0_3, %c0_4] : memref<16x16xf32, #tpu.memory_space<vmem>>, vector<16x16xf32>
    %c0_5 = arith.constant 0 : index
    %c0_6 = arith.constant 0 : index
    %c0_7 = arith.constant 0 : index
    %4 = vector.load %arg7[%c0_5, %c0_6, %c0_7] : memref<2x8x96xf32, #tpu.memory_space<vmem>>, vector<1x8x96xf32>
    %5 = vector.shape_cast %4 : vector<1x8x96xf32> to vector<8x96xf32>
    %6 = vector.extract_strided_slice %5 {offsets = [0, 0], sizes = [1, 96], strides = [1, 1]} : vector<8x96xf32> to vector<1x96xf32>
    %7 = vector.shape_cast %6 : vector<1x96xf32> to vector<96xf32>
    %8 = vector.extract_strided_slice %5 {offsets = [1, 0], sizes = [1, 32], strides = [1, 1]} : vector<8x96xf32> to vector<1x32xf32>
    %9 = vector.shape_cast %8 : vector<1x32xf32> to vector<32xf32>
    %10 = vector.extract_strided_slice %5 {offsets = [2, 0], sizes = [1, 64], strides = [1, 1]} : vector<8x96xf32> to vector<1x64xf32>
    %11 = vector.shape_cast %10 : vector<1x64xf32> to vector<64xf32>
    %12 = vector.extract_strided_slice %5 {offsets = [3, 0], sizes = [1, 32], strides = [1, 1]} : vector<8x96xf32> to vector<1x32xf32>
    %13 = vector.shape_cast %12 : vector<1x32xf32> to vector<32xf32>
    %14 = vector.extract_strided_slice %5 {offsets = [4, 0], sizes = [1, 32], strides = [1, 1]} : vector<8x96xf32> to vector<1x32xf32>
    %15 = vector.shape_cast %14 : vector<1x32xf32> to vector<32xf32>
    %16 = vector.extract_strided_slice %5 {offsets = [5, 0], sizes = [1, 32], strides = [1, 1]} : vector<8x96xf32> to vector<1x32xf32>
    %17 = vector.shape_cast %16 : vector<1x32xf32> to vector<32xf32>
    %18 = vector.extract_strided_slice %5 {offsets = [6, 0], sizes = [1, 32], strides = [1, 1]} : vector<8x96xf32> to vector<1x32xf32>
    %19 = vector.shape_cast %18 : vector<1x32xf32> to vector<32xf32>
    %20 = vector.extract_strided_slice %5 {offsets = [7, 0], sizes = [1, 32], strides = [1, 1]} : vector<8x96xf32> to vector<1x32xf32>
    %21 = vector.shape_cast %20 : vector<1x32xf32> to vector<32xf32>
    %cst = arith.constant dense<0.000000e+00> : vector<16xf32>
    %22 = vector.multi_reduction <add>, %2, %cst [1] : vector<16x32xf32> to vector<16xf32>
    %23 = vector.shape_cast %22 : vector<16xf32> to vector<16x1xf32>
    %cst_8 = arith.constant 3.200000e+01 : f32
    %24 = vector.broadcast %cst_8 : f32 to vector<16x1xf32>
    %25 = arith.divf %23, %24 : vector<16x1xf32>
    %26 = vector.broadcast %25 : vector<16x1xf32> to vector<16x32xf32>
    %27 = arith.subf %2, %26 : vector<16x32xf32>
    %28 = arith.mulf %27, %27 : vector<16x32xf32>
    %cst_9 = arith.constant dense<0.000000e+00> : vector<16xf32>
    %29 = vector.multi_reduction <add>, %28, %cst_9 [1] : vector<16x32xf32> to vector<16xf32>
    %30 = vector.shape_cast %29 : vector<16xf32> to vector<16x1xf32>
    %cst_10 = arith.constant 3.100000e+01 : f32
    %31 = vector.broadcast %cst_10 : f32 to vector<16x1xf32>
    %32 = arith.divf %30, %31 : vector<16x1xf32>
    %33 = math.sqrt %32 : vector<16x1xf32>
    %cst_11 = arith.constant 9.99999997E-7 : f32
    %34 = vector.broadcast %cst_11 : f32 to vector<16x1xf32>
    %35 = arith.addf %33, %34 : vector<16x1xf32>
    %36 = vector.broadcast %35 : vector<16x1xf32> to vector<16x32xf32>
    %37 = arith.divf %27, %36 : vector<16x32xf32>
    %38 = vector.shape_cast %15 : vector<32xf32> to vector<1x32xf32>
    %39 = vector.broadcast %38 : vector<1x32xf32> to vector<16x32xf32>
    %40 = arith.mulf %39, %37 : vector<16x32xf32>
    %41 = vector.shape_cast %17 : vector<32xf32> to vector<1x32xf32>
    %42 = vector.broadcast %41 : vector<1x32xf32> to vector<16x32xf32>
    %43 = arith.addf %40, %42 : vector<16x32xf32>
    %c0_12 = arith.constant 0 : index
    %c0_13 = arith.constant 0 : index
    %c0_14 = arith.constant 0 : index
    %44 = vector.load %arg3[%c0_12, %c0_13, %c0_14] : memref<2x32x96xf32, #tpu.memory_space<vmem>>, vector<1x32x96xf32>
    %45 = vector.shape_cast %44 : vector<1x32x96xf32> to vector<32x96xf32>
    %cst_15 = arith.constant dense<0.000000e+00> : vector<16x96xf32>
    %46 = tpu.matmul %43, %45, %cst_15 {dimension_numbers = #tpu.dot_dimension_numbers<[1], [0], [0], [1], [0, 0, 1, 1], [], []>, precision = #tpu.contract_precision<fp32>} : vector<16x32xf32>, vector<32x96xf32>, vector<16x96xf32> -> vector<16x96xf32>
    %47 = vector.shape_cast %7 : vector<96xf32> to vector<1x96xf32>
    %48 = vector.broadcast %47 : vector<1x96xf32> to vector<16x96xf32>
    %49 = arith.addf %46, %48 : vector<16x96xf32>
    %c0_16 = arith.constant 0 : index
    %c0_17 = arith.constant 0 : index
    %c0_18 = arith.constant 0 : index
    %50 = vector.load %arg4[%c0_16, %c0_17, %c0_18] : memref<2x32x32xf32, #tpu.memory_space<vmem>>, vector<1x32x32xf32>
    %51 = vector.shape_cast %50 : vector<1x32x32xf32> to vector<32x32xf32>
    %52 = vector.extract_strided_slice %49 {offsets = [0, 0], sizes = [16, 8], strides = [1, 1]} : vector<16x96xf32> to vector<16x8xf32>
    %53 = vector.extract_strided_slice %49 {offsets = [0, 32], sizes = [16, 8], strides = [1, 1]} : vector<16x96xf32> to vector<16x8xf32>
    %54 = vector.extract_strided_slice %49 {offsets = [0, 64], sizes = [16, 8], strides = [1, 1]} : vector<16x96xf32> to vector<16x8xf32>
    %cst_19 = arith.constant dense<0.000000e+00> : vector<16x16xf32>
    %55 = tpu.matmul %52, %53, %cst_19 {dimension_numbers = #tpu.dot_dimension_numbers<[1], [1], [0], [0], [0, 0, 1, 0], [], []>, precision = #tpu.contract_precision<fp32>} : vector<16x8xf32>, vector<16x8xf32>, vector<16x16xf32> -> vector<16x16xf32>
    %56 = arith.addf %55, %3 : vector<16x16xf32>
    %cst_20 = arith.constant dense<0xFF800000> : vector<16xf32>
    %57 = vector.multi_reduction <maximumf>, %56, %cst_20 [1] : vector<16x16xf32> to vector<16xf32>
    %58 = vector.shape_cast %57 : vector<16xf32> to vector<16x1xf32>
    %59 = vector.broadcast %58 : vector<16x1xf32> to vector<16x16xf32>
    %60 = arith.subf %56, %59 : vector<16x16xf32>
    %61 = math.exp %60 : vector<16x16xf32>
    %cst_21 = arith.constant dense<0.000000e+00> : vector<16xf32>
    %62 = vector.multi_reduction <add>, %61, %cst_21 [1] : vector<16x16xf32> to vector<16xf32>
    %63 = vector.shape_cast %62 : vector<16xf32> to vector<16x1xf32>
    %64 = vector.broadcast %63 : vector<16x1xf32> to vector<16x16xf32>
    %65 = arith.divf %61, %64 : vector<16x16xf32>
    %cst_22 = arith.constant dense<0.000000e+00> : vector<16x8xf32>
    %66 = tpu.matmul %65, %54, %cst_22 {dimension_numbers = #tpu.dot_dimension_numbers<[1], [0], [0], [1], [0, 0, 1, 1], [], []>, precision = #tpu.contract_precision<fp32>} : vector<16x16xf32>, vector<16x8xf32>, vector<16x8xf32> -> vector<16x8xf32>
    %67 = vector.extract_strided_slice %51 {offsets = [0, 0], sizes = [8, 32], strides = [1, 1]} : vector<32x32xf32> to vector<8x32xf32>
    %cst_23 = arith.constant dense<0.000000e+00> : vector<16x32xf32>
    %68 = tpu.matmul %66, %67, %cst_23 {dimension_numbers = #tpu.dot_dimension_numbers<[1], [0], [0], [1], [0, 0, 1, 1], [], []>, precision = #tpu.contract_precision<fp32>} : vector<16x8xf32>, vector<8x32xf32>, vector<16x32xf32> -> vector<16x32xf32>
    %69 = vector.extract_strided_slice %49 {offsets = [0, 8], sizes = [16, 8], strides = [1, 1]} : vector<16x96xf32> to vector<16x8xf32>
    %70 = vector.extract_strided_slice %49 {offsets = [0, 40], sizes = [16, 8], strides = [1, 1]} : vector<16x96xf32> to vector<16x8xf32>
    %71 = vector.extract_strided_slice %49 {offsets = [0, 72], sizes = [16, 8], strides = [1, 1]} : vector<16x96xf32> to vector<16x8xf32>
    %cst_24 = arith.constant dense<0.000000e+00> : vector<16x16xf32>
    %72 = tpu.matmul %69, %70, %cst_24 {dimension_numbers = #tpu.dot_dimension_numbers<[1], [1], [0], [0], [0, 0, 1, 0], [], []>, precision = #tpu.contract_precision<fp32>} : vector<16x8xf32>, vector<16x8xf32>, vector<16x16xf32> -> vector<16x16xf32>
    %73 = arith.addf %72, %3 : vector<16x16xf32>
    %cst_25 = arith.constant dense<0xFF800000> : vector<16xf32>
    %74 = vector.multi_reduction <maximumf>, %73, %cst_25 [1] : vector<16x16xf32> to vector<16xf32>
    %75 = vector.shape_cast %74 : vector<16xf32> to vector<16x1xf32>
    %76 = vector.broadcast %75 : vector<16x1xf32> to vector<16x16xf32>
    %77 = arith.subf %73, %76 : vector<16x16xf32>
    %78 = math.exp %77 : vector<16x16xf32>
    %cst_26 = arith.constant dense<0.000000e+00> : vector<16xf32>
    %79 = vector.multi_reduction <add>, %78, %cst_26 [1] : vector<16x16xf32> to vector<16xf32>
    %80 = vector.shape_cast %79 : vector<16xf32> to vector<16x1xf32>
    %81 = vector.broadcast %80 : vector<16x1xf32> to vector<16x16xf32>
    %82 = arith.divf %78, %81 : vector<16x16xf32>
    %cst_27 = arith.constant dense<0.000000e+00> : vector<16x8xf32>
    %83 = tpu.matmul %82, %71, %cst_27 {dimension_numbers = #tpu.dot_dimension_numbers<[1], [0], [0], [1], [0, 0, 1, 1], [], []>, precision = #tpu.contract_precision<fp32>} : vector<16x16xf32>, vector<16x8xf32>, vector<16x8xf32> -> vector<16x8xf32>
    %84 = vector.extract_strided_slice %51 {offsets = [8, 0], sizes = [8, 32], strides = [1, 1]} : vector<32x32xf32> to vector<8x32xf32>
    %cst_28 = arith.constant dense<0.000000e+00> : vector<16x32xf32>
    %85 = tpu.matmul %83, %84, %cst_28 {dimension_numbers = #tpu.dot_dimension_numbers<[1], [0], [0], [1], [0, 0, 1, 1], [], []>, precision = #tpu.contract_precision<fp32>} : vector<16x8xf32>, vector<8x32xf32>, vector<16x32xf32> -> vector<16x32xf32>
    %86 = arith.addf %68, %85 : vector<16x32xf32>
    %87 = vector.extract_strided_slice %49 {offsets = [0, 16], sizes = [16, 8], strides = [1, 1]} : vector<16x96xf32> to vector<16x8xf32>
    %88 = vector.extract_strided_slice %49 {offsets = [0, 48], sizes = [16, 8], strides = [1, 1]} : vector<16x96xf32> to vector<16x8xf32>
    %89 = vector.extract_strided_slice %49 {offsets = [0, 80], sizes = [16, 8], strides = [1, 1]} : vector<16x96xf32> to vector<16x8xf32>
    %cst_29 = arith.constant dense<0.000000e+00> : vector<16x16xf32>
    %90 = tpu.matmul %87, %88, %cst_29 {dimension_numbers = #tpu.dot_dimension_numbers<[1], [1], [0], [0], [0, 0, 1, 0], [], []>, precision = #tpu.contract_precision<fp32>} : vector<16x8xf32>, vector<16x8xf32>, vector<16x16xf32> -> vector<16x16xf32>
    %91 = arith.addf %90, %3 : vector<16x16xf32>
    %cst_30 = arith.constant dense<0xFF800000> : vector<16xf32>
    %92 = vector.multi_reduction <maximumf>, %91, %cst_30 [1] : vector<16x16xf32> to vector<16xf32>
    %93 = vector.shape_cast %92 : vector<16xf32> to vector<16x1xf32>
    %94 = vector.broadcast %93 : vector<16x1xf32> to vector<16x16xf32>
    %95 = arith.subf %91, %94 : vector<16x16xf32>
    %96 = math.exp %95 : vector<16x16xf32>
    %cst_31 = arith.constant dense<0.000000e+00> : vector<16xf32>
    %97 = vector.multi_reduction <add>, %96, %cst_31 [1] : vector<16x16xf32> to vector<16xf32>
    %98 = vector.shape_cast %97 : vector<16xf32> to vector<16x1xf32>
    %99 = vector.broadcast %98 : vector<16x1xf32> to vector<16x16xf32>
    %100 = arith.divf %96, %99 : vector<16x16xf32>
    %cst_32 = arith.constant dense<0.000000e+00> : vector<16x8xf32>
    %101 = tpu.matmul %100, %89, %cst_32 {dimension_numbers = #tpu.dot_dimension_numbers<[1], [0], [0], [1], [0, 0, 1, 1], [], []>, precision = #tpu.contract_precision<fp32>} : vector<16x16xf32>, vector<16x8xf32>, vector<16x8xf32> -> vector<16x8xf32>
    %102 = vector.extract_strided_slice %51 {offsets = [16, 0], sizes = [8, 32], strides = [1, 1]} : vector<32x32xf32> to vector<8x32xf32>
    %cst_33 = arith.constant dense<0.000000e+00> : vector<16x32xf32>
    %103 = tpu.matmul %101, %102, %cst_33 {dimension_numbers = #tpu.dot_dimension_numbers<[1], [0], [0], [1], [0, 0, 1, 1], [], []>, precision = #tpu.contract_precision<fp32>} : vector<16x8xf32>, vector<8x32xf32>, vector<16x32xf32> -> vector<16x32xf32>
    %104 = arith.addf %86, %103 : vector<16x32xf32>
    %105 = vector.extract_strided_slice %49 {offsets = [0, 24], sizes = [16, 8], strides = [1, 1]} : vector<16x96xf32> to vector<16x8xf32>
    %106 = vector.extract_strided_slice %49 {offsets = [0, 56], sizes = [16, 8], strides = [1, 1]} : vector<16x96xf32> to vector<16x8xf32>
    %107 = vector.extract_strided_slice %49 {offsets = [0, 88], sizes = [16, 8], strides = [1, 1]} : vector<16x96xf32> to vector<16x8xf32>
    %cst_34 = arith.constant dense<0.000000e+00> : vector<16x16xf32>
    %108 = tpu.matmul %105, %106, %cst_34 {dimension_numbers = #tpu.dot_dimension_numbers<[1], [1], [0], [0], [0, 0, 1, 0], [], []>, precision = #tpu.contract_precision<fp32>} : vector<16x8xf32>, vector<16x8xf32>, vector<16x16xf32> -> vector<16x16xf32>
    %109 = arith.addf %108, %3 : vector<16x16xf32>
    %cst_35 = arith.constant dense<0xFF800000> : vector<16xf32>
    %110 = vector.multi_reduction <maximumf>, %109, %cst_35 [1] : vector<16x16xf32> to vector<16xf32>
    %111 = vector.shape_cast %110 : vector<16xf32> to vector<16x1xf32>
    %112 = vector.broadcast %111 : vector<16x1xf32> to vector<16x16xf32>
    %113 = arith.subf %109, %112 : vector<16x16xf32>
    %114 = math.exp %113 : vector<16x16xf32>
    %cst_36 = arith.constant dense<0.000000e+00> : vector<16xf32>
    %115 = vector.multi_reduction <add>, %114, %cst_36 [1] : vector<16x16xf32> to vector<16xf32>
    %116 = vector.shape_cast %115 : vector<16xf32> to vector<16x1xf32>
    %117 = vector.broadcast %116 : vector<16x1xf32> to vector<16x16xf32>
    %118 = arith.divf %114, %117 : vector<16x16xf32>
    %cst_37 = arith.constant dense<0.000000e+00> : vector<16x8xf32>
    %119 = tpu.matmul %118, %107, %cst_37 {dimension_numbers = #tpu.dot_dimension_numbers<[1], [0], [0], [1], [0, 0, 1, 1], [], []>, precision = #tpu.contract_precision<fp32>} : vector<16x16xf32>, vector<16x8xf32>, vector<16x8xf32> -> vector<16x8xf32>
    %120 = vector.extract_strided_slice %51 {offsets = [24, 0], sizes = [8, 32], strides = [1, 1]} : vector<32x32xf32> to vector<8x32xf32>
    %cst_38 = arith.constant dense<0.000000e+00> : vector<16x32xf32>
    %121 = tpu.matmul %119, %120, %cst_38 {dimension_numbers = #tpu.dot_dimension_numbers<[1], [0], [0], [1], [0, 0, 1, 1], [], []>, precision = #tpu.contract_precision<fp32>} : vector<16x8xf32>, vector<8x32xf32>, vector<16x32xf32> -> vector<16x32xf32>
    %122 = arith.addf %104, %121 : vector<16x32xf32>
    %123 = arith.addf %2, %122 : vector<16x32xf32>
    %124 = vector.shape_cast %9 : vector<32xf32> to vector<1x32xf32>
    %125 = vector.broadcast %124 : vector<1x32xf32> to vector<16x32xf32>
    %126 = arith.addf %123, %125 : vector<16x32xf32>
    %cst_39 = arith.constant dense<0.000000e+00> : vector<16xf32>
    %127 = vector.multi_reduction <add>, %126, %cst_39 [1] : vector<16x32xf32> to vector<16xf32>
    %128 = vector.shape_cast %127 : vector<16xf32> to vector<16x1xf32>
    %cst_40 = arith.constant 3.200000e+01 : f32
    %129 = vector.broadcast %cst_40 : f32 to vector<16x1xf32>
    %130 = arith.divf %128, %129 : vector<16x1xf32>
    %131 = vector.broadcast %130 : vector<16x1xf32> to vector<16x32xf32>
    %132 = arith.subf %126, %131 : vector<16x32xf32>
    %133 = arith.mulf %132, %132 : vector<16x32xf32>
    %cst_41 = arith.constant dense<0.000000e+00> : vector<16xf32>
    %134 = vector.multi_reduction <add>, %133, %cst_41 [1] : vector<16x32xf32> to vector<16xf32>
    %135 = vector.shape_cast %134 : vector<16xf32> to vector<16x1xf32>
    %cst_42 = arith.constant 3.100000e+01 : f32
    %136 = vector.broadcast %cst_42 : f32 to vector<16x1xf32>
    %137 = arith.divf %135, %136 : vector<16x1xf32>
    %138 = math.sqrt %137 : vector<16x1xf32>
    %cst_43 = arith.constant 9.99999997E-7 : f32
    %139 = vector.broadcast %cst_43 : f32 to vector<16x1xf32>
    %140 = arith.addf %138, %139 : vector<16x1xf32>
    %141 = vector.broadcast %140 : vector<16x1xf32> to vector<16x32xf32>
    %142 = arith.divf %132, %141 : vector<16x32xf32>
    %143 = vector.shape_cast %19 : vector<32xf32> to vector<1x32xf32>
    %144 = vector.broadcast %143 : vector<1x32xf32> to vector<16x32xf32>
    %145 = arith.mulf %144, %142 : vector<16x32xf32>
    %146 = vector.shape_cast %21 : vector<32xf32> to vector<1x32xf32>
    %147 = vector.broadcast %146 : vector<1x32xf32> to vector<16x32xf32>
    %148 = arith.addf %145, %147 : vector<16x32xf32>
    %c0_44 = arith.constant 0 : index
    %c0_45 = arith.constant 0 : index
    %c0_46 = arith.constant 0 : index
    %149 = vector.load %arg5[%c0_44, %c0_45, %c0_46] : memref<2x32x64xf32, #tpu.memory_space<vmem>>, vector<1x32x64xf32>
    %150 = vector.shape_cast %149 : vector<1x32x64xf32> to vector<32x64xf32>
    %cst_47 = arith.constant dense<0.000000e+00> : vector<16x64xf32>
    %151 = tpu.matmul %148, %150, %cst_47 {dimension_numbers = #tpu.dot_dimension_numbers<[1], [0], [0], [1], [0, 0, 1, 1], [], []>, precision = #tpu.contract_precision<fp32>} : vector<16x32xf32>, vector<32x64xf32>, vector<16x64xf32> -> vector<16x64xf32>
    %152 = vector.shape_cast %11 : vector<64xf32> to vector<1x64xf32>
    %153 = vector.broadcast %152 : vector<1x64xf32> to vector<16x64xf32>
    %154 = arith.addf %151, %153 : vector<16x64xf32>
    %cst_48 = arith.constant 0.000000e+00 : f32
    %155 = vector.broadcast %cst_48 : f32 to vector<16x64xf32>
    %156 = arith.maximumf %154, %155 : vector<16x64xf32>
    %c0_49 = arith.constant 0 : index
    %c0_50 = arith.constant 0 : index
    %c0_51 = arith.constant 0 : index
    %157 = vector.load %arg6[%c0_49, %c0_50, %c0_51] : memref<2x64x32xf32, #tpu.memory_space<vmem>>, vector<1x64x32xf32>
    %158 = vector.shape_cast %157 : vector<1x64x32xf32> to vector<64x32xf32>
    %cst_52 = arith.constant dense<0.000000e+00> : vector<16x32xf32>
    %159 = tpu.matmul %156, %158, %cst_52 {dimension_numbers = #tpu.dot_dimension_numbers<[1], [0], [0], [1], [0, 0, 1, 1], [], []>, precision = #tpu.contract_precision<fp32>} : vector<16x64xf32>, vector<64x32xf32>, vector<16x32xf32> -> vector<16x32xf32>
    %160 = vector.shape_cast %13 : vector<32xf32> to vector<1x32xf32>
    %161 = vector.broadcast %160 : vector<1x32xf32> to vector<16x32xf32>
    %162 = arith.addf %159, %161 : vector<16x32xf32>
    %163 = arith.addf %126, %162 : vector<16x32xf32>
    %c1 = arith.constant 1 : index
    %c0_53 = arith.constant 0 : index
    %c0_54 = arith.constant 0 : index
    %164 = vector.load %arg7[%c1, %c0_53, %c0_54] : memref<2x8x96xf32, #tpu.memory_space<vmem>>, vector<1x8x96xf32>
    %165 = vector.shape_cast %164 : vector<1x8x96xf32> to vector<8x96xf32>
    %166 = vector.extract_strided_slice %165 {offsets = [0, 0], sizes = [1, 96], strides = [1, 1]} : vector<8x96xf32> to vector<1x96xf32>
    %167 = vector.shape_cast %166 : vector<1x96xf32> to vector<96xf32>
    %168 = vector.extract_strided_slice %165 {offsets = [1, 0], sizes = [1, 32], strides = [1, 1]} : vector<8x96xf32> to vector<1x32xf32>
    %169 = vector.shape_cast %168 : vector<1x32xf32> to vector<32xf32>
    %170 = vector.extract_strided_slice %165 {offsets = [2, 0], sizes = [1, 64], strides = [1, 1]} : vector<8x96xf32> to vector<1x64xf32>
    %171 = vector.shape_cast %170 : vector<1x64xf32> to vector<64xf32>
    %172 = vector.extract_strided_slice %165 {offsets = [3, 0], sizes = [1, 32], strides = [1, 1]} : vector<8x96xf32> to vector<1x32xf32>
    %173 = vector.shape_cast %172 : vector<1x32xf32> to vector<32xf32>
    %174 = vector.extract_strided_slice %165 {offsets = [4, 0], sizes = [1, 32], strides = [1, 1]} : vector<8x96xf32> to vector<1x32xf32>
    %175 = vector.shape_cast %174 : vector<1x32xf32> to vector<32xf32>
    %176 = vector.extract_strided_slice %165 {offsets = [5, 0], sizes = [1, 32], strides = [1, 1]} : vector<8x96xf32> to vector<1x32xf32>
    %177 = vector.shape_cast %176 : vector<1x32xf32> to vector<32xf32>
    %178 = vector.extract_strided_slice %165 {offsets = [6, 0], sizes = [1, 32], strides = [1, 1]} : vector<8x96xf32> to vector<1x32xf32>
    %179 = vector.shape_cast %178 : vector<1x32xf32> to vector<32xf32>
    %180 = vector.extract_strided_slice %165 {offsets = [7, 0], sizes = [1, 32], strides = [1, 1]} : vector<8x96xf32> to vector<1x32xf32>
    %181 = vector.shape_cast %180 : vector<1x32xf32> to vector<32xf32>
    %cst_55 = arith.constant dense<0.000000e+00> : vector<16xf32>
    %182 = vector.multi_reduction <add>, %163, %cst_55 [1] : vector<16x32xf32> to vector<16xf32>
    %183 = vector.shape_cast %182 : vector<16xf32> to vector<16x1xf32>
    %cst_56 = arith.constant 3.200000e+01 : f32
    %184 = vector.broadcast %cst_56 : f32 to vector<16x1xf32>
    %185 = arith.divf %183, %184 : vector<16x1xf32>
    %186 = vector.broadcast %185 : vector<16x1xf32> to vector<16x32xf32>
    %187 = arith.subf %163, %186 : vector<16x32xf32>
    %188 = arith.mulf %187, %187 : vector<16x32xf32>
    %cst_57 = arith.constant dense<0.000000e+00> : vector<16xf32>
    %189 = vector.multi_reduction <add>, %188, %cst_57 [1] : vector<16x32xf32> to vector<16xf32>
    %190 = vector.shape_cast %189 : vector<16xf32> to vector<16x1xf32>
    %cst_58 = arith.constant 3.100000e+01 : f32
    %191 = vector.broadcast %cst_58 : f32 to vector<16x1xf32>
    %192 = arith.divf %190, %191 : vector<16x1xf32>
    %193 = math.sqrt %192 : vector<16x1xf32>
    %cst_59 = arith.constant 9.99999997E-7 : f32
    %194 = vector.broadcast %cst_59 : f32 to vector<16x1xf32>
    %195 = arith.addf %193, %194 : vector<16x1xf32>
    %196 = vector.broadcast %195 : vector<16x1xf32> to vector<16x32xf32>
    %197 = arith.divf %187, %196 : vector<16x32xf32>
    %198 = vector.shape_cast %175 : vector<32xf32> to vector<1x32xf32>
    %199 = vector.broadcast %198 : vector<1x32xf32> to vector<16x32xf32>
    %200 = arith.mulf %199, %197 : vector<16x32xf32>
    %201 = vector.shape_cast %177 : vector<32xf32> to vector<1x32xf32>
    %202 = vector.broadcast %201 : vector<1x32xf32> to vector<16x32xf32>
    %203 = arith.addf %200, %202 : vector<16x32xf32>
    %c1_60 = arith.constant 1 : index
    %c0_61 = arith.constant 0 : index
    %c0_62 = arith.constant 0 : index
    %204 = vector.load %arg3[%c1_60, %c0_61, %c0_62] : memref<2x32x96xf32, #tpu.memory_space<vmem>>, vector<1x32x96xf32>
    %205 = vector.shape_cast %204 : vector<1x32x96xf32> to vector<32x96xf32>
    %cst_63 = arith.constant dense<0.000000e+00> : vector<16x96xf32>
    %206 = tpu.matmul %203, %205, %cst_63 {dimension_numbers = #tpu.dot_dimension_numbers<[1], [0], [0], [1], [0, 0, 1, 1], [], []>, precision = #tpu.contract_precision<fp32>} : vector<16x32xf32>, vector<32x96xf32>, vector<16x96xf32> -> vector<16x96xf32>
    %207 = vector.shape_cast %167 : vector<96xf32> to vector<1x96xf32>
    %208 = vector.broadcast %207 : vector<1x96xf32> to vector<16x96xf32>
    %209 = arith.addf %206, %208 : vector<16x96xf32>
    %c1_64 = arith.constant 1 : index
    %c0_65 = arith.constant 0 : index
    %c0_66 = arith.constant 0 : index
    %210 = vector.load %arg4[%c1_64, %c0_65, %c0_66] : memref<2x32x32xf32, #tpu.memory_space<vmem>>, vector<1x32x32xf32>
    %211 = vector.shape_cast %210 : vector<1x32x32xf32> to vector<32x32xf32>
    %212 = vector.extract_strided_slice %209 {offsets = [0, 0], sizes = [16, 8], strides = [1, 1]} : vector<16x96xf32> to vector<16x8xf32>
    %213 = vector.extract_strided_slice %209 {offsets = [0, 32], sizes = [16, 8], strides = [1, 1]} : vector<16x96xf32> to vector<16x8xf32>
    %214 = vector.extract_strided_slice %209 {offsets = [0, 64], sizes = [16, 8], strides = [1, 1]} : vector<16x96xf32> to vector<16x8xf32>
    %cst_67 = arith.constant dense<0.000000e+00> : vector<16x16xf32>
    %215 = tpu.matmul %212, %213, %cst_67 {dimension_numbers = #tpu.dot_dimension_numbers<[1], [1], [0], [0], [0, 0, 1, 0], [], []>, precision = #tpu.contract_precision<fp32>} : vector<16x8xf32>, vector<16x8xf32>, vector<16x16xf32> -> vector<16x16xf32>
    %216 = arith.addf %215, %3 : vector<16x16xf32>
    %cst_68 = arith.constant dense<0xFF800000> : vector<16xf32>
    %217 = vector.multi_reduction <maximumf>, %216, %cst_68 [1] : vector<16x16xf32> to vector<16xf32>
    %218 = vector.shape_cast %217 : vector<16xf32> to vector<16x1xf32>
    %219 = vector.broadcast %218 : vector<16x1xf32> to vector<16x16xf32>
    %220 = arith.subf %216, %219 : vector<16x16xf32>
    %221 = math.exp %220 : vector<16x16xf32>
    %cst_69 = arith.constant dense<0.000000e+00> : vector<16xf32>
    %222 = vector.multi_reduction <add>, %221, %cst_69 [1] : vector<16x16xf32> to vector<16xf32>
    %223 = vector.shape_cast %222 : vector<16xf32> to vector<16x1xf32>
    %224 = vector.broadcast %223 : vector<16x1xf32> to vector<16x16xf32>
    %225 = arith.divf %221, %224 : vector<16x16xf32>
    %cst_70 = arith.constant dense<0.000000e+00> : vector<16x8xf32>
    %226 = tpu.matmul %225, %214, %cst_70 {dimension_numbers = #tpu.dot_dimension_numbers<[1], [0], [0], [1], [0, 0, 1, 1], [], []>, precision = #tpu.contract_precision<fp32>} : vector<16x16xf32>, vector<16x8xf32>, vector<16x8xf32> -> vector<16x8xf32>
    %227 = vector.extract_strided_slice %211 {offsets = [0, 0], sizes = [8, 32], strides = [1, 1]} : vector<32x32xf32> to vector<8x32xf32>
    %cst_71 = arith.constant dense<0.000000e+00> : vector<16x32xf32>
    %228 = tpu.matmul %226, %227, %cst_71 {dimension_numbers = #tpu.dot_dimension_numbers<[1], [0], [0], [1], [0, 0, 1, 1], [], []>, precision = #tpu.contract_precision<fp32>} : vector<16x8xf32>, vector<8x32xf32>, vector<16x32xf32> -> vector<16x32xf32>
    %229 = vector.extract_strided_slice %209 {offsets = [0, 8], sizes = [16, 8], strides = [1, 1]} : vector<16x96xf32> to vector<16x8xf32>
    %230 = vector.extract_strided_slice %209 {offsets = [0, 40], sizes = [16, 8], strides = [1, 1]} : vector<16x96xf32> to vector<16x8xf32>
    %231 = vector.extract_strided_slice %209 {offsets = [0, 72], sizes = [16, 8], strides = [1, 1]} : vector<16x96xf32> to vector<16x8xf32>
    %cst_72 = arith.constant dense<0.000000e+00> : vector<16x16xf32>
    %232 = tpu.matmul %229, %230, %cst_72 {dimension_numbers = #tpu.dot_dimension_numbers<[1], [1], [0], [0], [0, 0, 1, 0], [], []>, precision = #tpu.contract_precision<fp32>} : vector<16x8xf32>, vector<16x8xf32>, vector<16x16xf32> -> vector<16x16xf32>
    %233 = arith.addf %232, %3 : vector<16x16xf32>
    %cst_73 = arith.constant dense<0xFF800000> : vector<16xf32>
    %234 = vector.multi_reduction <maximumf>, %233, %cst_73 [1] : vector<16x16xf32> to vector<16xf32>
    %235 = vector.shape_cast %234 : vector<16xf32> to vector<16x1xf32>
    %236 = vector.broadcast %235 : vector<16x1xf32> to vector<16x16xf32>
    %237 = arith.subf %233, %236 : vector<16x16xf32>
    %238 = math.exp %237 : vector<16x16xf32>
    %cst_74 = arith.constant dense<0.000000e+00> : vector<16xf32>
    %239 = vector.multi_reduction <add>, %238, %cst_74 [1] : vector<16x16xf32> to vector<16xf32>
    %240 = vector.shape_cast %239 : vector<16xf32> to vector<16x1xf32>
    %241 = vector.broadcast %240 : vector<16x1xf32> to vector<16x16xf32>
    %242 = arith.divf %238, %241 : vector<16x16xf32>
    %cst_75 = arith.constant dense<0.000000e+00> : vector<16x8xf32>
    %243 = tpu.matmul %242, %231, %cst_75 {dimension_numbers = #tpu.dot_dimension_numbers<[1], [0], [0], [1], [0, 0, 1, 1], [], []>, precision = #tpu.contract_precision<fp32>} : vector<16x16xf32>, vector<16x8xf32>, vector<16x8xf32> -> vector<16x8xf32>
    %244 = vector.extract_strided_slice %211 {offsets = [8, 0], sizes = [8, 32], strides = [1, 1]} : vector<32x32xf32> to vector<8x32xf32>
    %cst_76 = arith.constant dense<0.000000e+00> : vector<16x32xf32>
    %245 = tpu.matmul %243, %244, %cst_76 {dimension_numbers = #tpu.dot_dimension_numbers<[1], [0], [0], [1], [0, 0, 1, 1], [], []>, precision = #tpu.contract_precision<fp32>} : vector<16x8xf32>, vector<8x32xf32>, vector<16x32xf32> -> vector<16x32xf32>
    %246 = arith.addf %228, %245 : vector<16x32xf32>
    %247 = vector.extract_strided_slice %209 {offsets = [0, 16], sizes = [16, 8], strides = [1, 1]} : vector<16x96xf32> to vector<16x8xf32>
    %248 = vector.extract_strided_slice %209 {offsets = [0, 48], sizes = [16, 8], strides = [1, 1]} : vector<16x96xf32> to vector<16x8xf32>
    %249 = vector.extract_strided_slice %209 {offsets = [0, 80], sizes = [16, 8], strides = [1, 1]} : vector<16x96xf32> to vector<16x8xf32>
    %cst_77 = arith.constant dense<0.000000e+00> : vector<16x16xf32>
    %250 = tpu.matmul %247, %248, %cst_77 {dimension_numbers = #tpu.dot_dimension_numbers<[1], [1], [0], [0], [0, 0, 1, 0], [], []>, precision = #tpu.contract_precision<fp32>} : vector<16x8xf32>, vector<16x8xf32>, vector<16x16xf32> -> vector<16x16xf32>
    %251 = arith.addf %250, %3 : vector<16x16xf32>
    %cst_78 = arith.constant dense<0xFF800000> : vector<16xf32>
    %252 = vector.multi_reduction <maximumf>, %251, %cst_78 [1] : vector<16x16xf32> to vector<16xf32>
    %253 = vector.shape_cast %252 : vector<16xf32> to vector<16x1xf32>
    %254 = vector.broadcast %253 : vector<16x1xf32> to vector<16x16xf32>
    %255 = arith.subf %251, %254 : vector<16x16xf32>
    %256 = math.exp %255 : vector<16x16xf32>
    %cst_79 = arith.constant dense<0.000000e+00> : vector<16xf32>
    %257 = vector.multi_reduction <add>, %256, %cst_79 [1] : vector<16x16xf32> to vector<16xf32>
    %258 = vector.shape_cast %257 : vector<16xf32> to vector<16x1xf32>
    %259 = vector.broadcast %258 : vector<16x1xf32> to vector<16x16xf32>
    %260 = arith.divf %256, %259 : vector<16x16xf32>
    %cst_80 = arith.constant dense<0.000000e+00> : vector<16x8xf32>
    %261 = tpu.matmul %260, %249, %cst_80 {dimension_numbers = #tpu.dot_dimension_numbers<[1], [0], [0], [1], [0, 0, 1, 1], [], []>, precision = #tpu.contract_precision<fp32>} : vector<16x16xf32>, vector<16x8xf32>, vector<16x8xf32> -> vector<16x8xf32>
    %262 = vector.extract_strided_slice %211 {offsets = [16, 0], sizes = [8, 32], strides = [1, 1]} : vector<32x32xf32> to vector<8x32xf32>
    %cst_81 = arith.constant dense<0.000000e+00> : vector<16x32xf32>
    %263 = tpu.matmul %261, %262, %cst_81 {dimension_numbers = #tpu.dot_dimension_numbers<[1], [0], [0], [1], [0, 0, 1, 1], [], []>, precision = #tpu.contract_precision<fp32>} : vector<16x8xf32>, vector<8x32xf32>, vector<16x32xf32> -> vector<16x32xf32>
    %264 = arith.addf %246, %263 : vector<16x32xf32>
    %265 = vector.extract_strided_slice %209 {offsets = [0, 24], sizes = [16, 8], strides = [1, 1]} : vector<16x96xf32> to vector<16x8xf32>
    %266 = vector.extract_strided_slice %209 {offsets = [0, 56], sizes = [16, 8], strides = [1, 1]} : vector<16x96xf32> to vector<16x8xf32>
    %267 = vector.extract_strided_slice %209 {offsets = [0, 88], sizes = [16, 8], strides = [1, 1]} : vector<16x96xf32> to vector<16x8xf32>
    %cst_82 = arith.constant dense<0.000000e+00> : vector<16x16xf32>
    %268 = tpu.matmul %265, %266, %cst_82 {dimension_numbers = #tpu.dot_dimension_numbers<[1], [1], [0], [0], [0, 0, 1, 0], [], []>, precision = #tpu.contract_precision<fp32>} : vector<16x8xf32>, vector<16x8xf32>, vector<16x16xf32> -> vector<16x16xf32>
    %269 = arith.addf %268, %3 : vector<16x16xf32>
    %cst_83 = arith.constant dense<0xFF800000> : vector<16xf32>
    %270 = vector.multi_reduction <maximumf>, %269, %cst_83 [1] : vector<16x16xf32> to vector<16xf32>
    %271 = vector.shape_cast %270 : vector<16xf32> to vector<16x1xf32>
    %272 = vector.broadcast %271 : vector<16x1xf32> to vector<16x16xf32>
    %273 = arith.subf %269, %272 : vector<16x16xf32>
    %274 = math.exp %273 : vector<16x16xf32>
    %cst_84 = arith.constant dense<0.000000e+00> : vector<16xf32>
    %275 = vector.multi_reduction <add>, %274, %cst_84 [1] : vector<16x16xf32> to vector<16xf32>
    %276 = vector.shape_cast %275 : vector<16xf32> to vector<16x1xf32>
    %277 = vector.broadcast %276 : vector<16x1xf32> to vector<16x16xf32>
    %278 = arith.divf %274, %277 : vector<16x16xf32>
    %cst_85 = arith.constant dense<0.000000e+00> : vector<16x8xf32>
    %279 = tpu.matmul %278, %267, %cst_85 {dimension_numbers = #tpu.dot_dimension_numbers<[1], [0], [0], [1], [0, 0, 1, 1], [], []>, precision = #tpu.contract_precision<fp32>} : vector<16x16xf32>, vector<16x8xf32>, vector<16x8xf32> -> vector<16x8xf32>
    %280 = vector.extract_strided_slice %211 {offsets = [24, 0], sizes = [8, 32], strides = [1, 1]} : vector<32x32xf32> to vector<8x32xf32>
    %cst_86 = arith.constant dense<0.000000e+00> : vector<16x32xf32>
    %281 = tpu.matmul %279, %280, %cst_86 {dimension_numbers = #tpu.dot_dimension_numbers<[1], [0], [0], [1], [0, 0, 1, 1], [], []>, precision = #tpu.contract_precision<fp32>} : vector<16x8xf32>, vector<8x32xf32>, vector<16x32xf32> -> vector<16x32xf32>
    %282 = arith.addf %264, %281 : vector<16x32xf32>
    %283 = arith.addf %163, %282 : vector<16x32xf32>
    %284 = vector.shape_cast %169 : vector<32xf32> to vector<1x32xf32>
    %285 = vector.broadcast %284 : vector<1x32xf32> to vector<16x32xf32>
    %286 = arith.addf %283, %285 : vector<16x32xf32>
    %cst_87 = arith.constant dense<0.000000e+00> : vector<16xf32>
    %287 = vector.multi_reduction <add>, %286, %cst_87 [1] : vector<16x32xf32> to vector<16xf32>
    %288 = vector.shape_cast %287 : vector<16xf32> to vector<16x1xf32>
    %cst_88 = arith.constant 3.200000e+01 : f32
    %289 = vector.broadcast %cst_88 : f32 to vector<16x1xf32>
    %290 = arith.divf %288, %289 : vector<16x1xf32>
    %291 = vector.broadcast %290 : vector<16x1xf32> to vector<16x32xf32>
    %292 = arith.subf %286, %291 : vector<16x32xf32>
    %293 = arith.mulf %292, %292 : vector<16x32xf32>
    %cst_89 = arith.constant dense<0.000000e+00> : vector<16xf32>
    %294 = vector.multi_reduction <add>, %293, %cst_89 [1] : vector<16x32xf32> to vector<16xf32>
    %295 = vector.shape_cast %294 : vector<16xf32> to vector<16x1xf32>
    %cst_90 = arith.constant 3.100000e+01 : f32
    %296 = vector.broadcast %cst_90 : f32 to vector<16x1xf32>
    %297 = arith.divf %295, %296 : vector<16x1xf32>
    %298 = math.sqrt %297 : vector<16x1xf32>
    %cst_91 = arith.constant 9.99999997E-7 : f32
    %299 = vector.broadcast %cst_91 : f32 to vector<16x1xf32>
    %300 = arith.addf %298, %299 : vector<16x1xf32>
    %301 = vector.broadcast %300 : vector<16x1xf32> to vector<16x32xf32>
    %302 = arith.divf %292, %301 : vector<16x32xf32>
    %303 = vector.shape_cast %179 : vector<32xf32> to vector<1x32xf32>
    %304 = vector.broadcast %303 : vector<1x32xf32> to vector<16x32xf32>
    %305 = arith.mulf %304, %302 : vector<16x32xf32>
    %306 = vector.shape_cast %181 : vector<32xf32> to vector<1x32xf32>
    %307 = vector.broadcast %306 : vector<1x32xf32> to vector<16x32xf32>
    %308 = arith.addf %305, %307 : vector<16x32xf32>
    %c1_92 = arith.constant 1 : index
    %c0_93 = arith.constant 0 : index
    %c0_94 = arith.constant 0 : index
    %309 = vector.load %arg5[%c1_92, %c0_93, %c0_94] : memref<2x32x64xf32, #tpu.memory_space<vmem>>, vector<1x32x64xf32>
    %310 = vector.shape_cast %309 : vector<1x32x64xf32> to vector<32x64xf32>
    %cst_95 = arith.constant dense<0.000000e+00> : vector<16x64xf32>
    %311 = tpu.matmul %308, %310, %cst_95 {dimension_numbers = #tpu.dot_dimension_numbers<[1], [0], [0], [1], [0, 0, 1, 1], [], []>, precision = #tpu.contract_precision<fp32>} : vector<16x32xf32>, vector<32x64xf32>, vector<16x64xf32> -> vector<16x64xf32>
    %312 = vector.shape_cast %171 : vector<64xf32> to vector<1x64xf32>
    %313 = vector.broadcast %312 : vector<1x64xf32> to vector<16x64xf32>
    %314 = arith.addf %311, %313 : vector<16x64xf32>
    %cst_96 = arith.constant 0.000000e+00 : f32
    %315 = vector.broadcast %cst_96 : f32 to vector<16x64xf32>
    %316 = arith.maximumf %314, %315 : vector<16x64xf32>
    %c1_97 = arith.constant 1 : index
    %c0_98 = arith.constant 0 : index
    %c0_99 = arith.constant 0 : index
    %317 = vector.load %arg6[%c1_97, %c0_98, %c0_99] : memref<2x64x32xf32, #tpu.memory_space<vmem>>, vector<1x64x32xf32>
    %318 = vector.shape_cast %317 : vector<1x64x32xf32> to vector<64x32xf32>
    %cst_100 = arith.constant dense<0.000000e+00> : vector<16x32xf32>
    %319 = tpu.matmul %316, %318, %cst_100 {dimension_numbers = #tpu.dot_dimension_numbers<[1], [0], [0], [1], [0, 0, 1, 1], [], []>, precision = #tpu.contract_precision<fp32>} : vector<16x64xf32>, vector<64x32xf32>, vector<16x32xf32> -> vector<16x32xf32>
    %320 = vector.shape_cast %173 : vector<32xf32> to vector<1x32xf32>
    %321 = vector.broadcast %320 : vector<1x32xf32> to vector<16x32xf32>
    %322 = arith.addf %319, %321 : vector<16x32xf32>
    %323 = arith.addf %286, %322 : vector<16x32xf32>
    %c0_101 = arith.constant 0 : index
    %c0_102 = arith.constant 0 : index
    %324 = vector.load %arg8[%c0_101, %c0_102] : memref<2x32xf32, #tpu.memory_space<vmem>>, vector<2x32xf32>
    %325 = vector.extract_strided_slice %324 {offsets = [0, 0], sizes = [1, 32], strides = [1, 1]} : vector<2x32xf32> to vector<1x32xf32>
    %326 = vector.shape_cast %325 : vector<1x32xf32> to vector<32xf32>
    %327 = vector.extract_strided_slice %324 {offsets = [1, 0], sizes = [1, 32], strides = [1, 1]} : vector<2x32xf32> to vector<1x32xf32>
    %328 = vector.shape_cast %327 : vector<1x32xf32> to vector<32xf32>
    %cst_103 = arith.constant dense<0.000000e+00> : vector<16xf32>
    %329 = vector.multi_reduction <add>, %323, %cst_103 [1] : vector<16x32xf32> to vector<16xf32>
    %330 = vector.shape_cast %329 : vector<16xf32> to vector<16x1xf32>
    %cst_104 = arith.constant 3.200000e+01 : f32
    %331 = vector.broadcast %cst_104 : f32 to vector<16x1xf32>
    %332 = arith.divf %330, %331 : vector<16x1xf32>
    %333 = vector.broadcast %332 : vector<16x1xf32> to vector<16x32xf32>
    %334 = arith.subf %323, %333 : vector<16x32xf32>
    %335 = arith.mulf %334, %334 : vector<16x32xf32>
    %cst_105 = arith.constant dense<0.000000e+00> : vector<16xf32>
    %336 = vector.multi_reduction <add>, %335, %cst_105 [1] : vector<16x32xf32> to vector<16xf32>
    %337 = vector.shape_cast %336 : vector<16xf32> to vector<16x1xf32>
    %cst_106 = arith.constant 3.100000e+01 : f32
    %338 = vector.broadcast %cst_106 : f32 to vector<16x1xf32>
    %339 = arith.divf %337, %338 : vector<16x1xf32>
    %340 = math.sqrt %339 : vector<16x1xf32>
    %cst_107 = arith.constant 9.99999997E-7 : f32
    %341 = vector.broadcast %cst_107 : f32 to vector<16x1xf32>
    %342 = arith.addf %340, %341 : vector<16x1xf32>
    %343 = vector.broadcast %342 : vector<16x1xf32> to vector<16x32xf32>
    %344 = arith.divf %334, %343 : vector<16x32xf32>
    %345 = vector.shape_cast %326 : vector<32xf32> to vector<1x32xf32>
    %346 = vector.broadcast %345 : vector<1x32xf32> to vector<16x32xf32>
    %347 = arith.mulf %346, %344 : vector<16x32xf32>
    %348 = vector.shape_cast %328 : vector<32xf32> to vector<1x32xf32>
    %349 = vector.broadcast %348 : vector<1x32xf32> to vector<16x32xf32>
    %350 = arith.addf %347, %349 : vector<16x32xf32>
    %c0_108 = arith.constant 0 : index
    %c0_109 = arith.constant 0 : index
    %351 = vector.load %arg9[%c0_108, %c0_109] : memref<16x32xf32, #tpu.memory_space<vmem>>, vector<16x32xf32>
    tpu.vector_store %arg9[%c0_108, %c0_109], %350 {strides = array<i32>} : memref<16x32xf32, #tpu.memory_space<vmem>>, vector<16x32xf32>,
    return
  }
}

</mosaic_0001>

<bundles_post_ra>
// kernel: transformer_encode.1
= control target key start
LH: loop header
LB: loop body
LE: loop exit
PB: predicated region body
PF: predicated region fallthrough
CT: control target
= control target key end

     0   :  { %vm42_vm0 = vcmask 261120   ;;  %s20745_s0 = inlined_call_operand.vmem [shape: f32[16,32], index: 0, kind: input, shape index: {}]   ;;  %s20746_s1 = inlined_call_operand.vmem [shape: f32[16,32], index: 1, kind: input, shape index: {}]   ;;  %s20747_s2 = inlined_call_operand.vmem [shape: f32[16,16], index: 2, kind: input, shape index: {}]   ;;  %s20748_s3 = inlined_call_operand.vmem [shape: f32[2,32,96], index: 3, kind: input, shape index: {}]   ;;  %s20749_s4 = inlined_call_operand.vmem [shape: f32[2,32,32], index: 4, kind: input, shape index: {}]   ;;  %s20750_s5 = inlined_call_operand.vmem [shape: f32[2,32,64], index: 5, kind: input, shape index: {}]   ;;  %s20751_s6 = inlined_call_operand.vmem [shape: f32[2,64,32], index: 6, kind: input, shape index: {}]   ;;  %s20752_s7 = inlined_call_operand.vmem [shape: f32[2,8,96], index: 7, kind: input, shape index: {}]   ;;  %s20753_s8 = inlined_call_operand.vmem [shape: f32[2,32], index: 8, kind: input, shape index: {}]   ;;  %s20754_s9 = inlined_call_operand.hbm [shape: f32[16,32], index: 9, kind: output, shape index: {}]  }
   0x1   :  { %v33_v0 = vld [vmem:[%s20745_s0] sm:$0xff]  ;;  %v34_v2 = vld [vmem:[%s20745_s0 + $0x8] sm:$0xff] }
   0x2   :  { %v35_v1 = vld [vmem:[%s20746_s1] sm:$0xff]  ;;  %v36_v4 = vld [vmem:[%s20746_s1 + $0x8] sm:$0xff] }
   0x3   :  { %v19669_v3 = vadd.f32 %v35_v1, %v33_v0 }
   0x4   :  { %14 = vsyncpa [#allocation3], 0  ;;  %v19674_v5 = vadd.f32 %v36_v4, %v34_v2  ;;  %v97_v18 = vld [vmem:[%s20748_s3] sm:$0xff]  ;;  %v98_v19 = vld [vmem:[%s20748_s3 + $0x8] sm:$0xff]  ;;  %v85_v60 = vlaneseq  ;;  %vm649_vm5 = vcmask 64512   ;;  %s19596_s25 = smov 96  }
   0x5   :  { %v43_v6 = vsel %vm42_vm0, %v19669_v3, 0.0  ;;  %v99_v20 = vld [vmem:[%s20748_s3 + $0x10] sm:$0xff]  ;;  %v112_v21 = vand.u32 4294901760, %v97_v18  ;;  %v115_v22 = vand.u32 4294901760, %v98_v19  ;;  %v100_v23 = vld [vmem:[%s20748_s3 + $0x18] sm:$0xff]  ;;  %s19597_s26 = smov 88  }
   0x6   :  { %44 = vadd.xlane.f32.xlu0 %v43_v6  ;;  %v46_v7 = vsel %vm42_vm0, %v19674_v5, 0.0  ;;  %v118_v24 = vand.u32 4294901760, %v99_v20  ;;  %v121_v25 = vand.u32 4294901760, %v100_v23  ;;  %v19721_v2 = vshrl.u32 %v85_v60, 7  ;;  %s19598_s27 = smov 120   ;;  %s19599_s11 = smov 80  }
   0x7   :  { %v19704_v26 = vpack.c.bf16 %v115_v22, %v112_v21  ;;  %v202_v28 = vsub.f32 %v97_v18, %v112_v21  ;;  %v209_v29 = vsub.f32 %v98_v19, %v115_v22  ;;  %vm1160_vm6 = vcmask 130048   ;;  %s19600_s12 = smov 112   ;;  %s19601_s13 = smov 64  }
   0x8   :  { %v19706_v27 = vpack.c.bf16 %v121_v25, %v118_v24  ;;  %v216_v34 = vsub.f32 %v99_v20, %v118_v24  ;;  %v223_v35 = vsub.f32 %v100_v23, %v121_v25  ;;  %v87_v6 = vsub.s32 4, %v19721_v2  ;;  %s19602_s14 = smov 56   ;;  %s19603_s15 = smov 72  }
   0x9   :  { %18343 = vmatprep.subr.bf16.mxu0 %v19704_v26  ;;  %v203_v30 = vand.u32 4294901760, %v202_v28  ;;  %v210_v31 = vand.u32 4294901760, %v209_v29  ;;  %v18358_v46 = vpack.c.bf16 %v209_v29, %v202_v28  ;;  %s19604_s16 = smov 104   ;;  %s19605_s0 = smov 48   ;;  %vm7459_vm11 = vcmask 523264  }
   0xa   :  { %47 = vadd.xlane.f32.xlu0 %v46_v7  ;;  %18345 = vmatpush3.bf16.msra.mxu0 %v19704_v26  ;;  %v217_v38 = vand.u32 4294901760, %v216_v34  ;;  %v224_v39 = vand.u32 4294901760, %v223_v35  ;;  %v19715_v47 = vpack.c.bf16 %v223_v35, %v216_v34  ;;  %v41_v7 = vld [vmem:[%s20752_s7] sm:$0xff]  ;;  %s19606_s20 = smov 40  }
   0xb   :  { %18347 = vmatprep.subr.bf16.mxu0 %v19706_v27  ;;  %v204_v32 = vsub.f32 %v202_v28, %v203_v30  ;;  %v211_v33 = vsub.f32 %v209_v29, %v210_v31  ;;  %v19717_v48 = vpack.c.bf16 %v210_v31, %v203_v30 }
   0xc   :  { %v218_v41 = vsub.f32 %v216_v34, %v217_v38  ;;  %v225_v42 = vsub.f32 %v223_v35, %v224_v39  ;;  %v19719_v49 = vpack.c.bf16 %v224_v39, %v217_v38 }
   0xd   :  { %v205_v36 = vand.u32 4294901760, %v204_v32  ;;  %v212_v37 = vand.u32 4294901760, %v211_v33 }
   0xe   :  { %18349 = vmatpush3.bf16.msra.mxu0 %v19706_v27  ;;  %v219_v43 = vand.u32 4294901760, %v218_v41  ;;  %v226_v44 = vand.u32 4294901760, %v225_v42 }
   0xf   :  { %v19712_v40 = vpack.c.bf16 %v212_v37, %v205_v36 }
  0x10   :  { %v18354_v45 = vpack.c.bf16 %v226_v44, %v219_v43 }
  0x11   :  { %18351 = vmatprep.subr.bf16.mxu0 %v19712_v40 }
  0x93   :  { %v45_v8 = vpop.xlane.xlu0 %44 }
  0x94   :  { %v50_v9 = vmul.f32 0.03125, %v45_v8  ;;  %v93_v8 = vsub.s32 5, %v19721_v2 }
  0x96   :  { %v19681_v10 = vsub.f32 %v19669_v3, %v50_v9  ;;  %v88_v9 = vrot.slane %v41_v7, %v87_v6 }
  0x97   :  { %v48_v11 = vpop.xlane.xlu0 %47 }
  0x98   :  { %v51_v12 = vmul.f32 0.03125, %v48_v11  ;;  %v54_v13 = vmul.f32 %v19681_v10, %v19681_v10 }
  0x9a   :  { %v19686_v14 = vsub.f32 %v19674_v5, %v51_v12  ;;  %v56_v15 = vsel %vm42_vm0, %v54_v13, 0.0  ;;  %v94_v13 = vrot.slane %v41_v7, %v93_v8 }
  0x9b   :  { %57 = vadd.xlane.f32.xlu1 %v56_v15 }
  0x9c   :  { %v55_v16 = vmul.f32 %v19686_v14, %v19686_v14 }
  0x9e   :  { %v59_v17 = vsel %vm42_vm0, %v55_v16, 0.0 }
  0x9f   :  { %60 = vadd.xlane.f32.xlu1 %v59_v17 }
 0x128   :  { %v58_v50 = vpop.xlane.xlu1 %57 }
 0x129   :  { %v63_v51 = vmul.f32 0.032258064, %v58_v50 }
 0x12b   :  { %19464 = vrsqrt.f32 %v63_v51  ;;  %vm67_vm1 = vcmp.eq.f32.partialorder %v63_v51, inf  ;;  %v70_v56 = vand.u32 2147483648, %v63_v51  ;;  %vm69_vm2 = vcmp.eq.f32.partialorder %v63_v51, 0.0 }
 0x12c   :  { %v61_v52 = vpop.xlane.xlu1 %60 }
 0x12d   :  { %v64_v53 = vmul.f32 0.032258064, %v61_v52 }
 0x12f   :  { %19466 = vrsqrt.f32 %v64_v53  ;;  %vm74_vm3 = vcmp.eq.f32.partialorder %v64_v53, inf  ;;  %v77_v63 = vand.u32 2147483648, %v64_v53  ;;  %vm76_vm4 = vcmp.eq.f32.partialorder %v64_v53, 0.0 }
 0x135   :  { %v19465_v54 = vpop.eup %19464 }
 0x136   :  { %v66_v55 = vmul.f32 %v19465_v54, %v63_v51 }
 0x138   :  { %v68_v57 = vsel %vm67_vm1, %v63_v51, %v66_v55 }
 0x139   :  { %v19467_v58 = vpop.eup %19466  ;;  %v71_v59 = vsel %vm69_vm2, %v70_v56, %v68_v57 }
 0x13a   :  { %v79_v61 = vadd.f32 1e-06, %v71_v59  ;;  %v73_v62 = vmul.f32 %v19467_v58, %v64_v53 }
 0x13c   :  { %19468 = vrcp.f32 %v79_v61  ;;  %v75_v0 = vsel %vm74_vm3, %v64_v53, %v73_v62 }
 0x13d   :  { %v78_v1 = vsel %vm76_vm4, %v77_v63, %v75_v0 }
 0x13e   :  { %v80_v4 = vadd.f32 1e-06, %v78_v1 }
 0x140   :  { %19470 = vrcp.f32 %v80_v4 }
 0x146   :  { %v19469_v11 = vpop.eup %19468 }
 0x147   :  { %v82_v12 = vmul.f32 %v19469_v11, %v19681_v10 }
 0x149   :  { %v89_v15 = vmul.f32 %v88_v9, %v82_v12 }
 0x14a   :  { %v19471_v16 = vpop.eup %19470 }
 0x14b   :  { %v95_v17 = vadd.f32 %v94_v13, %v89_v15  ;;  %v84_v18 = vmul.f32 %v19471_v16, %v19686_v14  ;;  %v19752_v14 = vsub.s32 0, %v19721_v2 }
 0x14d   :  { %v106_v19 = vsel %vm42_vm0, %v95_v17, 0  ;;  %v90_v20 = vmul.f32 %v88_v9, %v84_v18  ;;  %v104_v34 = vrot.slane %v41_v7, %v19752_v14 }
 0x14e   :  { %v180_v21 = vand.u32 4294901760, %v106_v19 }
 0x14f   :  { %v96_v22 = vadd.f32 %v94_v13, %v90_v20 }
 0x150   :  { %v181_v23 = vsub.f32 %v106_v19, %v180_v21 }
 0x151   :  { %v109_v24 = vsel %vm42_vm0, %v96_v22, 0 }
 0x152   :  { %v182_v25 = vand.u32 4294901760, %v181_v23  ;;  %v190_v28 = vand.u32 4294901760, %v109_v24 }
 0x154   :  { %v183_v29 = vsub.f32 %v181_v23, %v182_v25  ;;  %v191_v10 = vsub.f32 %v109_v24, %v190_v28 }
 0x156   :  { %v184_v30 = vand.u32 4294901760, %v183_v29  ;;  %v192_v31 = vand.u32 4294901760, %v191_v10 }
 0x158   :  { %16946 = vmatprep.mubr.f32.mxu0 %v184_v30  ;;  %v193_v32 = vsub.f32 %v191_v10, %v192_v31 }
 0x15a   :  { %v194_v33 = vand.u32 4294901760, %v193_v32 }
 0x15c   :  { %16947 = vmatmul.mubr.f32.vlgmr.msra.gmra.mrb[0].mxu0 %v194_v33 }
 0x15d   :  { %18353 = vmatpush3.bf16.msra.mxu0 %v19712_v40  ;;  %16957 = vmatprep.mubr.f32.mxu0 %v180_v21 }
 0x15e   :  { %18355 = vmatprep.subr.bf16.mxu0 %v18354_v45 }
 0x161   :  { %18357 = vmatpush3.bf16.msra.mxu0 %v18354_v45 }
 0x162   :  { %18359 = vmatprep.subr.bf16.mxu0 %v18358_v46 }
 0x164   :  { %16958 = vmatmul.mubr.f32.vlgmr.msra.gmra.mrb[0].mxu0 %v190_v28 }
 0x165   :  { %18361 = vmatpush3.bf16.msra.mxu0 %v18358_v46  ;;  %16968 = vmatprep.mubr.f32.mxu0 %v181_v23 }
 0x166   :  { %18363 = vmatprep.subr.bf16.mxu0 %v19715_v47 }
 0x169   :  { %18365 = vmatpush3.bf16.msra.mxu0 %v19715_v47 }
 0x16a   :  { %18367 = vmatprep.subr.bf16.mxu0 %v19704_v26 }
 0x16c   :  { %16969 = vmatmul.mubr.f32.vlgmr.msra.gmra.mrb[0].mxu0 %v191_v10 }
 0x16d   :  { %18369 = vmatpush3.bf16.msra.mxu0 %v19704_v26  ;;  %16979 = vmatprep.mubr.f32.mxu0 %v182_v25 }
 0x16e   :  { %18371 = vmatprep.subr.bf16.mxu0 %v19706_v27 }
 0x171   :  { %18373 = vmatpush3.bf16.msra.mxu0 %v19706_v27 }
 0x172   :  { %18375 = vmatprep.subr.bf16.mxu0 %v19717_v48 }
 0x174   :  { %16980 = vmatmul.mubr.f32.vlgmr.msra.gmra.mrb[0].mxu0 %v192_v31 }
 0x175   :  { %18377 = vmatpush3.bf16.msra.mxu0 %v19717_v48  ;;  %16990 = vmatprep.mubr.f32.mxu0 %v180_v21 }
 0x176   :  { %18379 = vmatprep.subr.bf16.mxu0 %v19719_v49 }
 0x179   :  { %18381 = vmatpush3.bf16.msra.mxu0 %v19719_v49 }
 0x17a   :  { %18383 = vmatprep.subr.bf16.mxu0 %v19704_v26 }
 0x17c   :  { %16991 = vmatmul.mubr.f32.vlgmr.msra.gmra.mrb[0].mxu0 %v190_v28 }
 0x17d   :  { %18385 = vmatpush3.bf16.msra.mxu0 %v19704_v26  ;;  %17001 = vmatprep.mubr.f32.mxu0 %v180_v21 }
 0x17e   :  { %18387 = vmatprep.subr.bf16.mxu0 %v19706_v27 }
 0x181   :  { %18389 = vmatpush3.bf16.msra.mxu0 %v19706_v27 }
 0x184   :  { %17002 = vmatmul.mubr.f32.vlgmr.msra.gmra.mrb[0].mxu0 %v190_v28 }
 0x257   :  { %v17003_v35 = vpop.f32.mrb[0].mxu0 }
 0x258   :  { %v19755_v36 = vadd.f32 %v17003_v35, %v104_v34  ;;  %v629_v37 = vpop.f32.mrb[1].mxu0 }
 0x259   :  { %v19757_v38 = vadd.f32 %v629_v37, %v104_v34 }
 0x25a   :  { %647 = vrot.lane.b32.xlu1 %v19755_v36, %s19596_s25  ;;  %v652_v43 = vsel %vm649_vm5, %v19755_v36, 0 }
 0x25b   :  { %645 = vrot.lane.b32.xlu0 %v19757_v38, %s19596_s25  ;;  %v650_v26 = vsel %vm649_vm5, %v19757_v38, 0  ;;  %v19778_v44 = vand.u32 4294901760, %v652_v43 }
 0x25c   :  { %v19765_v27 = vand.u32 4294901760, %v650_v26 }
 0x25d   :  { %v736_v48 = vsub.f32 %v652_v43, %v19778_v44  ;;  %v19796_v43 = vld [vmem:[%s20747_s2 + $0x8] sm:$0xff] }
 0x25e   :  { %1703 = vrot.lane.b32.xlu1 %v19755_v36, %s19597_s26  ;;  %v726_v39 = vsub.f32 %v650_v26, %v19765_v27 }
 0x25f   :  { %1697 = vrot.lane.b32.xlu0 %v19757_v38, %s19598_s27  ;;  %v737_v55 = vand.u32 4294901760, %v736_v48 }
 0x260   :  { %v727_v40 = vand.u32 4294901760, %v726_v39 }
 0x261   :  { %v738_v60 = vsub.f32 %v736_v48, %v737_v55 }
 0x262   :  { %1701 = vrot.lane.b32.xlu1 %v19757_v38, %s19597_s26  ;;  %v728_v41 = vsub.f32 %v726_v39, %v727_v40 }
 0x263   :  { %v739_v63 = vand.u32 4294901760, %v738_v60 }
 0x264   :  { %v729_v42 = vand.u32 4294901760, %v728_v41 }
 0x266   :  { %1699 = vrot.lane.b32.xlu1 %v19755_v36, %s19598_s27  ;;  %17008 = vmatprep.mubr.f32.mxu1 %v729_v42 }
 0x2cc   :  { %v648_v45 = vpop.permute.xlu1 %647 }
 0x2cd   :  { %v656_v46 = vsel %vm649_vm5, %v648_v45, 0  ;;  %v646_v47 = vpop.permute.xlu0 %645 }
 0x2ce   :  { %v662_v49 = vand.u32 4294901760, %v656_v46  ;;  %v654_v50 = vsel %vm649_vm5, %v646_v47, 0 }
 0x2cf   :  { %v659_v51 = vand.u32 4294901760, %v654_v50 }
 0x2d0   :  { %v754_v52 = vsub.f32 %v656_v46, %v662_v49  ;;  %v1704_v4 = vpop.permute.xlu1 %1703 }
 0x2d1   :  { %v18390_v53 = vpack.c.bf16 %v662_v49, %v659_v51  ;;  %v747_v54 = vsub.f32 %v654_v50, %v659_v51  ;;  %v1698_v11 = vpop.permute.xlu0 %1697  ;;  %v1711_v13 = vsel %vm649_vm5, %v1704_v4, 0 }
 0x2d2   :  { %v755_v56 = vand.u32 4294901760, %v754_v52  ;;  %v1705_v15 = vsel %vm649_vm5, %v1698_v11, 0  ;;  %v1717_v17 = vand.u32 4294901760, %v1711_v13 }
 0x2d3   :  { %v748_v57 = vand.u32 4294901760, %v747_v54  ;;  %18391 = vmatprep.subr.bf16.mxu1 %v18390_v53  ;;  %v18398_v1 = vpack.c.bf16 %v754_v52, %v747_v54  ;;  %v1780_v18 = vand.u32 4294901760, %v1705_v15 }
 0x2d4   :  { %v756_v58 = vsub.f32 %v754_v52, %v755_v56  ;;  %18393 = vmatpush3.bf16.xpose.msra.mxu1 %v18390_v53  ;;  %v1702_v7 = vpop.permute.xlu1 %1701  ;;  %v1809_v21 = vsub.f32 %v1711_v13, %v1717_v17 }
 0x2d5   :  { %v749_v59 = vsub.f32 %v747_v54, %v748_v57  ;;  %v18406_v9 = vpack.c.bf16 %v755_v56, %v748_v57  ;;  %v1709_v12 = vsel %vm649_vm5, %v1702_v7, 0  ;;  %v1781_v22 = vsub.f32 %v1705_v15, %v1780_v18 }
 0x2d6   :  { %v757_v61 = vand.u32 4294901760, %v756_v58  ;;  %v1714_v16 = vand.u32 4294901760, %v1709_v12  ;;  %v1810_v25 = vand.u32 4294901760, %v1809_v21 }
 0x2d7   :  { %v750_v62 = vand.u32 4294901760, %v749_v59  ;;  %v1782_v29 = vand.u32 4294901760, %v1781_v22 }
 0x2d8   :  { %v1802_v19 = vsub.f32 %v1709_v12, %v1714_v16  ;;  %v1700_v20 = vpop.permute.xlu1 %1699  ;;  %v18438_v10 = vpack.c.bf16 %v1717_v17, %v1714_v16  ;;  %v1811_v31 = vsub.f32 %v1809_v21, %v1810_v25 }
 0x2d9   :  { %v18394_v0 = vpack.c.bf16 %v757_v61, %v750_v62  ;;  %v1707_v23 = vsel %vm649_vm5, %v1700_v20, 0  ;;  %v1783_v33 = vsub.f32 %v1781_v22, %v1782_v29 }
 0x2da   :  { %v1803_v24 = vand.u32 4294901760, %v1802_v19  ;;  %v1790_v28 = vand.u32 4294901760, %v1707_v23  ;;  %v1812_v37 = vand.u32 4294901760, %v1811_v31  ;;  %v18446_v42 = vpack.c.bf16 %v1809_v21, %v1802_v19 }
 0x2db   :  { %17009 = vmatmul.mubr.f32.vlgmr.msra.gmra.mrb[0].mxu1 %v739_v63  ;;  %18395 = vmatprep.subr.bf16.mxu1 %v18394_v0  ;;  %v1784_v26 = vand.u32 4294901760, %v1783_v33 }
 0x2dc   :  { %18397 = vmatpush3.bf16.xpose.msra.mxu1 %v18394_v0  ;;  %17015 = vmatprep.mubr.f32.mxu1 %v19765_v27  ;;  %v1804_v30 = vsub.f32 %v1802_v19, %v1803_v24  ;;  %v1791_v32 = vsub.f32 %v1707_v23, %v1790_v28 }
 0x2dd   :  { %18399 = vmatprep.subr.bf16.mxu1 %v18398_v1 }
 0x2de   :  { %v1805_v34 = vand.u32 4294901760, %v1804_v30  ;;  %v1792_v35 = vand.u32 4294901760, %v1791_v32 }
 0x2e3   :  { %17016 = vmatmul.mubr.f32.vlgmr.msra.gmra.mrb[0].mxu1 %v19778_v44 }
 0x2e4   :  { %18401 = vmatpush3.bf16.xpose.msra.mxu1 %v18398_v1  ;;  %17022 = vmatprep.mubr.f32.mxu1 %v726_v39  ;;  %v18442_v39 = vpack.c.bf16 %v1812_v37, %v1805_v34 }
 0x2e5   :  { %18403 = vmatprep.subr.bf16.mxu1 %v18390_v53 }
 0x2eb   :  { %17023 = vmatmul.mubr.f32.vlgmr.msra.gmra.mrb[0].mxu1 %v736_v48 }
 0x2ec   :  { %18405 = vmatpush3.bf16.xpose.msra.mxu1 %v18390_v53  ;;  %17029 = vmatprep.mubr.f32.mxu1 %v727_v40  ;;  %v1793_v40 = vsub.f32 %v1791_v32, %v1792_v35 }
 0x2ed   :  { %18407 = vmatprep.subr.bf16.mxu1 %v18406_v9 }
 0x2ee   :  { %v1794_v41 = vand.u32 4294901760, %v1793_v40 }
 0x2f3   :  { %17030 = vmatmul.mubr.f32.vlgmr.msra.gmra.mrb[0].mxu1 %v737_v55 }
 0x2f4   :  { %18409 = vmatpush3.bf16.xpose.msra.mxu1 %v18406_v9  ;;  %17036 = vmatprep.mubr.f32.mxu1 %v19765_v27 }
 0x2f5   :  { %18411 = vmatprep.subr.bf16.mxu1 %v18390_v53 }
 0x2fb   :  { %17037 = vmatmul.mubr.f32.vlgmr.msra.gmra.mrb[0].mxu1 %v19778_v44 }
 0x2fc   :  { %18413 = vmatpush3.bf16.xpose.msra.mxu1 %v18390_v53  ;;  %17043 = vmatprep.mubr.f32.mxu1 %v19765_v27  ;;  %v18454_v27 = vpack.c.bf16 %v1810_v25, %v1803_v24 }
 0x2fd   :  { %18439 = vmatprep.subr.bf16.mxu1 %v18438_v10 }
 0x303   :  { %17044 = vmatmul.mubr.f32.vlgmr.msra.gmra.mrb[0].mxu1 %v19778_v44  ;;  %v19801_v44 = vld [vmem:[%s20747_s2] sm:$0xff] }
 0x304   :  { %18441 = vmatpush3.bf16.xpose.msra.mxu1 %v18438_v10  ;;  %17092 = vmatprep.mubr.f32.mxu1 %v1784_v26 }
 0x305   :  { %18443 = vmatprep.subr.bf16.mxu1 %v18442_v39 }
 0x30b   :  { %17093 = vmatmul.mubr.f32.vlgmr.msra.gmra.mrb[2].mxu1 %v1794_v41 }
 0x30c   :  { %18445 = vmatpush3.bf16.xpose.msra.mxu1 %v18442_v39  ;;  %17099 = vmatprep.mubr.f32.mxu1 %v1780_v18 }
 0x30d   :  { %18447 = vmatprep.subr.bf16.mxu1 %v18446_v42 }
 0x313   :  { %17100 = vmatmul.mubr.f32.vlgmr.msra.gmra.mrb[2].mxu1 %v1790_v28 }
 0x314   :  { %18449 = vmatpush3.bf16.xpose.msra.mxu1 %v18446_v42  ;;  %17106 = vmatprep.mubr.f32.mxu1 %v1781_v22 }
 0x315   :  { %18451 = vmatprep.subr.bf16.mxu1 %v18438_v10 }
 0x31b   :  { %17107 = vmatmul.mubr.f32.vlgmr.msra.gmra.mrb[2].mxu1 %v1791_v32 }
 0x31c   :  { %18453 = vmatpush3.bf16.xpose.msra.mxu1 %v18438_v10  ;;  %17113 = vmatprep.mubr.f32.mxu1 %v1782_v29 }
 0x31d   :  { %18455 = vmatprep.subr.bf16.mxu1 %v18454_v27 }
 0x323   :  { %17114 = vmatmul.mubr.f32.vlgmr.msra.gmra.mrb[2].mxu1 %v1792_v35 }
 0x324   :  { %18457 = vmatpush3.bf16.xpose.msra.mxu1 %v18454_v27  ;;  %17120 = vmatprep.mubr.f32.mxu1 %v1780_v18 }
 0x325   :  { %18459 = vmatprep.subr.bf16.mxu1 %v18438_v10 }
 0x32b   :  { %17121 = vmatmul.mubr.f32.vlgmr.msra.gmra.mrb[2].mxu1 %v1790_v28 }
 0x32c   :  { %18461 = vmatpush3.bf16.xpose.msra.mxu1 %v18438_v10  ;;  %17127 = vmatprep.mubr.f32.mxu1 %v1780_v18 }
 0x333   :  { %17128 = vmatmul.mubr.f32.vlgmr.msra.gmra.mrb[2].mxu1 %v1790_v28 }
 0x3d6   :  { %v17045_v45 = vpop.f32.mrb[0].mxu1 }
 0x3d7   :  { %v19112_v46 = vadd.f32 %v17045_v45, %v19796_v43  ;;  %v1150_v47 = vpop.f32.mrb[1].mxu1 }
 0x3d8   :  { %v19113_v48 = vadd.f32 %v1150_v47, %v19801_v44 }
 0x3d9   :  { %v1164_v49 = vsel %vm1160_vm6, %v19112_v46, -inf }
 0x3da   :  { %1165 = vmax.xlane.f32.xlu1 %v1164_v49  ;;  %v1161_v50 = vsel %vm1160_vm6, %v19113_v48, -inf }
 0x3db   :  { %1162 = vmax.xlane.f32.xlu0 %v1161_v50 }
 0x3eb   :  { %3747 = vrot.lane.b32.xlu1 %v19755_v36, %s19599_s11 }
 0x3ef   :  { %3741 = vrot.lane.b32.xlu1 %v19757_v38, %s19600_s12 }
 0x3f3   :  { %3743 = vrot.lane.b32.xlu1 %v19755_v36, %s19600_s12 }
 0x406   :  { %v17129_v51 = vpop.f32.mrb[2].mxu1 }
 0x407   :  { %v19114_v52 = vadd.f32 %v17129_v51, %v19796_v43  ;;  %v2205_v53 = vpop.f32.mrb[3].mxu1 }
 0x408   :  { %v19115_v54 = vadd.f32 %v2205_v53, %v19801_v44 }
 0x409   :  { %v2218_v55 = vsel %vm1160_vm6, %v19114_v52, -inf }
 0x40a   :  { %2219 = vmax.xlane.f32.xlu0 %v2218_v55  ;;  %v2215_v56 = vsel %vm1160_vm6, %v19115_v54, -inf }
 0x40e   :  { %2216 = vmax.xlane.f32.xlu0 %v2215_v56 }
 0x424   :  { %3745 = vrot.lane.b32.xlu0 %v19757_v38, %s19599_s11 }
 0x467   :  { %v1166_v57 = vpop.xlane.xlu1 %1165 }
 0x468   :  { %v1168_v58 = vsub.f32 %v19112_v46, %v1166_v57  ;;  %v1163_v59 = vpop.xlane.xlu0 %1162 }
 0x469   :  { %v1167_v60 = vsub.f32 %v19113_v48, %v1163_v59 }
 0x46a   :  { %v1171_v61 = vmul.f32 1.442695, %v1168_v58 }
 0x46b   :  { %v1169_v62 = vmul.f32 1.442695, %v1167_v60  ;;  %v3748_v63 = vpop.permute.xlu1 %3747 }
 0x46c   :  { %19472 = vpow2.f32 %v1171_v61  ;;  %v3755_v19 = vsel %vm649_vm5, %v3748_v63, 0 }
 0x46d   :  { %19474 = vpow2.f32 %v1169_v62  ;;  %v3761_v23 = vand.u32 4294901760, %v3755_v19 }
 0x46f   :  { %v3742_v0 = vpop.permute.xlu1 %3741  ;;  %v3853_v10 = vsub.f32 %v3755_v19, %v3761_v23 }
 0x470   :  { %v3749_v1 = vsel %vm649_vm5, %v3742_v0, 0 }
 0x471   :  { %v19820_v4 = vand.u32 4294901760, %v3749_v1  ;;  %v3854_v34 = vand.u32 4294901760, %v3853_v10 }
 0x473   :  { %v19823_v7 = vsub.f32 %v3749_v1, %v19820_v4  ;;  %v3744_v18 = vpop.permute.xlu1 %3743  ;;  %v3855_v40 = vsub.f32 %v3853_v10, %v3854_v34 }
 0x474   :  { %v3751_v21 = vsel %vm649_vm5, %v3744_v18, 0 }
 0x475   :  { %v3826_v9 = vand.u32 4294901760, %v19823_v7  ;;  %v3834_v24 = vand.u32 4294901760, %v3751_v21  ;;  %v3856_v47 = vand.u32 4294901760, %v3855_v40 }
 0x476   :  { %v19826_v11 = vpop.eup %19472 }
 0x477   :  { %v19828_v12 = vpop.eup %19474  ;;  %v1176_v13 = vsel %vm1160_vm6, %v19826_v11, 0.0  ;;  %v3827_v15 = vsub.f32 %v19823_v7, %v3826_v9  ;;  %v3835_v31 = vsub.f32 %v3751_v21, %v3834_v24 }
 0x478   :  { %1177 = vadd.xlane.f32.xlu1 %v1176_v13  ;;  %v1173_v16 = vsel %vm1160_vm6, %v19828_v12, 0.0 }
 0x479   :  { %1174 = vadd.xlane.f32.xlu0 %v1173_v16  ;;  %v3828_v17 = vand.u32 4294901760, %v3827_v15  ;;  %v3836_v37 = vand.u32 4294901760, %v3835_v31 }
 0x47b   :  { %17236 = vmatprep.mubr.f32.mxu1 %v3828_v17  ;;  %v3837_v42 = vsub.f32 %v3835_v31, %v3836_v37 }
 0x47d   :  { %v3838_v49 = vand.u32 4294901760, %v3837_v42 }
 0x489   :  { %1185 = vrot.lane.b32.xlu1 %v19755_v36, %s19601_s13 }
 0x48f   :  { %1183 = vrot.lane.b32.xlu0 %v19757_v38, %s19601_s13 }
 0x497   :  { %v2220_v20 = vpop.xlane.xlu0 %2219 }
 0x498   :  { %v2222_v22 = vsub.f32 %v19114_v52, %v2220_v20 }
 0x49a   :  { %v2225_v25 = vmul.f32 1.442695, %v2222_v22 }
 0x49b   :  { %v2217_v28 = vpop.xlane.xlu0 %2216 }
 0x49c   :  { %v2221_v29 = vsub.f32 %v19115_v54, %v2217_v28  ;;  %19476 = vpow2.f32 %v2225_v25 }
 0x49e   :  { %v2223_v30 = vmul.f32 1.442695, %v2221_v29 }
 0x49f   :  { %v3746_v32 = vpop.permute.xlu0 %3745 }
 0x4a0   :  { %19478 = vpow2.f32 %v2223_v30  ;;  %v3753_v33 = vsel %vm649_vm5, %v3746_v32, 0 }
 0x4a1   :  { %v3758_v35 = vand.u32 4294901760, %v3753_v33 }
 0x4a3   :  { %v18486_v26 = vpack.c.bf16 %v3761_v23, %v3758_v35  ;;  %v3846_v39 = vsub.f32 %v3753_v33, %v3758_v35 }
 0x4a5   :  { %v3847_v41 = vand.u32 4294901760, %v3846_v39  ;;  %18487 = vmatprep.subr.bf16.mxu1 %v18486_v26  ;;  %v18494_v53 = vpack.c.bf16 %v3853_v10, %v3846_v39 }
 0x4a6   :  { %18489 = vmatpush3.bf16.xpose.msra.mxu1 %v18486_v26  ;;  %v19844_v45 = vpop.eup %19476 }
 0x4a7   :  { %v3848_v27 = vsub.f32 %v3846_v39, %v3847_v41  ;;  %v2230_v51 = vsel %vm1160_vm6, %v19844_v45, 0.0  ;;  %v18502_v54 = vpack.c.bf16 %v3854_v34, %v3847_v41 }
 0x4a9   :  { %v3849_v46 = vand.u32 4294901760, %v3848_v27 }
 0x4aa   :  { %v19846_v48 = vpop.eup %19478 }
 0x4ab   :  { %v18490_v50 = vpack.c.bf16 %v3856_v47, %v3849_v46  ;;  %v2227_v52 = vsel %vm1160_vm6, %v19846_v48, 0.0 }
 0x4ad   :  { %2231 = vadd.xlane.f32.xlu1 %v2230_v51  ;;  %17237 = vmatmul.mubr.f32.vlgmr.msra.gmra.mrb[4].mxu1 %v3838_v49 }
 0x4ae   :  { %18491 = vmatprep.subr.bf16.mxu1 %v18490_v50  ;;  %2228 = vadd.xlane.f32.xlu0 %v2227_v52 }
 0x4af   :  { %18493 = vmatpush3.bf16.xpose.msra.mxu1 %v18490_v50  ;;  %17243 = vmatprep.mubr.f32.mxu1 %v19820_v4 }
 0x4b0   :  { %18495 = vmatprep.subr.bf16.mxu1 %v18494_v53 }
 0x4b6   :  { %17244 = vmatmul.mubr.f32.vlgmr.msra.gmra.mrb[4].mxu1 %v3834_v24 }
 0x4b7   :  { %18497 = vmatpush3.bf16.xpose.msra.mxu1 %v18494_v53  ;;  %17250 = vmatprep.mubr.f32.mxu1 %v19823_v7 }
 0x4b8   :  { %18499 = vmatprep.subr.bf16.mxu1 %v18486_v26 }
 0x4be   :  { %17251 = vmatmul.mubr.f32.vlgmr.msra.gmra.mrb[4].mxu1 %v3835_v31  ;;  %2239 = vrot.lane.b32.xlu1 %v19755_v36, %s19602_s14 }
 0x4bf   :  { %18501 = vmatpush3.bf16.xpose.msra.mxu1 %v18486_v26  ;;  %17257 = vmatprep.mubr.f32.mxu1 %v3826_v9 }
 0x4c0   :  { %18503 = vmatprep.subr.bf16.mxu1 %v18502_v54 }
 0x4c2   :  { %5298 = vrot.lane.b32.xlu1 %v19755_v36, %s19603_s15 }
 0x4c4   :  { %2237 = vrot.lane.b32.xlu0 %v19757_v38, %s19602_s14 }
 0x4c6   :  { %17258 = vmatmul.mubr.f32.vlgmr.msra.gmra.mrb[4].mxu1 %v3836_v37  ;;  %5294 = vrot.lane.b32.xlu1 %v19755_v36, %s19604_s16 }
 0x4c7   :  { %18505 = vmatpush3.bf16.xpose.msra.mxu1 %v18502_v54  ;;  %17264 = vmatprep.mubr.f32.mxu1 %v19820_v4 }
 0x4c8   :  { %18507 = vmatprep.subr.bf16.mxu1 %v18486_v26  ;;  %5296 = vrot.lane.b32.xlu0 %v19757_v38, %s19603_s15 }
 0x4cc   :  { %5292 = vrot.lane.b32.xlu0 %v19757_v38, %s19604_s16 }
 0x4ce   :  { %17265 = vmatmul.mubr.f32.vlgmr.msra.gmra.mrb[4].mxu1 %v3834_v24 }
 0x4cf   :  { %18509 = vmatpush3.bf16.xpose.msra.mxu1 %v18486_v26  ;;  %17271 = vmatprep.mubr.f32.mxu1 %v19820_v4 }
 0x4d6   :  { %17272 = vmatmul.mubr.f32.vlgmr.msra.gmra.mrb[4].mxu1 %v3834_v24 }
 0x505   :  { %v1178_v55 = vpop.xlane.xlu1 %1177 }
 0x506   :  { %19480 = vrcp.f32 %v1178_v55  ;;  %v1175_v56 = vpop.xlane.xlu0 %1174 }
 0x507   :  { %19482 = vrcp.f32 %v1175_v56 }
 0x509   :  { %v1186_v57 = vpop.permute.xlu1 %1185 }
 0x50a   :  { %v1199_v58 = vand.u32 4294901760, %v1186_v57  ;;  %v1184_v59 = vpop.permute.xlu0 %1183 }
 0x50b   :  { %v1196_v60 = vand.u32 4294901760, %v1184_v59 }
 0x50c   :  { %v1291_v61 = vsub.f32 %v1186_v57, %v1199_v58 }
 0x50d   :  { %v18414_v62 = vpack.c.bf16 %v1199_v58, %v1196_v60  ;;  %v1284_v63 = vsub.f32 %v1184_v59, %v1196_v60 }
 0x50e   :  { %v1292_v0 = vand.u32 4294901760, %v1291_v61 }
 0x50f   :  { %v1285_v1 = vand.u32 4294901760, %v1284_v63  ;;  %18415 = vmatprep.subr.bf16.mxu0 %v18414_v62  ;;  %v18422_v31 = vpack.c.bf16 %v1291_v61, %v1284_v63 }
 0x510   :  { %v19481_v7 = vpop.eup %19480  ;;  %v1293_v9 = vsub.f32 %v1291_v61, %v1292_v0  ;;  %18417 = vmatpush3.bf16.msra.mxu0 %v18414_v62 }
 0x511   :  { %v19483_v13 = vpop.eup %19482  ;;  %v1182_v4 = vmul.f32 %v19481_v7, %v19826_v11  ;;  %v1286_v15 = vsub.f32 %v1284_v63, %v1285_v1  ;;  %v18430_v32 = vpack.c.bf16 %v1292_v0, %v1285_v1 }
 0x512   :  { %v1180_v16 = vmul.f32 %v19483_v13, %v19828_v12  ;;  %v1294_v17 = vand.u32 4294901760, %v1293_v9 }
 0x513   :  { %v1287_v18 = vand.u32 4294901760, %v1286_v15  ;;  %v1193_v19 = vsel %vm1160_vm6, %v1182_v4, 0 }
 0x514   :  { %v1190_v20 = vsel %vm1160_vm6, %v1180_v16, 0  ;;  %v19874_v21 = vand.u32 4294901760, %v1193_v19 }
 0x515   :  { %v18418_v22 = vpack.c.bf16 %v1294_v17, %v1287_v18  ;;  %v1262_v23 = vand.u32 4294901760, %v1190_v20 }
 0x516   :  { %v1273_v24 = vsub.f32 %v1193_v19, %v19874_v21 }
 0x517   :  { %18419 = vmatprep.subr.bf16.mxu0 %v18418_v22  ;;  %v1263_v25 = vsub.f32 %v1190_v20, %v1262_v23 }
 0x518   :  { %v1274_v28 = vand.u32 4294901760, %v1273_v24 }
 0x519   :  { %v1264_v29 = vand.u32 4294901760, %v1263_v25 }
 0x51a   :  { %v1275_v11 = vsub.f32 %v1273_v24, %v1274_v28 }
 0x51b   :  { %v1265_v10 = vsub.f32 %v1263_v25, %v1264_v29 }
 0x51c   :  { %v1276_v12 = vand.u32 4294901760, %v1275_v11 }
 0x51d   :  { %v1266_v30 = vand.u32 4294901760, %v1265_v10 }
 0x51f   :  { %17050 = vmatprep.mubr.f32.mxu0 %v1266_v30 }
 0x520   :  { %17051 = vmatmul.mubr.f32.vlgmr.msra.gmra.mrb[2].mxu0 %v1276_v12 }
 0x521   :  { %18421 = vmatpush3.bf16.msra.mxu0 %v18418_v22  ;;  %17057 = vmatprep.mubr.f32.mxu0 %v1262_v23 }
 0x522   :  { %18423 = vmatprep.subr.bf16.mxu0 %v18422_v31 }
 0x528   :  { %17058 = vmatmul.mubr.f32.vlgmr.msra.gmra.mrb[2].mxu0 %v19874_v21 }
 0x529   :  { %18425 = vmatpush3.bf16.msra.mxu0 %v18422_v31  ;;  %17064 = vmatprep.mubr.f32.mxu0 %v1263_v25 }
 0x52a   :  { %18427 = vmatprep.subr.bf16.mxu0 %v18414_v62 }
 0x530   :  { %17065 = vmatmul.mubr.f32.vlgmr.msra.gmra.mrb[2].mxu0 %v1273_v24 }
 0x531   :  { %18429 = vmatpush3.bf16.msra.mxu0 %v18414_v62  ;;  %17071 = vmatprep.mubr.f32.mxu0 %v1264_v29 }
 0x532   :  { %18431 = vmatprep.subr.bf16.mxu0 %v18430_v32 }
 0x538   :  { %17072 = vmatmul.mubr.f32.vlgmr.msra.gmra.mrb[2].mxu0 %v1274_v28 }
 0x539   :  { %18433 = vmatpush3.bf16.msra.mxu0 %v18430_v32  ;;  %17078 = vmatprep.mubr.f32.mxu0 %v1262_v23 }
 0x53a   :  { %18435 = vmatprep.subr.bf16.mxu0 %v18414_v62  ;;  %v2232_v33 = vpop.xlane.xlu1 %2231 }
 0x53b   :  { %19484 = vrcp.f32 %v2232_v33  ;;  %v2229_v34 = vpop.xlane.xlu0 %2228 }
 0x53c   :  { %19486 = vrcp.f32 %v2229_v34 }
 0x53e   :  { %v2240_v35 = vpop.permute.xlu1 %2239 }
 0x53f   :  { %v2253_v37 = vand.u32 4294901760, %v2240_v35  ;;  %v2238_v26 = vpop.permute.xlu0 %2237 }
 0x540   :  { %v2250_v39 = vand.u32 4294901760, %v2238_v26  ;;  %17079 = vmatmul.mubr.f32.vlgmr.msra.gmra.mrb[2].mxu0 %v19874_v21 }
 0x541   :  { %v19879_v40 = vsub.f32 %v2240_v35, %v2253_v37  ;;  %18437 = vmatpush3.bf16.msra.mxu0 %v18414_v62  ;;  %17085 = vmatprep.mubr.f32.mxu0 %v1262_v23 }
 0x542   :  { %v19881_v41 = vpack.c.bf16 %v2253_v37, %v2250_v39  ;;  %v19883_v42 = vsub.f32 %v2238_v26, %v2250_v39  ;;  %v5299_v27 = vpop.permute.xlu1 %5298 }
 0x543   :  { %v2346_v46 = vand.u32 4294901760, %v19879_v40  ;;  %v5306_v47 = vsel %vm649_vm5, %v5299_v27, 0  ;;  %v5297_v49 = vpop.permute.xlu0 %5296 }
 0x544   :  { %v2339_v50 = vand.u32 4294901760, %v19883_v42  ;;  %v5312_v51 = vand.u32 4294901760, %v5306_v47  ;;  %v5304_v52 = vsel %vm649_vm5, %v5297_v49, 0  ;;  %18463 = vmatprep.subr.bf16.mxu0 %v19881_v41 }
 0x545   :  { %v19485_v53 = vpop.eup %19484  ;;  %v2347_v54 = vsub.f32 %v19879_v40, %v2346_v46  ;;  %v5309_v55 = vand.u32 4294901760, %v5304_v52 }
 0x546   :  { %v19487_v56 = vpop.eup %19486  ;;  %v2236_v57 = vmul.f32 %v19485_v53, %v19844_v45  ;;  %v2340_v58 = vsub.f32 %v19883_v42, %v2339_v50  ;;  %v19897_v59 = vsub.f32 %v5306_v47, %v5312_v51  ;;  %v5295_v60 = vpop.permute.xlu1 %5294  ;;  %v18478_v53 = vpack.c.bf16 %v2346_v46, %v2339_v50 }
 0x547   :  { %v2234_v61 = vmul.f32 %v19487_v56, %v19846_v48  ;;  %v19900_v62 = vpack.c.bf16 %v5312_v51, %v5309_v55  ;;  %v19902_v63 = vsub.f32 %v5304_v52, %v5309_v55  ;;  %v5302_v0 = vsel %vm649_vm5, %v5295_v60, 0  ;;  %v5293_v1 = vpop.permute.xlu0 %5292 }
 0x548   :  { %v5405_v7 = vand.u32 4294901760, %v19897_v59  ;;  %v19906_v9 = vand.u32 4294901760, %v5302_v0  ;;  %v5300_v45 = vsel %vm649_vm5, %v5293_v1, 0  ;;  %17086 = vmatmul.mubr.f32.vlgmr.msra.gmra.mrb[2].mxu0 %v19874_v21  ;;  %v2341_v13 = vand.u32 4294901760, %v2340_v58 }
 0x549   :  { %v5398_v4 = vand.u32 4294901760, %v19902_v63  ;;  %v19911_v15 = vand.u32 4294901760, %v5300_v45  ;;  %18465 = vmatpush3.bf16.msra.mxu0 %v19881_v41  ;;  %18535 = vmatprep.subr.bf16.mxu1 %v19900_v62  ;;  %v2348_v48 = vand.u32 4294901760, %v2347_v54  ;;  %v2244_v16 = vsel %vm1160_vm6, %v2234_v61, 0 }
 0x54a   :  { %v5406_v17 = vsub.f32 %v19897_v59, %v5405_v7  ;;  %v5386_v18 = vsub.f32 %v5302_v0, %v19906_v9  ;;  %18537 = vmatpush3.bf16.xpose.msra.mxu1 %v19900_v62  ;;  %v19919_v19 = vand.u32 4294901760, %v2244_v16  ;;  %v2247_v20 = vsel %vm1160_vm6, %v2236_v57, 0 }
 0x54b   :  { %v5399_v21 = vsub.f32 %v19902_v63, %v5398_v4  ;;  %v5376_v22 = vsub.f32 %v5300_v45, %v19911_v15  ;;  %v18466_v23 = vpack.c.bf16 %v2348_v48, %v2341_v13  ;;  %v19924_v24 = vand.u32 4294901760, %v2247_v20 }
 0x54c   :  { %v5387_v25 = vand.u32 4294901760, %v5386_v18  ;;  %v5407_v28 = vand.u32 4294901760, %v5406_v17  ;;  %v2317_v29 = vsub.f32 %v2244_v16, %v19919_v19  ;;  %v18542_v49 = vpack.c.bf16 %v19897_v59, %v19902_v63 }
 0x54d   :  { %v5377_v11 = vand.u32 4294901760, %v5376_v22  ;;  %18467 = vmatprep.subr.bf16.mxu0 %v18466_v23  ;;  %v5400_v10 = vand.u32 4294901760, %v5399_v21  ;;  %v2327_v30 = vsub.f32 %v2247_v20, %v19924_v24  ;;  %v18470_v51 = vpack.c.bf16 %v19879_v40, %v19883_v42 }
 0x54e   :  { %v5388_v12 = vsub.f32 %v5386_v18, %v5387_v25  ;;  %v2318_v31 = vand.u32 4294901760, %v2317_v29  ;;  %v18550_v52 = vpack.c.bf16 %v5405_v7, %v5398_v4 }
 0x54f   :  { %v18538_v32 = vpack.c.bf16 %v5407_v28, %v5400_v10  ;;  %v5378_v33 = vsub.f32 %v5376_v22, %v5377_v11  ;;  %v2328_v34 = vand.u32 4294901760, %v2327_v30 }
 0x550   :  { %v2319_v35 = vsub.f32 %v2317_v29, %v2318_v31  ;;  %v5389_v39 = vand.u32 4294901760, %v5388_v12 }
 0x551   :  { %18539 = vmatprep.subr.bf16.mxu1 %v18538_v32  ;;  %v5379_v37 = vand.u32 4294901760, %v5378_v33  ;;  %v2329_v26 = vsub.f32 %v2327_v30, %v2328_v34 }
 0x552   :  { %v2320_v27 = vand.u32 4294901760, %v2319_v35 }
 0x553   :  { %17350 = vmatprep.mubr.f32.mxu1 %v5379_v37  ;;  %v2330_v47 = vand.u32 4294901760, %v2329_v26 }
 0x554   :  { %17134 = vmatprep.mubr.f32.mxu0 %v2320_v27  ;;  %17351 = vmatmul.mubr.f32.vlgmr.msra.gmra.mrb[6].mxu1 %v5389_v39 }
 0x555   :  { %18541 = vmatpush3.bf16.xpose.msra.mxu1 %v18538_v32  ;;  %17135 = vmatmul.mubr.f32.vlgmr.msra.gmra.mrb[4].mxu0 %v2330_v47 }
 0x556   :  { %18469 = vmatpush3.bf16.msra.mxu0 %v18466_v23  ;;  %17357 = vmatprep.mubr.f32.mxu1 %v19911_v15 }
 0x557   :  { %18543 = vmatprep.subr.bf16.mxu1 %v18542_v49  ;;  %17141 = vmatprep.mubr.f32.mxu0 %v19919_v19 }
 0x558   :  { %18471 = vmatprep.subr.bf16.mxu0 %v18470_v51 }
 0x55c   :  { %17358 = vmatmul.mubr.f32.vlgmr.msra.gmra.mrb[6].mxu1 %v19906_v9 }
 0x55d   :  { %18545 = vmatpush3.bf16.xpose.msra.mxu1 %v18542_v49  ;;  %17142 = vmatmul.mubr.f32.vlgmr.msra.gmra.mrb[4].mxu0 %v19924_v24 }
 0x55e   :  { %18473 = vmatpush3.bf16.msra.mxu0 %v18470_v51  ;;  %17364 = vmatprep.mubr.f32.mxu1 %v5376_v22 }
 0x55f   :  { %18547 = vmatprep.subr.bf16.mxu1 %v19900_v62  ;;  %17148 = vmatprep.mubr.f32.mxu0 %v2317_v29 }
 0x560   :  { %18475 = vmatprep.subr.bf16.mxu0 %v19881_v41 }
 0x564   :  { %17365 = vmatmul.mubr.f32.vlgmr.msra.gmra.mrb[6].mxu1 %v5386_v18 }
 0x565   :  { %18549 = vmatpush3.bf16.xpose.msra.mxu1 %v19900_v62  ;;  %17149 = vmatmul.mubr.f32.vlgmr.msra.gmra.mrb[4].mxu0 %v2327_v30 }
 0x566   :  { %18477 = vmatpush3.bf16.msra.mxu0 %v19881_v41  ;;  %17371 = vmatprep.mubr.f32.mxu1 %v5377_v11 }
 0x567   :  { %18551 = vmatprep.subr.bf16.mxu1 %v18550_v52  ;;  %17155 = vmatprep.mubr.f32.mxu0 %v2318_v31 }
 0x568   :  { %18479 = vmatprep.subr.bf16.mxu0 %v18478_v53 }
 0x56c   :  { %17372 = vmatmul.mubr.f32.vlgmr.msra.gmra.mrb[6].mxu1 %v5387_v25 }
 0x56d   :  { %18553 = vmatpush3.bf16.xpose.msra.mxu1 %v18550_v52  ;;  %17156 = vmatmul.mubr.f32.vlgmr.msra.gmra.mrb[4].mxu0 %v2328_v34 }
 0x56e   :  { %18481 = vmatpush3.bf16.msra.mxu0 %v18478_v53  ;;  %17378 = vmatprep.mubr.f32.mxu1 %v19911_v15 }
 0x56f   :  { %18555 = vmatprep.subr.bf16.mxu1 %v19900_v62  ;;  %17162 = vmatprep.mubr.f32.mxu0 %v19919_v19 }
 0x570   :  { %18483 = vmatprep.subr.bf16.mxu0 %v19881_v41 }
 0x574   :  { %17379 = vmatmul.mubr.f32.vlgmr.msra.gmra.mrb[6].mxu1 %v19906_v9 }
 0x575   :  { %18557 = vmatpush3.bf16.xpose.msra.mxu1 %v19900_v62  ;;  %17163 = vmatmul.mubr.f32.vlgmr.msra.gmra.mrb[4].mxu0 %v19924_v24 }
 0x576   :  { %18485 = vmatpush3.bf16.msra.mxu0 %v19881_v41  ;;  %17385 = vmatprep.mubr.f32.mxu1 %v19911_v15  ;;  %v640_v41 = vld [vmem:[%s20749_s4 + $0x8] sm:$0xff] }
 0x577   :  { %17169 = vmatprep.mubr.f32.mxu0 %v19919_v19  ;;  %v19965_v56 = vand.u32 4294901760, %v640_v41 }
 0x579   :  { %17172 = vmatprep.subr.mxu0 %v19965_v56  ;;  %v2845_v57 = vsub.f32 %v640_v41, %v19965_v56 }
 0x57b   :  { %v2846_v58 = vand.u32 4294901760, %v2845_v57 }
 0x57c   :  { %17386 = vmatmul.mubr.f32.vlgmr.msra.gmra.mrb[6].mxu1 %v19906_v9 }
 0x57d   :  { %17170 = vmatmul.mubr.f32.vlgmr.msra.gmra.mrb[4].mxu0 %v19924_v24  ;;  %v2847_v59 = vsub.f32 %v2845_v57, %v2846_v58 }
 0x57e   :  { %17173 = vmatpush3.msra.mxu0 %v19965_v56 }
 0x57f   :  { %v2848_v60 = vand.u32 4294901760, %v2847_v59 }
 0x581   :  { %17177 = vmatprep.subr.mxu0 %v2848_v60 }
 0x5a9   :  { %v17273_v40 = vpop.f32.mrb[4].mxu1 }
 0x5aa   :  { %v19116_v42 = vadd.f32 %v17273_v40, %v19796_v43  ;;  %v4249_v46 = vpop.f32.mrb[5].mxu1 }
 0x5ab   :  { %v19117_v50 = vadd.f32 %v4249_v46, %v19801_v44 }
 0x5ac   :  { %v4262_v54 = vsel %vm1160_vm6, %v19116_v42, -inf }
 0x5ad   :  { %4263 = vmax.xlane.f32.xlu1 %v4262_v54  ;;  %v4259_v55 = vsel %vm1160_vm6, %v19117_v50, -inf }
 0x5ae   :  { %4260 = vmax.xlane.f32.xlu0 %v4259_v55 }
 0x5be   :  { %4283 = vrot.lane.b32.xlu1 %v19755_v36, %s19605_s0 }
 0x61b   :  { %v17087_v61 = vpop.f32.mrb[2].mxu0 }
 0x61c   :  { %v1687_v62 = vpop.f32.mrb[3].mxu0  ;;  %v3250_v26 = vsel %vm649_vm5, %v17087_v61, 0 }
 0x61d   :  { %v3247_v33 = vsel %vm649_vm5, %v1687_v62, 0  ;;  %v3328_v27 = vand.u32 4294901760, %v3250_v26 }
 0x61e   :  { %v3318_v35 = vand.u32 4294901760, %v3247_v33 }
 0x61f   :  { %v3329_v52 = vsub.f32 %v3250_v26, %v3328_v27 }
 0x620   :  { %v3319_v39 = vsub.f32 %v3247_v33, %v3318_v35 }
 0x621   :  { %v3330_v46 = vand.u32 4294901760, %v3329_v52 }
 0x622   :  { %v3320_v49 = vand.u32 4294901760, %v3319_v39 }
 0x623   :  { %v3331_v55 = vsub.f32 %v3329_v52, %v3330_v46 }
 0x624   :  { %v3321_v40 = vsub.f32 %v3319_v39, %v3320_v49 }
 0x626   :  { %v3322_v54 = vand.u32 4294901760, %v3321_v40 }
 0x63a   :  { %v4264_v63 = vpop.xlane.xlu1 %4263 }
 0x63b   :  { %v4266_v0 = vsub.f32 %v19116_v42, %v4264_v63  ;;  %v4261_v1 = vpop.xlane.xlu0 %4260 }
 0x63c   :  { %v4265_v7 = vsub.f32 %v19117_v50, %v4261_v1 }
 0x63d   :  { %v4269_v9 = vmul.f32 1.442695, %v4266_v0 }
 0x63e   :  { %v4267_v45 = vmul.f32 1.442695, %v4265_v7  ;;  %v4284_v41 = vpop.permute.xlu1 %4283 }
 0x63f   :  { %19488 = vpow2.f32 %v4269_v9 }
 0x640   :  { %19490 = vpow2.f32 %v4267_v45 }
 0x649   :  { %v19970_v13 = vpop.eup %19488 }
 0x64a   :  { %v4274_v4 = vsel %vm1160_vm6, %v19970_v13, 0.0  ;;  %v19974_v15 = vpop.eup %19490 }
 0x64b   :  { %4275 = vadd.xlane.f32.xlu0 %v4274_v4  ;;  %v4271_v48 = vsel %vm1160_vm6, %v19974_v15, 0.0 }
 0x64f   :  { %4272 = vadd.xlane.f32.xlu0 %v4271_v48  ;;  %v17387_v16 = vpop.f32.mrb[6].mxu1 }
 0x650   :  { %v17171_v17 = vpop.f32.mrb[4].mxu0  ;;  %v5800_v18 = vpop.f32.mrb[7].mxu1  ;;  %v19996_v51 = vadd.f32 %v17387_v16, %v19796_v43  ;;  %v3332_v43 = vand.u32 4294901760, %v3331_v55 }
 0x651   :  { %v2755_v19 = vsel %vm649_vm5, %v17171_v17, 0  ;;  %v19980_v20 = vadd.f32 %v5800_v18, %v19801_v44  ;;  %v2741_v21 = vpop.f32.mrb[5].mxu0  ;;  %v639_v44 = vld [vmem:[%s20749_s4] sm:$0xff] }
 0x652   :  { %v2833_v22 = vand.u32 4294901760, %v2755_v19  ;;  %v2752_v23 = vsel %vm649_vm5, %v2741_v21, 0  ;;  %v3253_v34 = vand.u32 4294901760, %v639_v44  ;;  %v5813_v42 = vsel %vm1160_vm6, %v19996_v51, -inf }
 0x653   :  { %v2823_v24 = vand.u32 4294901760, %v2752_v23  ;;  %v5810_v25 = vsel %vm1160_vm6, %v19980_v20, -inf }
 0x654   :  { %v2834_v28 = vsub.f32 %v2755_v19, %v2833_v22  ;;  %5811 = vmax.xlane.f32.xlu1 %v5810_v25  ;;  %v3340_v37 = vsub.f32 %v639_v44, %v3253_v34 }
 0x655   :  { %v2824_v29 = vsub.f32 %v2752_v23, %v2823_v24 }
 0x656   :  { %v2835_v11 = vand.u32 4294901760, %v2834_v28  ;;  %v3341_v47 = vand.u32 4294901760, %v3340_v37 }
 0x657   :  { %v2825_v10 = vand.u32 4294901760, %v2824_v29 }
 0x658   :  { %v2836_v30 = vsub.f32 %v2834_v28, %v2835_v11  ;;  %v3342_v53 = vsub.f32 %v3340_v37, %v3341_v47 }
 0x659   :  { %v2826_v12 = vsub.f32 %v2824_v29, %v2825_v10 }
 0x65a   :  { %v2837_v32 = vand.u32 4294901760, %v2836_v30  ;;  %v3343_v50 = vand.u32 4294901760, %v3342_v53 }
 0x65b   :  { %v2827_v31 = vand.u32 4294901760, %v2826_v12 }
 0x65d   :  { %17174 = vmatprep.mubr.f32.mxu0 %v2827_v31 }
 0x65e   :  { %17175 = vmatmul.mubr.f32.vlgmr.msra.gmra.mrb[6].mxu0 %v2837_v32 }
 0x65f   :  { %17179 = vmatprep.mubr.f32.mxu0 %v2823_v24  ;;  %17178 = vmatpush3.msra.mxu0 %v2848_v60 }
 0x660   :  { %17182 = vmatprep.subr.mxu0 %v2845_v57 }
 0x665   :  { %4281 = vrot.lane.b32.xlu0 %v19757_v38, %s19605_s0 }
 0x666   :  { %17180 = vmatmul.mubr.f32.vlgmr.msra.gmra.mrb[6].mxu0 %v2833_v22 }
 0x667   :  { %17184 = vmatprep.mubr.f32.mxu0 %v2824_v29  ;;  %17183 = vmatpush3.msra.mxu0 %v2845_v57  ;;  %v4297_v57 = vand.u32 4294901760, %v4284_v41 }
 0x668   :  { %17187 = vmatprep.subr.mxu0 %v19965_v56 }
 0x669   :  { %v4389_v59 = vsub.f32 %v4284_v41, %v4297_v57 }
 0x66b   :  { %v4390_v61 = vand.u32 4294901760, %v4389_v59 }
 0x66d   :  { %v4391_v48 = vsub.f32 %v4389_v59, %v4390_v61 }
 0x66e   :  { %17185 = vmatmul.mubr.f32.vlgmr.msra.gmra.mrb[6].mxu0 %v2834_v28 }
 0x66f   :  { %17189 = vmatprep.mubr.f32.mxu0 %v2825_v10  ;;  %17188 = vmatpush3.msra.mxu0 %v19965_v56 }
 0x670   :  { %17192 = vmatprep.subr.mxu0 %v2846_v58 }
 0x676   :  { %17190 = vmatmul.mubr.f32.vlgmr.msra.gmra.mrb[6].mxu0 %v2835_v11 }
 0x677   :  { %17194 = vmatprep.mubr.f32.mxu0 %v2823_v24  ;;  %17193 = vmatpush3.msra.mxu0 %v2846_v58 }
 0x678   :  { %17197 = vmatprep.subr.mxu0 %v19965_v56 }
 0x67e   :  { %17195 = vmatmul.mubr.f32.vlgmr.msra.gmra.mrb[6].mxu0 %v2833_v22 }
 0x67f   :  { %17199 = vmatprep.mubr.f32.mxu0 %v2823_v24  ;;  %17198 = vmatpush3.msra.mxu0 %v19965_v56 }
 0x680   :  { %17202 = vmatprep.subr.mxu0 %v3253_v34 }
 0x684   :  { %5814 = vmax.xlane.f32.xlu0 %v5813_v42 }
 0x686   :  { %17200 = vmatmul.mubr.f32.vlgmr.msra.gmra.mrb[6].mxu0 %v2833_v22 }
 0x687   :  { %17204 = vmatprep.mubr.f32.mxu0 %v3322_v54  ;;  %17203 = vmatpush3.msra.mxu0 %v3253_v34 }
 0x688   :  { %17207 = vmatprep.subr.mxu0 %v3343_v50 }
 0x68e   :  { %17205 = vmatmul.mubr.f32.vlgmr.msra.gmra.mrb[6].mxu0 %v3332_v43 }
 0x68f   :  { %17209 = vmatprep.mubr.f32.mxu0 %v3318_v35  ;;  %17208 = vmatpush3.msra.mxu0 %v3343_v50 }
 0x690   :  { %17212 = vmatprep.subr.mxu0 %v3340_v37 }
 0x696   :  { %17210 = vmatmul.mubr.f32.vlgmr.msra.gmra.mrb[6].mxu0 %v3328_v27 }
 0x697   :  { %17214 = vmatprep.mubr.f32.mxu0 %v3319_v39  ;;  %17213 = vmatpush3.msra.mxu0 %v3340_v37 }
 0x698   :  { %17217 = vmatprep.subr.mxu0 %v3253_v34 }
 0x69e   :  { %17215 = vmatmul.mubr.f32.vlgmr.msra.gmra.mrb[6].mxu0 %v3329_v52 }
 0x69f   :  { %17219 = vmatprep.mubr.f32.mxu0 %v3320_v49  ;;  %17218 = vmatpush3.msra.mxu0 %v3253_v34 }
 0x6a0   :  { %17222 = vmatprep.subr.mxu0 %v3341_v47 }
 0x6a6   :  { %17220 = vmatmul.mubr.f32.vlgmr.msra.gmra.mrb[6].mxu0 %v3330_v46 }
 0x6a7   :  { %17224 = vmatprep.mubr.f32.mxu0 %v3318_v35  ;;  %17223 = vmatpush3.msra.mxu0 %v3341_v47 }
 0x6a8   :  { %17227 = vmatprep.subr.mxu0 %v3253_v34 }
 0x6ae   :  { %17225 = vmatmul.mubr.f32.vlgmr.msra.gmra.mrb[6].mxu0 %v3328_v27 }
 0x6af   :  { %17229 = vmatprep.mubr.f32.mxu0 %v3318_v35  ;;  %17228 = vmatpush3.msra.mxu0 %v3253_v34 }
 0x6b6   :  { %17230 = vmatmul.mubr.f32.vlgmr.msra.gmra.mrb[6].mxu0 %v3328_v27 }
 0x6d8   :  { %v4276_v56 = vpop.xlane.xlu0 %4275 }
 0x6d9   :  { %19492 = vrcp.f32 %v4276_v56 }
 0x6dc   :  { %v4273_v58 = vpop.xlane.xlu0 %4272 }
 0x6dd   :  { %19494 = vrcp.f32 %v4273_v58 }
 0x6e0   :  { %v4282_v60 = vpop.permute.xlu0 %4281 }
 0x6e1   :  { %v4294_v62 = vand.u32 4294901760, %v4282_v60  ;;  %v5812_v63 = vpop.xlane.xlu1 %5811 }
 0x6e2   :  { %v5816_v0 = vsub.f32 %v19980_v20, %v5812_v63  ;;  %v4392_v20 = vand.u32 4294901760, %v4391_v48 }
 0x6e3   :  { %v19493_v1 = vpop.eup %19492  ;;  %v18510_v7 = vpack.c.bf16 %v4297_v57, %v4294_v62  ;;  %v4382_v9 = vsub.f32 %v4282_v60, %v4294_v62 }
 0x6e4   :  { %v4280_v45 = vmul.f32 %v19493_v1, %v19970_v13  ;;  %v5818_v4 = vmul.f32 1.442695, %v5816_v0 }
 0x6e5   :  { %v4383_v16 = vand.u32 4294901760, %v4382_v9  ;;  %18511 = vmatprep.subr.bf16.mxu0 %v18510_v7  ;;  %v18518_v33 = vpack.c.bf16 %v4389_v59, %v4382_v9 }
 0x6e6   :  { %19496 = vpow2.f32 %v5818_v4  ;;  %18513 = vmatpush3.bf16.msra.mxu0 %v18510_v7  ;;  %v4291_v17 = vsel %vm1160_vm6, %v4280_v45, 0 }
 0x6e7   :  { %v19495_v18 = vpop.eup %19494  ;;  %v4384_v19 = vsub.f32 %v4382_v9, %v4383_v16  ;;  %v4370_v21 = vand.u32 4294901760, %v4291_v17  ;;  %v18526_v34 = vpack.c.bf16 %v4390_v61, %v4383_v16 }
 0x6e8   :  { %v4278_v22 = vmul.f32 %v19495_v18, %v19974_v15 }
 0x6e9   :  { %v4385_v23 = vand.u32 4294901760, %v4384_v19  ;;  %v4371_v24 = vsub.f32 %v4291_v17, %v4370_v21 }
 0x6ea   :  { %v4288_v25 = vsel %vm1160_vm6, %v4278_v22, 0 }
 0x6eb   :  { %v18514_v28 = vpack.c.bf16 %v4392_v20, %v4385_v23  ;;  %v4360_v13 = vand.u32 4294901760, %v4288_v25  ;;  %v4372_v29 = vand.u32 4294901760, %v4371_v24 }
 0x6ed   :  { %18515 = vmatprep.subr.bf16.mxu0 %v18514_v28  ;;  %v4361_v11 = vsub.f32 %v4288_v25, %v4360_v13  ;;  %v4373_v12 = vsub.f32 %v4371_v24, %v4372_v29 }
 0x6ef   :  { %v4362_v10 = vand.u32 4294901760, %v4361_v11  ;;  %v4374_v44 = vand.u32 4294901760, %v4373_v12 }
 0x6f0   :  { %v20006_v30 = vpop.eup %19496 }
 0x6f1   :  { %v5822_v31 = vsel %vm1160_vm6, %v20006_v30, 0.0  ;;  %v4363_v32 = vsub.f32 %v4361_v11, %v4362_v10 }
 0x6f2   :  { %5823 = vadd.xlane.f32.xlu0 %v5822_v31 }
 0x6f3   :  { %v4364_v15 = vand.u32 4294901760, %v4363_v32 }
 0x6f5   :  { %17278 = vmatprep.mubr.f32.mxu0 %v4364_v15 }
 0x6f6   :  { %17279 = vmatmul.mubr.f32.vlgmr.msra.gmra.mrb[8].mxu0 %v4374_v44 }
 0x6f7   :  { %18517 = vmatpush3.bf16.msra.mxu0 %v18514_v28  ;;  %17285 = vmatprep.mubr.f32.mxu0 %v4360_v13 }
 0x6f8   :  { %18519 = vmatprep.subr.bf16.mxu0 %v18518_v33 }
 0x6fe   :  { %17286 = vmatmul.mubr.f32.vlgmr.msra.gmra.mrb[8].mxu0 %v4370_v21 }
 0x6ff   :  { %18521 = vmatpush3.bf16.msra.mxu0 %v18518_v33  ;;  %17292 = vmatprep.mubr.f32.mxu0 %v4361_v11 }
 0x700   :  { %18523 = vmatprep.subr.bf16.mxu0 %v18510_v7 }
 0x706   :  { %17293 = vmatmul.mubr.f32.vlgmr.msra.gmra.mrb[8].mxu0 %v4371_v24 }
 0x707   :  { %18525 = vmatpush3.bf16.msra.mxu0 %v18510_v7  ;;  %17299 = vmatprep.mubr.f32.mxu0 %v4362_v10 }
 0x708   :  { %18527 = vmatprep.subr.bf16.mxu0 %v18526_v34  ;;  %5832 = vrot.lane.b32.xlu0 %v19757_v38, %s19606_s20  ;;  %v641_v38 = vld [vmem:[%s20749_s4 + $0x10] sm:$0xff] }
 0x709   :  { %v20019_v47 = vand.u32 4294901760, %v641_v38 }
 0x70b   :  { %v4889_v49 = vsub.f32 %v641_v38, %v20019_v47 }
 0x70e   :  { %17300 = vmatmul.mubr.f32.vlgmr.msra.gmra.mrb[8].mxu0 %v4372_v29 }
 0x70f   :  { %18529 = vmatpush3.bf16.msra.mxu0 %v18526_v34  ;;  %17306 = vmatprep.mubr.f32.mxu0 %v4360_v13 }
 0x710   :  { %18531 = vmatprep.subr.bf16.mxu0 %v18510_v7 }
 0x711   :  { %v5815_v35 = vpop.xlane.xlu0 %5814 }
 0x712   :  { %v5817_v37 = vsub.f32 %v19996_v51, %v5815_v35  ;;  %v4890_v51 = vand.u32 4294901760, %v4889_v49 }
 0x714   :  { %v5820_v26 = vmul.f32 1.442695, %v5817_v37  ;;  %v4891_v52 = vsub.f32 %v4889_v49, %v4890_v51  ;;  %v642_v37 = vld [vmem:[%s20749_s4 + $0x18] sm:$0xff] }
 0x716   :  { %19498 = vpow2.f32 %v5820_v26  ;;  %17307 = vmatmul.mubr.f32.vlgmr.msra.gmra.mrb[8].mxu0 %v4370_v21  ;;  %v4892_v53 = vand.u32 4294901760, %v4891_v52  ;;  %v6353_v26 = vand.u32 4294901760, %v642_v37 }
 0x717   :  { %18533 = vmatpush3.bf16.msra.mxu0 %v18510_v7  ;;  %17313 = vmatprep.mubr.f32.mxu0 %v4360_v13 }
 0x718   :  { %17316 = vmatprep.subr.mxu0 %v20019_v47 }
 0x71e   :  { %17314 = vmatmul.mubr.f32.vlgmr.msra.gmra.mrb[8].mxu0 %v4370_v21 }
 0x71f   :  { %17317 = vmatpush3.msra.mxu0 %v20019_v47 }
 0x720   :  { %v19499_v39 = vpop.eup %19498  ;;  %17321 = vmatprep.subr.mxu0 %v4892_v53 }
 0x721   :  { %v5825_v27 = vsel %vm1160_vm6, %v19499_v39, 0.0 }
 0x722   :  { %5826 = vadd.xlane.f32.xlu1 %v5825_v27 }
 0x733   :  { %5834 = vrot.lane.b32.xlu1 %v19755_v36, %s19606_s20 }
 0x77f   :  { %v5824_v61 = vpop.xlane.xlu0 %5823 }
 0x780   :  { %19500 = vrcp.f32 %v5824_v61 }
 0x783   :  { %v5833_v9 = vpop.permute.xlu0 %5832 }
 0x784   :  { %v5845_v16 = vand.u32 4294901760, %v5833_v9 }
 0x786   :  { %v5933_v21 = vsub.f32 %v5833_v9, %v5845_v16 }
 0x788   :  { %v5934_v24 = vand.u32 4294901760, %v5933_v21 }
 0x78a   :  { %v19501_v63 = vpop.eup %19500  ;;  %v5935_v11 = vsub.f32 %v5933_v21, %v5934_v24 }
 0x78b   :  { %v5829_v1 = vmul.f32 %v19501_v63, %v20006_v30 }
 0x78c   :  { %v5936_v31 = vand.u32 4294901760, %v5935_v11 }
 0x78d   :  { %v5839_v48 = vsel %vm1160_vm6, %v5829_v1, 0 }
 0x78e   :  { %v5911_v17 = vand.u32 4294901760, %v5839_v48 }
 0x790   :  { %v5912_v23 = vsub.f32 %v5839_v48, %v5911_v17 }
 0x792   :  { %v5913_v28 = vand.u32 4294901760, %v5912_v23 }
 0x794   :  { %v5914_v30 = vsub.f32 %v5912_v23, %v5913_v28 }
 0x796   :  { %v5915_v15 = vand.u32 4294901760, %v5914_v30 }
 0x7af   :  { %v5827_v62 = vpop.xlane.xlu1 %5826 }
 0x7b0   :  { %19502 = vrcp.f32 %v5827_v62 }
 0x7b3   :  { %v5835_v7 = vpop.permute.xlu1 %5834 }
 0x7b4   :  { %v5848_v4 = vand.u32 4294901760, %v5835_v7 }
 0x7b6   :  { %v5940_v19 = vsub.f32 %v5835_v7, %v5848_v4  ;;  %v18558_v13 = vpack.c.bf16 %v5848_v4, %v5845_v16 }
 0x7b8   :  { %v5941_v20 = vand.u32 4294901760, %v5940_v19  ;;  %v18566_v34 = vpack.c.bf16 %v5940_v19, %v5933_v21 }
 0x7ba   :  { %v19503_v0 = vpop.eup %19502  ;;  %v5942_v29 = vsub.f32 %v5940_v19, %v5941_v20  ;;  %v18574_v35 = vpack.c.bf16 %v5941_v20, %v5934_v24  ;;  %v6905_v20 = vld [vmem:[%s20750_s5 + $0x10] sm:$0xff] }
 0x7bb   :  { %v5831_v45 = vmul.f32 %v19503_v0, %v19499_v39  ;;  %v6440_v39 = vsub.f32 %v642_v37, %v6353_v26 }
 0x7bc   :  { %v5943_v12 = vand.u32 4294901760, %v5942_v29 }
 0x7bd   :  { %v5842_v18 = vsel %vm1160_vm6, %v5831_v45, 0  ;;  %v6441_v27 = vand.u32 4294901760, %v6440_v39 }
 0x7be   :  { %v5921_v22 = vand.u32 4294901760, %v5842_v18  ;;  %v18562_v44 = vpack.c.bf16 %v5943_v12, %v5936_v31 }
 0x7bf   :  { %v6442_v38 = vsub.f32 %v6440_v39, %v6441_v27 }
 0x7c0   :  { %v5922_v25 = vsub.f32 %v5842_v18, %v5921_v22 }
 0x7c2   :  { %v5923_v10 = vand.u32 4294901760, %v5922_v25 }
 0x7c4   :  { %v5924_v32 = vsub.f32 %v5922_v25, %v5923_v10 }
 0x7c6   :  { %v5925_v33 = vand.u32 4294901760, %v5924_v32 }
 0x7f1   :  { %v17315_v40 = vpop.f32.mrb[8].mxu0 }
 0x7f2   :  { %v4799_v42 = vsel %vm649_vm5, %v17315_v40, 0  ;;  %v4785_v36 = vpop.f32.mrb[9].mxu0 }
 0x7f3   :  { %v20025_v46 = vand.u32 4294901760, %v4799_v42  ;;  %v4796_v50 = vsel %vm649_vm5, %v4785_v36, 0 }
 0x7f4   :  { %v4867_v54 = vand.u32 4294901760, %v4796_v50 }
 0x7f5   :  { %v4878_v55 = vsub.f32 %v4799_v42, %v20025_v46 }
 0x7f6   :  { %v4868_v43 = vsub.f32 %v4796_v50, %v4867_v54 }
 0x7f7   :  { %v4879_v41 = vand.u32 4294901760, %v4878_v55 }
 0x7f8   :  { %v4869_v56 = vand.u32 4294901760, %v4868_v43 }
 0x7f9   :  { %v4880_v57 = vsub.f32 %v4878_v55, %v4879_v41 }
 0x7fa   :  { %v4870_v58 = vsub.f32 %v4868_v43, %v4869_v56 }
 0x7fb   :  { %v4881_v60 = vand.u32 4294901760, %v4880_v57  ;;  %v20045_v57 = vsub.s32 1, %v19721_v2 }
 0x7fc   :  { %v4871_v59 = vand.u32 4294901760, %v4870_v58  ;;  %v20050_v58 = vld [vmem:[%s20752_s7] sm:$0xff] }
 0x7fe   :  { %17318 = vmatprep.mubr.f32.mxu0 %v4871_v59  ;;  %v6848_v59 = vrot.slane %v20050_v58, %v20045_v57 }
 0x7ff   :  { %17319 = vmatmul.mubr.f32.vlgmr.msra.gmra.mrb[6].mxu0 %v4881_v60 }
 0x800   :  { %17322 = vmatpush3.msra.mxu0 %v4892_v53  ;;  %17323 = vmatprep.mubr.f32.mxu0 %v4867_v54 }
 0x801   :  { %17326 = vmatprep.subr.mxu0 %v4889_v49 }
 0x807   :  { %17324 = vmatmul.mubr.f32.vlgmr.msra.gmra.mrb[6].mxu0 %v20025_v46 }
 0x808   :  { %17327 = vmatpush3.msra.mxu0 %v4889_v49  ;;  %17328 = vmatprep.mubr.f32.mxu0 %v4868_v43 }
 0x809   :  { %17331 = vmatprep.subr.mxu0 %v20019_v47 }
 0x80f   :  { %17329 = vmatmul.mubr.f32.vlgmr.msra.gmra.mrb[6].mxu0 %v4878_v55 }
 0x810   :  { %17332 = vmatpush3.msra.mxu0 %v20019_v47  ;;  %17333 = vmatprep.mubr.f32.mxu0 %v4869_v56 }
 0x811   :  { %17336 = vmatprep.subr.mxu0 %v4890_v51 }
 0x817   :  { %17334 = vmatmul.mubr.f32.vlgmr.msra.gmra.mrb[6].mxu0 %v4879_v41 }
 0x818   :  { %17337 = vmatpush3.msra.mxu0 %v4890_v51  ;;  %17338 = vmatprep.mubr.f32.mxu0 %v4867_v54 }
 0x819   :  { %17341 = vmatprep.subr.mxu0 %v20019_v47 }
 0x81f   :  { %17339 = vmatmul.mubr.f32.vlgmr.msra.gmra.mrb[6].mxu0 %v20025_v46 }
 0x820   :  { %17342 = vmatpush3.msra.mxu0 %v20019_v47  ;;  %17343 = vmatprep.mubr.f32.mxu0 %v4867_v54  ;;  %v6443_v47 = vand.u32 4294901760, %v6442_v38 }
 0x821   :  { %18559 = vmatprep.subr.bf16.mxu0 %v18558_v13 }
 0x827   :  { %17344 = vmatmul.mubr.f32.vlgmr.msra.gmra.mrb[6].mxu0 %v20025_v46 }
 0x828   :  { %18561 = vmatpush3.bf16.msra.mxu0 %v18558_v13  ;;  %17392 = vmatprep.mubr.f32.mxu0 %v5915_v15 }
 0x829   :  { %18563 = vmatprep.subr.bf16.mxu0 %v18562_v44 }
 0x82b   :  { %17393 = vmatmul.mubr.f32.vlgmr.msra.gmra.mrb[10].mxu0 %v5925_v33 }
 0x82c   :  { %18565 = vmatpush3.bf16.msra.mxu0 %v18562_v44  ;;  %17399 = vmatprep.mubr.f32.mxu0 %v5911_v17 }
 0x82d   :  { %18567 = vmatprep.subr.bf16.mxu0 %v18566_v34 }
 0x833   :  { %17400 = vmatmul.mubr.f32.vlgmr.msra.gmra.mrb[10].mxu0 %v5921_v22 }
 0x834   :  { %18569 = vmatpush3.bf16.msra.mxu0 %v18566_v34  ;;  %17406 = vmatprep.mubr.f32.mxu0 %v5912_v23  ;;  %v6904_v23 = vld [vmem:[%s20750_s5 + $0x8] sm:$0xff] }
 0x835   :  { %18571 = vmatprep.subr.bf16.mxu0 %v18558_v13 }
 0x83b   :  { %17407 = vmatmul.mubr.f32.vlgmr.msra.gmra.mrb[10].mxu0 %v5922_v25  ;;  %v6921_v25 = vand.u32 4294901760, %v6904_v23 }
 0x83c   :  { %18573 = vmatpush3.bf16.msra.mxu0 %v18558_v13  ;;  %17413 = vmatprep.mubr.f32.mxu0 %v5913_v28  ;;  %v6906_v28 = vld [vmem:[%s20750_s5 + $0x18] sm:$0xff] }
 0x83d   :  { %18575 = vmatprep.subr.bf16.mxu0 %v18574_v35  ;;  %v6927_v29 = vand.u32 4294901760, %v6906_v28  ;;  %v7015_v12 = vsub.f32 %v6904_v23, %v6921_v25 }
 0x83f   :  { %v7016_v32 = vand.u32 4294901760, %v7015_v12  ;;  %v7029_v34 = vsub.f32 %v6906_v28, %v6927_v29 }
 0x841   :  { %v7017_v44 = vsub.f32 %v7015_v12, %v7016_v32 }
 0x843   :  { %17414 = vmatmul.mubr.f32.vlgmr.msra.gmra.mrb[10].mxu0 %v5923_v10  ;;  %v7018_v37 = vand.u32 4294901760, %v7017_v44 }
 0x844   :  { %18577 = vmatpush3.bf16.msra.mxu0 %v18574_v35  ;;  %17420 = vmatprep.mubr.f32.mxu0 %v5911_v17 }
 0x845   :  { %18579 = vmatprep.subr.bf16.mxu0 %v18558_v13 }
 0x84b   :  { %17421 = vmatmul.mubr.f32.vlgmr.msra.gmra.mrb[10].mxu0 %v5921_v22 }
 0x84c   :  { %18581 = vmatpush3.bf16.msra.mxu0 %v18558_v13  ;;  %17427 = vmatprep.mubr.f32.mxu0 %v5911_v17  ;;  %v6924_v13 = vand.u32 4294901760, %v6905_v20 }
 0x84d   :  { %17430 = vmatprep.subr.mxu0 %v6353_v26 }
 0x84e   :  { %v20090_v10 = vpack.c.bf16 %v6927_v29, %v6924_v13  ;;  %v7022_v33 = vsub.f32 %v6905_v20, %v6924_v13 }
 0x853   :  { %17428 = vmatmul.mubr.f32.vlgmr.msra.gmra.mrb[10].mxu0 %v5921_v22  ;;  %v6903_v22 = vld [vmem:[%s20750_s5] sm:$0xff] }
 0x854   :  { %17431 = vmatpush3.msra.mxu0 %v6353_v26  ;;  %v6918_v24 = vand.u32 4294901760, %v6903_v22 }
 0x855   :  { %17435 = vmatprep.subr.mxu0 %v6443_v47 }
 0x856   :  { %v20088_v11 = vpack.c.bf16 %v6921_v25, %v6918_v24  ;;  %v7008_v30 = vsub.f32 %v6903_v22, %v6918_v24  ;;  %v6899_v22 = vsub.s32 7, %v19721_v2 }
 0x858   :  { %18583 = vmatprep.subr.bf16.mxu1 %v20088_v11  ;;  %v7009_v31 = vand.u32 4294901760, %v7008_v30  ;;  %v6900_v25 = vrot.slane %v20050_v58, %v6899_v22 }
 0x859   :  { %18585 = vmatpush3.bf16.msra.mxu1 %v20088_v11 }
 0x85a   :  { %18587 = vmatprep.subr.bf16.mxu1 %v20090_v10  ;;  %v7010_v15 = vsub.f32 %v7008_v30, %v7009_v31 }
 0x85c   :  { %v7011_v35 = vand.u32 4294901760, %v7010_v15 }
 0x85d   :  { %18589 = vmatpush3.bf16.msra.mxu1 %v20090_v10 }
 0x926   :  { %v17429_v49 = vpop.f32.mrb[10].mxu0 }
 0x927   :  { %v6350_v51 = vsel %vm649_vm5, %v17429_v49, 0  ;;  %v6336_v52 = vpop.f32.mrb[11].mxu0 }
 0x928   :  { %v6428_v53 = vand.u32 4294901760, %v6350_v51  ;;  %v6347_v40 = vsel %vm649_vm5, %v6336_v52, 0 }
 0x929   :  { %v6418_v42 = vand.u32 4294901760, %v6347_v40 }
 0x92a   :  { %v6429_v36 = vsub.f32 %v6350_v51, %v6428_v53 }
 0x92b   :  { %v6419_v46 = vsub.f32 %v6347_v40, %v6418_v42  ;;  %v20103_v40 = vpack.c.bf16 %v7029_v34, %v7022_v33 }
 0x92c   :  { %v6430_v50 = vand.u32 4294901760, %v6429_v36 }
 0x92d   :  { %v6420_v54 = vand.u32 4294901760, %v6419_v46 }
 0x92e   :  { %v6431_v55 = vsub.f32 %v6429_v36, %v6430_v50 }
 0x92f   :  { %v6421_v43 = vsub.f32 %v6419_v46, %v6420_v54 }
 0x930   :  { %v6432_v56 = vand.u32 4294901760, %v6431_v55 }
 0x931   :  { %v6422_v41 = vand.u32 4294901760, %v6421_v43 }
 0x933   :  { %17432 = vmatprep.mubr.f32.mxu0 %v6422_v41 }
 0x934   :  { %17433 = vmatmul.mubr.f32.vlgmr.msra.gmra.mrb[6].mxu0 %v6432_v56 }
 0x935   :  { %17436 = vmatpush3.msra.mxu0 %v6443_v47  ;;  %17437 = vmatprep.mubr.f32.mxu0 %v6418_v42 }
 0x936   :  { %17440 = vmatprep.subr.mxu0 %v6440_v39 }
 0x93c   :  { %17438 = vmatmul.mubr.f32.vlgmr.msra.gmra.mrb[6].mxu0 %v6428_v53 }
 0x93d   :  { %17441 = vmatpush3.msra.mxu0 %v6440_v39  ;;  %17442 = vmatprep.mubr.f32.mxu0 %v6419_v46  ;;  %v7030_v39 = vand.u32 4294901760, %v7029_v34  ;;  %v20112_v46 = vld [vmem:[%s20751_s6] sm:$0xff] }
 0x93e   :  { %17445 = vmatprep.subr.mxu0 %v6353_v26 }
 0x93f   :  { %v7031_v47 = vsub.f32 %v7029_v34, %v7030_v39 }
 0x941   :  { %v7032_v51 = vand.u32 4294901760, %v7031_v47 }
 0x944   :  { %17443 = vmatmul.mubr.f32.vlgmr.msra.gmra.mrb[6].mxu0 %v6429_v36 }
 0x945   :  { %17446 = vmatpush3.msra.mxu0 %v6353_v26  ;;  %17447 = vmatprep.mubr.f32.mxu0 %v6420_v54  ;;  %v7467_v54 = vand.u32 4294901760, %v20112_v46 }
 0x946   :  { %17450 = vmatprep.subr.mxu0 %v6441_v27 }
 0x94c   :  { %17448 = vmatmul.mubr.f32.vlgmr.msra.gmra.mrb[6].mxu0 %v6430_v50  ;;  %v20117_v50 = vld [vmem:[%s20751_s6 + $0x8] sm:$0xff] }
 0x94d   :  { %17451 = vmatpush3.msra.mxu0 %v6441_v27  ;;  %17452 = vmatprep.mubr.f32.mxu0 %v6418_v42  ;;  %v20096_v27 = vpack.c.bf16 %v7018_v37, %v7011_v35  ;;  %v7470_v55 = vand.u32 4294901760, %v20117_v50 }
 0x94e   :  { %17455 = vmatprep.subr.mxu0 %v6353_v26 }
 0x94f   :  { %18591 = vmatprep.subr.bf16.mxu1 %v20096_v27  ;;  %v20125_v43 = vpack.c.bf16 %v7470_v55, %v7467_v54 }
 0x954   :  { %17453 = vmatmul.mubr.f32.vlgmr.msra.gmra.mrb[6].mxu0 %v6428_v53 }
 0x955   :  { %17456 = vmatpush3.msra.mxu0 %v6353_v26  ;;  %17457 = vmatprep.mubr.f32.mxu0 %v6418_v42  ;;  %v7023_v26 = vand.u32 4294901760, %v7022_v33  ;;  %v20105_v42 = vpack.c.bf16 %v7016_v32, %v7009_v31 }
 0x956   :  { %18679 = vmatprep.subr.bf16.mxu0 %v20125_v43 }
 0x957   :  { %v7024_v38 = vsub.f32 %v7022_v33, %v7023_v26  ;;  %v20107_v36 = vpack.c.bf16 %v7030_v39, %v7023_v26 }
 0x959   :  { %v7025_v49 = vand.u32 4294901760, %v7024_v38 }
 0x95b   :  { %v20099_v52 = vpack.c.bf16 %v7032_v51, %v7025_v49 }
 0x95c   :  { %17458 = vmatmul.mubr.f32.vlgmr.msra.gmra.mrb[6].mxu0 %v6428_v53  ;;  %v20101_v53 = vpack.c.bf16 %v7015_v12, %v7008_v30 }
 0x95d   :  { %18681 = vmatpush3.bf16.msra.mxu0 %v20125_v43 }
 0xa2f   :  { %v17459_v60 = vpop.f32.mrb[6].mxu0 }
 0xa30   :  { %v6844_v61 = vadd.f32 %v17459_v60, %v19674_v5  ;;  %v6831_v62 = vpop.f32.mrb[7].mxu0 }
 0xa31   :  { %v6843_v63 = vadd.f32 %v6831_v62, %v19669_v3 }
 0xa32   :  { %v20056_v0 = vadd.f32 %v6848_v59, %v6844_v61 }
 0xa33   :  { %v20058_v1 = vadd.f32 %v6848_v59, %v6843_v63 }
 0xa34   :  { %v6854_v7 = vsel %vm42_vm0, %v20056_v0, 0.0 }
 0xa35   :  { %6855 = vadd.xlane.f32.xlu0 %v6854_v7  ;;  %v6851_v9 = vsel %vm42_vm0, %v20058_v1, 0.0 }
 0xa36   :  { %6852 = vadd.xlane.f32.xlu1 %v6851_v9 }
 0xac2   :  { %v6856_v45 = vpop.xlane.xlu0 %6855 }
 0xac3   :  { %v6858_v4 = vmul.f32 0.03125, %v6856_v45  ;;  %v6853_v48 = vpop.xlane.xlu1 %6852 }
 0xac4   :  { %v6857_v16 = vmul.f32 0.03125, %v6853_v48 }
 0xac5   :  { %v20065_v5 = vsub.f32 %v20056_v0, %v6858_v4 }
 0xac6   :  { %v20068_v3 = vsub.f32 %v20058_v1, %v6857_v16 }
 0xac7   :  { %v6862_v17 = vmul.f32 %v20065_v5, %v20065_v5 }
 0xac8   :  { %v6861_v18 = vmul.f32 %v20068_v3, %v20068_v3 }
 0xac9   :  { %v6866_v19 = vsel %vm42_vm0, %v6862_v17, 0.0 }
 0xaca   :  { %6867 = vadd.xlane.f32.xlu1 %v6866_v19  ;;  %v6863_v21 = vsel %vm42_vm0, %v6861_v18, 0.0 }
 0xacb   :  { %6864 = vadd.xlane.f32.xlu0 %v6863_v21  ;;  %v6893_v21 = vsub.s32 6, %v19721_v2 }
 0xacd   :  { %v6894_v23 = vrot.slane %v20050_v58, %v6893_v21 }
 0xb57   :  { %v6868_v41 = vpop.xlane.xlu1 %6867 }
 0xb58   :  { %v6870_v56 = vmul.f32 0.032258064, %v6868_v41  ;;  %v6865_v59 = vpop.xlane.xlu0 %6864  ;;  %v7454_v41 = vld [vmem:[%s20751_s6 + $0x38] sm:$0xff] }
 0xb59   :  { %v6869_v60 = vmul.f32 0.032258064, %v6865_v59  ;;  %v7488_v59 = vand.u32 4294901760, %v7454_v41 }
 0xb5a   :  { %19504 = vrsqrt.f32 %v6870_v56  ;;  %vm6880_vm7 = vcmp.eq.f32.partialorder %v6870_v56, inf  ;;  %v6883_v7 = vand.u32 2147483648, %v6870_v56  ;;  %vm6882_vm8 = vcmp.eq.f32.partialorder %v6870_v56, 0.0 }
 0xb5b   :  { %19506 = vrsqrt.f32 %v6869_v60  ;;  %vm6873_vm9 = vcmp.eq.f32.partialorder %v6869_v60, inf  ;;  %v6876_v4 = vand.u32 2147483648, %v6869_v60  ;;  %vm6875_vm10 = vcmp.eq.f32.partialorder %v6869_v60, 0.0 }
 0xb64   :  { %v19505_v61 = vpop.eup %19504 }
 0xb65   :  { %v19507_v62 = vpop.eup %19506  ;;  %v6879_v63 = vmul.f32 %v19505_v61, %v6870_v56  ;;  %v7561_v61 = vsub.f32 %v20112_v46, %v7467_v54 }
 0xb66   :  { %v6872_v9 = vmul.f32 %v19507_v62, %v6869_v60  ;;  %v7568_v62 = vsub.f32 %v20117_v50, %v7470_v55 }
 0xb67   :  { %v6881_v45 = vsel %vm6880_vm7, %v6870_v56, %v6879_v63  ;;  %v7562_v63 = vand.u32 4294901760, %v7561_v61 }
 0xb68   :  { %v6884_v48 = vsel %vm6882_vm8, %v6883_v7, %v6881_v45  ;;  %v6874_v16 = vsel %vm6873_vm9, %v6869_v60, %v6872_v9  ;;  %v7569_v7 = vand.u32 4294901760, %v7568_v62 }
 0xb69   :  { %v6886_v17 = vadd.f32 1e-06, %v6884_v48  ;;  %v6877_v18 = vsel %vm6875_vm10, %v6876_v4, %v6874_v16  ;;  %v7563_v45 = vsub.f32 %v7561_v61, %v7562_v63 }
 0xb6a   :  { %v6885_v19 = vadd.f32 1e-06, %v6877_v18  ;;  %v18694_v9 = vpack.c.bf16 %v7569_v7, %v7562_v63  ;;  %v7570_v4 = vsub.f32 %v7568_v62, %v7569_v7 }
 0xb6b   :  { %19508 = vrcp.f32 %v6886_v17  ;;  %v7564_v46 = vand.u32 4294901760, %v7563_v45 }
 0xb6c   :  { %19510 = vrcp.f32 %v6885_v19  ;;  %v7571_v54 = vand.u32 4294901760, %v7570_v4 }
 0xb6e   :  { %v18646_v55 = vpack.c.bf16 %v7571_v54, %v7564_v46 }
 0xb75   :  { %v19509_v20 = vpop.eup %19508 }
 0xb76   :  { %v19511_v24 = vpop.eup %19510  ;;  %v6890_v28 = vmul.f32 %v19509_v20, %v20065_v5 }
 0xb77   :  { %v6888_v13 = vmul.f32 %v19511_v24, %v20068_v3  ;;  %v7449_v3 = vld [vmem:[%s20751_s6 + $0x10] sm:$0xff] }
 0xb78   :  { %v6896_v29 = vmul.f32 %v6894_v23, %v6890_v28  ;;  %v7473_v49 = vand.u32 4294901760, %v7449_v3 }
 0xb79   :  { %v6895_v30 = vmul.f32 %v6894_v23, %v6888_v13 }
 0xb7a   :  { %v6902_v12 = vadd.f32 %v6900_v25, %v6896_v29  ;;  %v7575_v48 = vsub.f32 %v7449_v3, %v7473_v49 }
 0xb7b   :  { %v6901_v31 = vadd.f32 %v6900_v25, %v6895_v30 }
 0xb7c   :  { %v6915_v32 = vsel %vm42_vm0, %v6902_v12, 0  ;;  %v7576_v17 = vand.u32 4294901760, %v7575_v48 }
 0xb7d   :  { %v6912_v15 = vsel %vm42_vm0, %v6901_v31, 0  ;;  %v6996_v44 = vand.u32 4294901760, %v6915_v32 }
 0xb7e   :  { %v6986_v33 = vand.u32 4294901760, %v6912_v15  ;;  %v7577_v18 = vsub.f32 %v7575_v48, %v7576_v17 }
 0xb7f   :  { %v6997_v34 = vsub.f32 %v6915_v32, %v6996_v44 }
 0xb80   :  { %v6987_v35 = vsub.f32 %v6912_v15, %v6986_v33  ;;  %v7578_v25 = vand.u32 4294901760, %v7577_v18 }
 0xb81   :  { %v6998_v37 = vand.u32 4294901760, %v6997_v34 }
 0xb82   :  { %v6988_v26 = vand.u32 4294901760, %v6987_v35 }
 0xb83   :  { %v6999_v39 = vsub.f32 %v6997_v34, %v6998_v37 }
 0xb84   :  { %v6989_v38 = vsub.f32 %v6987_v35, %v6988_v26 }
 0xb85   :  { %v7000_v5 = vand.u32 4294901760, %v6999_v39 }
 0xb86   :  { %v6990_v47 = vand.u32 4294901760, %v6989_v38 }
 0xb88   :  { %17468 = vmatprep.mubr.f32.mxu1 %v6990_v47 }
 0xb89   :  { %17469 = vmatmul.mubr.f32.vlgmr.msra.gmra.mrb[8].mxu1 %v7000_v5 }
 0xb8a   :  { %18593 = vmatpush3.bf16.msra.mxu1 %v20096_v27  ;;  %17479 = vmatprep.mubr.f32.mxu1 %v6986_v33  ;;  %v7450_v27 = vld [vmem:[%s20751_s6 + $0x18] sm:$0xff] }
 0xb8b   :  { %18595 = vmatprep.subr.bf16.mxu1 %v20099_v52 }
 0xb8e   :  { %18597 = vmatpush3.bf16.msra.mxu1 %v20099_v52  ;;  %v7452_v52 = vld [vmem:[%s20751_s6 + $0x28] sm:$0xff] }
 0xb8f   :  { %18599 = vmatprep.subr.bf16.mxu1 %v20101_v53 }
 0xb91   :  { %17480 = vmatmul.mubr.f32.vlgmr.msra.gmra.mrb[8].mxu1 %v6996_v44 }
 0xb92   :  { %18601 = vmatpush3.bf16.msra.mxu1 %v20101_v53  ;;  %17490 = vmatprep.mubr.f32.mxu1 %v6987_v35 }
 0xb93   :  { %18603 = vmatprep.subr.bf16.mxu1 %v20103_v40 }
 0xb96   :  { %18605 = vmatpush3.bf16.msra.mxu1 %v20103_v40  ;;  %v7482_v40 = vand.u32 4294901760, %v7452_v52 }
 0xb97   :  { %18607 = vmatprep.subr.bf16.mxu1 %v20088_v11 }
 0xb98   :  { %v7596_v23 = vsub.f32 %v7452_v52, %v7482_v40 }
 0xb99   :  { %17491 = vmatmul.mubr.f32.vlgmr.msra.gmra.mrb[8].mxu1 %v6997_v34 }
 0xb9a   :  { %18609 = vmatpush3.bf16.msra.mxu1 %v20088_v11  ;;  %17501 = vmatprep.mubr.f32.mxu1 %v6988_v26  ;;  %v7597_v13 = vand.u32 4294901760, %v7596_v23 }
 0xb9b   :  { %18611 = vmatprep.subr.bf16.mxu1 %v20090_v10 }
 0xb9c   :  { %v7598_v31 = vsub.f32 %v7596_v23, %v7597_v13 }
 0xb9e   :  { %18613 = vmatpush3.bf16.msra.mxu1 %v20090_v10  ;;  %v7599_v34 = vand.u32 4294901760, %v7598_v31 }
 0xb9f   :  { %18615 = vmatprep.subr.bf16.mxu1 %v20105_v42 }
 0xba1   :  { %17502 = vmatmul.mubr.f32.vlgmr.msra.gmra.mrb[8].mxu1 %v6998_v37 }
 0xba2   :  { %18617 = vmatpush3.bf16.msra.mxu1 %v20105_v42  ;;  %17512 = vmatprep.mubr.f32.mxu1 %v6986_v33 }
 0xba3   :  { %18619 = vmatprep.subr.bf16.mxu1 %v20107_v36 }
 0xba6   :  { %18621 = vmatpush3.bf16.msra.mxu1 %v20107_v36  ;;  %v7453_v36 = vld [vmem:[%s20751_s6 + $0x30] sm:$0xff] }
 0xba7   :  { %18623 = vmatprep.subr.bf16.mxu1 %v20088_v11  ;;  %v7485_v56 = vand.u32 4294901760, %v7453_v36 }
 0xba9   :  { %17513 = vmatmul.mubr.f32.vlgmr.msra.gmra.mrb[8].mxu1 %v6996_v44  ;;  %v20192_v60 = vpack.c.bf16 %v7488_v59, %v7485_v56  ;;  %v7603_v32 = vsub.f32 %v7453_v36, %v7485_v56 }
 0xbaa   :  { %18625 = vmatpush3.bf16.msra.mxu1 %v20088_v11  ;;  %17523 = vmatprep.mubr.f32.mxu1 %v6986_v33  ;;  %v7476_v11 = vand.u32 4294901760, %v7450_v27 }
 0xbab   :  { %18627 = vmatprep.subr.bf16.mxu1 %v20090_v10  ;;  %v7604_v35 = vand.u32 4294901760, %v7603_v32 }
 0xbac   :  { %v20168_v51 = vpack.c.bf16 %v7476_v11, %v7473_v49  ;;  %v7582_v16 = vsub.f32 %v7450_v27, %v7476_v11  ;;  %v18662_v49 = vpack.c.bf16 %v7568_v62, %v7561_v61 }
 0xbad   :  { %v7605_v39 = vsub.f32 %v7603_v32, %v7604_v35 }
 0xbae   :  { %18629 = vmatpush3.bf16.msra.mxu1 %v20090_v10  ;;  %v7451_v10 = vld [vmem:[%s20751_s6 + $0x20] sm:$0xff]  ;;  %18683 = vmatprep.subr.bf16.mxu0 %v20168_v51  ;;  %v7583_v50 = vand.u32 4294901760, %v7582_v16  ;;  %v18666_v11 = vpack.c.bf16 %v7582_v16, %v7575_v48 }
 0xbaf   :  { %18631 = vmatprep.subr.bf16.mxu1 %v20125_v43  ;;  %v7479_v53 = vand.u32 4294901760, %v7451_v10  ;;  %18685 = vmatpush3.bf16.msra.mxu0 %v20168_v51  ;;  %v7606_v5 = vand.u32 4294901760, %v7605_v39 }
 0xbb0   :  { %v18698_v20 = vpack.c.bf16 %v7583_v50, %v7576_v17  ;;  %v7584_v24 = vsub.f32 %v7582_v16, %v7583_v50 }
 0xbb1   :  { %17524 = vmatmul.mubr.f32.vlgmr.msra.gmra.mrb[8].mxu1 %v6996_v44  ;;  %v20180_v42 = vpack.c.bf16 %v7482_v40, %v7479_v53  ;;  %v7589_v19 = vsub.f32 %v7451_v10, %v7479_v53  ;;  %v7610_v44 = vsub.f32 %v7454_v41, %v7488_v59  ;;  %v6909_v53 = vsub.s32 2, %v19721_v2 }
 0xbb2   :  { %18633 = vmatpush3.bf16.msra.mxu1 %v20125_v43  ;;  %v7585_v29 = vand.u32 4294901760, %v7584_v24 }
 0xbb3   :  { %18635 = vmatprep.subr.bf16.mxu1 %v20168_v51  ;;  %18687 = vmatprep.subr.bf16.mxu0 %v20180_v42  ;;  %v7590_v28 = vand.u32 4294901760, %v7589_v19  ;;  %v7611_v37 = vand.u32 4294901760, %v7610_v44  ;;  %v18670_v10 = vpack.c.bf16 %v7596_v23, %v7589_v19  ;;  %v18674_v52 = vpack.c.bf16 %v7610_v44, %v7603_v32 }
 0xbb4   :  { %18689 = vmatpush3.bf16.msra.mxu0 %v20180_v42  ;;  %v18650_v15 = vpack.c.bf16 %v7585_v29, %v7578_v25  ;;  %v6910_v40 = vrot.slane %v20050_v58, %v6909_v53 }
 0xbb5   :  { %18691 = vmatprep.subr.bf16.mxu0 %v20192_v60  ;;  %v18702_v30 = vpack.c.bf16 %v7597_v13, %v7590_v28  ;;  %v7591_v12 = vsub.f32 %v7589_v19, %v7590_v28  ;;  %v18706_v38 = vpack.c.bf16 %v7611_v37, %v7604_v35  ;;  %v7612_v47 = vsub.f32 %v7610_v44, %v7611_v37  ;;  %v16126_v35 = vld [vmem:[%s20748_s3 + $0x20] sm:$0xff]  ;;  %v16127_v37 = vld [vmem:[%s20748_s3 + $0x28] sm:$0xff] }
 0xbb6   :  { %18637 = vmatpush3.bf16.msra.mxu1 %v20168_v51  ;;  %v8118_v39 = vand.u32 4294901760, %v16126_v35 }
 0xbb7   :  { %18639 = vmatprep.subr.bf16.mxu1 %v20180_v42  ;;  %v7592_v33 = vand.u32 4294901760, %v7591_v12  ;;  %v7613_v3 = vand.u32 4294901760, %v7612_v47  ;;  %v16129_v47 = vld [vmem:[%s20748_s3 + $0x38] sm:$0xff] }
 0xbb8   :  { %18693 = vmatpush3.bf16.msra.mxu0 %v20192_v60 }
 0xbb9   :  { %18695 = vmatprep.subr.bf16.mxu0 %v18694_v9  ;;  %v18654_v26 = vpack.c.bf16 %v7599_v34, %v7592_v33  ;;  %v18658_v27 = vpack.c.bf16 %v7613_v3, %v7606_v5  ;;  %v8127_v3 = vand.u32 4294901760, %v16129_v47 }
 0xbba   :  { %18641 = vmatpush3.bf16.msra.mxu1 %v20180_v42 }
 0xbbb   :  { %18643 = vmatprep.subr.bf16.mxu1 %v20192_v60 }
 0xbbe   :  { %18645 = vmatpush3.bf16.msra.mxu1 %v20192_v60 }
 0xbbf   :  { %18647 = vmatprep.subr.bf16.mxu1 %v18646_v55 }
 0xc84   :  { %v17525_v36 = vpop.f32.mrb[8].mxu1 }
 0xc85   :  { %v19120_v41 = vadd.f32 %v17525_v36, %v6910_v40  ;;  %v7435_v56 = vpop.f32.mrb[9].mxu1 }
 0xc86   :  { %v19121_v59 = vadd.f32 %v7435_v56, %v6910_v40 }
 0xc87   :  { %v7446_v63 = vmax.f32 %v19120_v41, 0.0 }
 0xc88   :  { %v7445_v7 = vmax.f32 %v19121_v59, 0.0  ;;  %v8229_v59 = vsub.f32 %v16129_v47, %v8127_v3 }
 0xc89   :  { %v7464_v45 = vsel %vm7459_vm11, %v7446_v63, 0 }
 0xc8a   :  { %v7549_v4 = vand.u32 4294901760, %v7464_v45  ;;  %v7461_v61 = vsel %vm7459_vm11, %v7445_v7, 0 }
 0xc8b   :  { %v7539_v62 = vand.u32 4294901760, %v7461_v61 }
 0xc8c   :  { %v7550_v48 = vsub.f32 %v7464_v45, %v7549_v4 }
 0xc8d   :  { %v7540_v16 = vsub.f32 %v7461_v61, %v7539_v62 }
 0xc8e   :  { %v7551_v46 = vand.u32 4294901760, %v7550_v48 }
 0xc8f   :  { %v7541_v54 = vand.u32 4294901760, %v7540_v16 }
 0xc90   :  { %v7552_v17 = vsub.f32 %v7550_v48, %v7551_v46 }
 0xc91   :  { %17599 = vmatprep.mubr.f32.mxu0 %v7541_v54  ;;  %v7542_v50 = vsub.f32 %v7540_v16, %v7541_v54 }
 0xc92   :  { %17600 = vmatmul.mubr.f32.vlgmr.msra.gmra.mrb[12].mxu0 %v7551_v46  ;;  %v7553_v19 = vand.u32 4294901760, %v7552_v17 }
 0xc93   :  { %18697 = vmatpush3.bf16.msra.mxu0 %v18694_v9  ;;  %17618 = vmatprep.mubr.f32.mxu0 %v7539_v62  ;;  %v7543_v18 = vand.u32 4294901760, %v7542_v50 }
 0xc94   :  { %18699 = vmatprep.subr.bf16.mxu0 %v18698_v20 }
 0xc95   :  { %17542 = vmatprep.mubr.f32.mxu1 %v7543_v18 }
 0xc96   :  { %17543 = vmatmul.mubr.f32.vlgmr.msra.gmra.mrb[10].mxu1 %v7553_v19 }
 0xc97   :  { %18649 = vmatpush3.bf16.msra.mxu1 %v18646_v55  ;;  %18701 = vmatpush3.bf16.msra.mxu0 %v18698_v20 }
 0xc98   :  { %17561 = vmatprep.mubr.f32.mxu1 %v7539_v62  ;;  %18651 = vmatprep.subr.bf16.mxu1 %v18650_v15 }
 0xc99   :  { %18703 = vmatprep.subr.bf16.mxu0 %v18702_v30 }
 0xc9b   :  { %18653 = vmatpush3.bf16.msra.mxu1 %v18650_v15  ;;  %18705 = vmatpush3.bf16.msra.mxu0 %v18702_v30 }
 0xc9c   :  { %18655 = vmatprep.subr.bf16.mxu1 %v18654_v26  ;;  %18707 = vmatprep.subr.bf16.mxu0 %v18706_v38 }
 0xc9f   :  { %18657 = vmatpush3.bf16.msra.mxu1 %v18654_v26  ;;  %18709 = vmatpush3.bf16.msra.mxu0 %v18706_v38  ;;  %v16128_v26 = vld [vmem:[%s20748_s3 + $0x30] sm:$0xff]  ;;  %v8121_v38 = vand.u32 4294901760, %v16127_v37 }
 0xca0   :  { %18659 = vmatprep.subr.bf16.mxu1 %v18658_v27  ;;  %18711 = vmatprep.subr.bf16.mxu0 %v20125_v43  ;;  %v8124_v5 = vand.u32 4294901760, %v16128_v26 }
 0xca2   :  { %17619 = vmatmul.mubr.f32.vlgmr.msra.gmra.mrb[12].mxu0 %v7549_v4  ;;  %v8222_v56 = vsub.f32 %v16128_v26, %v8124_v5 }
 0xca3   :  { %18661 = vmatpush3.bf16.msra.mxu1 %v18658_v27  ;;  %18713 = vmatpush3.bf16.msra.mxu0 %v20125_v43  ;;  %v7457_v43 = vsub.s32 3, %v19721_v2  ;;  %v20256_v27 = vpack.c.bf16 %v8121_v38, %v8118_v39 }
 0xca4   :  { %17637 = vmatprep.mubr.f32.mxu0 %v7539_v62  ;;  %18663 = vmatprep.subr.bf16.mxu1 %v18662_v49  ;;  %v8223_v45 = vand.u32 4294901760, %v8222_v56  ;;  %v18746_v50 = vpack.c.bf16 %v8229_v59, %v8222_v56 }
 0xca5   :  { %18715 = vmatprep.subr.bf16.mxu0 %v20168_v51 }
 0xca6   :  { %17562 = vmatmul.mubr.f32.vlgmr.msra.gmra.mrb[10].mxu1 %v7549_v4  ;;  %v8224_v62 = vsub.f32 %v8222_v56, %v8223_v45 }
 0xca7   :  { %18665 = vmatpush3.bf16.msra.mxu1 %v18662_v49  ;;  %17580 = vmatprep.mubr.f32.mxu1 %v7540_v16  ;;  %v20258_v49 = vpack.c.bf16 %v8127_v3, %v8124_v5 }
 0xca8   :  { %18717 = vmatpush3.bf16.msra.mxu0 %v20168_v51  ;;  %18667 = vmatprep.subr.bf16.mxu1 %v18666_v11  ;;  %v7458_v51 = vrot.slane %v20050_v58, %v7457_v43  ;;  %v8225_v16 = vand.u32 4294901760, %v8224_v62 }
 0xca9   :  { %18719 = vmatprep.subr.bf16.mxu0 %v20180_v42 }
 0xcab   :  { %18669 = vmatpush3.bf16.msra.mxu1 %v18666_v11  ;;  %v8208_v11 = vsub.f32 %v16126_v35, %v8118_v39 }
 0xcac   :  { %18721 = vmatpush3.bf16.msra.mxu0 %v20180_v42  ;;  %18671 = vmatprep.subr.bf16.mxu1 %v18670_v10 }
 0xcad   :  { %18723 = vmatprep.subr.bf16.mxu0 %v20192_v60 }
 0xcaf   :  { %18673 = vmatpush3.bf16.msra.mxu1 %v18670_v10  ;;  %v8215_v10 = vsub.f32 %v16127_v37, %v8121_v38 }
 0xcb0   :  { %18725 = vmatpush3.bf16.msra.mxu0 %v20192_v60  ;;  %18675 = vmatprep.subr.bf16.mxu1 %v18674_v52 }
 0xcb1   :  { %v8216_v40 = vand.u32 4294901760, %v8215_v10  ;;  %v18742_v17 = vpack.c.bf16 %v8215_v10, %v8208_v11 }
 0xcb3   :  { %17638 = vmatmul.mubr.f32.vlgmr.msra.gmra.mrb[12].mxu0 %v7549_v4  ;;  %18677 = vmatpush3.bf16.msra.mxu1 %v18674_v52  ;;  %v8209_v52 = vand.u32 4294901760, %v8208_v11  ;;  %v8217_v41 = vsub.f32 %v8215_v10, %v8216_v40  ;;  %v8230_v4 = vand.u32 4294901760, %v8229_v59 }
 0xcb4   :  { %18727 = vmatprep.subr.bf16.mxu1 %v20256_v27 }
 0xcb5   :  { %v8210_v36 = vsub.f32 %v8208_v11, %v8209_v52  ;;  %v8218_v7 = vand.u32 4294901760, %v8217_v41  ;;  %v20264_v18 = vpack.c.bf16 %v8216_v40, %v8209_v52  ;;  %v20266_v19 = vpack.c.bf16 %v8230_v4, %v8223_v45 }
 0xcb6   :  { %17581 = vmatmul.mubr.f32.vlgmr.msra.gmra.mrb[10].mxu1 %v7550_v48  ;;  %v8231_v48 = vsub.f32 %v8229_v59, %v8230_v4 }
 0xcb7   :  { %18729 = vmatpush3.bf16.msra.mxu1 %v20256_v27  ;;  %v8211_v63 = vand.u32 4294901760, %v8210_v36 }
 0xcb8   :  { %18731 = vmatprep.subr.bf16.mxu1 %v20258_v49  ;;  %v8232_v46 = vand.u32 4294901760, %v8231_v48 }
 0xcb9   :  { %v18734_v61 = vpack.c.bf16 %v8218_v7, %v8211_v63 }
 0xcba   :  { %v18738_v54 = vpack.c.bf16 %v8232_v46, %v8225_v16 }
 0xcbb   :  { %18733 = vmatpush3.bf16.msra.mxu1 %v20258_v49 }
 0xcbc   :  { %18735 = vmatprep.subr.bf16.mxu1 %v18734_v61 }
 0xd86   :  { %v17639_v9 = vpop.f32.mrb[12].mxu0 }
 0xd87   :  { %v8036_v55 = vpop.f32.mrb[13].mxu0 }
 0xd89   :  { %v17582_v23 = vpop.f32.mrb[10].mxu1 }
 0xd8a   :  { %v19122_v42 = vadd.f32 %v17582_v23, %v7458_v51  ;;  %v7760_v20 = vpop.f32.mrb[11].mxu1 }
 0xd8b   :  { %v19124_v24 = vadd.f32 %v7760_v20, %v7458_v51 }
 0xd8c   :  { %v19123_v25 = vadd.f32 %v19122_v42, %v17639_v9 }
 0xd8d   :  { %v19125_v28 = vadd.f32 %v19124_v24, %v8036_v55 }
 0xd8e   :  { %v20223_v60 = vadd.f32 %v19123_v25, %v20056_v0 }
 0xd8f   :  { %v20226_v13 = vadd.f32 %v19125_v28, %v20058_v1 }
 0xd90   :  { %v8053_v29 = vsel %vm42_vm0, %v20223_v60, 0.0 }
 0xd91   :  { %8054 = vadd.xlane.f32.xlu1 %v8053_v29  ;;  %v8050_v58 = vsel %vm42_vm0, %v20226_v13, 0.0 }
 0xd92   :  { %8051 = vadd.xlane.f32.xlu0 %v8050_v58 }
 0xe1e   :  { %v8055_v30 = vpop.xlane.xlu1 %8054 }
 0xe1f   :  { %v8057_v12 = vmul.f32 0.03125, %v8055_v30  ;;  %v8052_v31 = vpop.xlane.xlu0 %8051 }
 0xe20   :  { %v8056_v32 = vmul.f32 0.03125, %v8052_v31 }
 0xe21   :  { %v20233_v15 = vsub.f32 %v20223_v60, %v8057_v12 }
 0xe22   :  { %v20236_v0 = vsub.f32 %v20226_v13, %v8056_v32 }
 0xe23   :  { %v8061_v1 = vmul.f32 %v20233_v15, %v20233_v15 }
 0xe24   :  { %v8060_v44 = vmul.f32 %v20236_v0, %v20236_v0 }
 0xe25   :  { %v8065_v33 = vsel %vm42_vm0, %v8061_v1, 0.0 }
 0xe26   :  { %8066 = vadd.xlane.f32.xlu1 %v8065_v33  ;;  %v8062_v34 = vsel %vm42_vm0, %v8060_v44, 0.0  ;;  %v16125_v44 = vld [vmem:[%s20752_s7 + $0x8] sm:$0xff] }
 0xe27   :  { %8063 = vadd.xlane.f32.xlu0 %v8062_v34  ;;  %v8093_v33 = vrot.slane %v16125_v44, %v87_v6  ;;  %v8099_v37 = vrot.slane %v16125_v44, %v93_v8 }
 0xeb3   :  { %v8067_v9 = vpop.xlane.xlu1 %8066 }
 0xeb4   :  { %v8069_v51 = vmul.f32 0.032258064, %v8067_v9  ;;  %v8064_v55 = vpop.xlane.xlu0 %8063 }
 0xeb5   :  { %v8068_v23 = vmul.f32 0.032258064, %v8064_v55 }
 0xeb6   :  { %19512 = vrsqrt.f32 %v8069_v51  ;;  %vm8079_vm12 = vcmp.eq.f32.partialorder %v8069_v51, inf  ;;  %v8082_v25 = vand.u32 2147483648, %v8069_v51  ;;  %vm8081_vm13 = vcmp.eq.f32.partialorder %v8069_v51, 0.0 }
 0xeb7   :  { %19514 = vrsqrt.f32 %v8068_v23  ;;  %vm8072_vm14 = vcmp.eq.f32.partialorder %v8068_v23, inf  ;;  %v8075_v58 = vand.u32 2147483648, %v8068_v23  ;;  %vm8074_vm15 = vcmp.eq.f32.partialorder %v8068_v23, 0.0 }
 0xec0   :  { %v19513_v42 = vpop.eup %19512 }
 0xec1   :  { %v19515_v20 = vpop.eup %19514  ;;  %v8078_v24 = vmul.f32 %v19513_v42, %v8069_v51 }
 0xec2   :  { %v8071_v28 = vmul.f32 %v19515_v20, %v8068_v23 }
 0xec3   :  { %v8080_v29 = vsel %vm8079_vm12, %v8069_v51, %v8078_v24 }
 0xec4   :  { %v8083_v30 = vsel %vm8081_vm13, %v8082_v25, %v8080_v29  ;;  %v8073_v12 = vsel %vm8072_vm14, %v8068_v23, %v8071_v28 }
 0xec5   :  { %v8085_v31 = vadd.f32 1e-06, %v8083_v30  ;;  %v8076_v32 = vsel %vm8074_vm15, %v8075_v58, %v8073_v12 }
 0xec6   :  { %v8084_v1 = vadd.f32 1e-06, %v8076_v32 }
 0xec7   :  { %19516 = vrcp.f32 %v8085_v31 }
 0xec8   :  { %19518 = vrcp.f32 %v8084_v1 }
 0xed1   :  { %v19517_v34 = vpop.eup %19516 }
 0xed2   :  { %v19519_v35 = vpop.eup %19518  ;;  %v8089_v26 = vmul.f32 %v19517_v34, %v20233_v15 }
 0xed3   :  { %v8087_v39 = vmul.f32 %v19519_v35, %v20236_v0  ;;  %v8110_v0 = vrot.slane %v16125_v44, %v19752_v14 }
 0xed4   :  { %v8095_v38 = vmul.f32 %v8093_v33, %v8089_v26 }
 0xed5   :  { %v8094_v47 = vmul.f32 %v8093_v33, %v8087_v39 }
 0xed6   :  { %v8101_v5 = vadd.f32 %v8099_v37, %v8095_v38 }
 0xed7   :  { %v8100_v3 = vadd.f32 %v8099_v37, %v8094_v47 }
 0xed8   :  { %v8115_v11 = vsel %vm42_vm0, %v8101_v5, 0 }
 0xed9   :  { %v8112_v10 = vsel %vm42_vm0, %v8100_v3, 0  ;;  %v8196_v52 = vand.u32 4294901760, %v8115_v11 }
 0xeda   :  { %v8186_v40 = vand.u32 4294901760, %v8112_v10 }
 0xedb   :  { %v8197_v6 = vsub.f32 %v8115_v11, %v8196_v52 }
 0xedc   :  { %v8187_v36 = vsub.f32 %v8112_v10, %v8186_v40 }
 0xedd   :  { %v8198_v41 = vand.u32 4294901760, %v8197_v6 }
 0xede   :  { %v8188_v56 = vand.u32 4294901760, %v8187_v36 }
 0xedf   :  { %v8199_v59 = vsub.f32 %v8197_v6, %v8198_v41 }
 0xee0   :  { %v8189_v8 = vsub.f32 %v8187_v36, %v8188_v56 }
 0xee1   :  { %v8200_v15 = vand.u32 4294901760, %v8199_v59 }
 0xee2   :  { %v8190_v63 = vand.u32 4294901760, %v8189_v8 }
 0xee4   :  { %17648 = vmatprep.mubr.f32.mxu1 %v8190_v63 }
 0xee5   :  { %17649 = vmatmul.mubr.f32.vlgmr.msra.gmra.mrb[12].mxu1 %v8200_v15 }
 0xee6   :  { %18737 = vmatpush3.bf16.msra.mxu1 %v18734_v61  ;;  %17659 = vmatprep.mubr.f32.mxu1 %v8186_v40 }
 0xee7   :  { %18739 = vmatprep.subr.bf16.mxu1 %v18738_v54 }
 0xeea   :  { %18741 = vmatpush3.bf16.msra.mxu1 %v18738_v54 }
 0xeeb   :  { %18743 = vmatprep.subr.bf16.mxu1 %v18742_v17 }
 0xeed   :  { %17660 = vmatmul.mubr.f32.vlgmr.msra.gmra.mrb[12].mxu1 %v8196_v52 }
 0xeee   :  { %18745 = vmatpush3.bf16.msra.mxu1 %v18742_v17  ;;  %17670 = vmatprep.mubr.f32.mxu1 %v8187_v36 }
 0xeef   :  { %18747 = vmatprep.subr.bf16.mxu1 %v18746_v50 }
 0xef2   :  { %18749 = vmatpush3.bf16.msra.mxu1 %v18746_v50 }
 0xef3   :  { %18751 = vmatprep.subr.bf16.mxu1 %v20256_v27 }
 0xef5   :  { %17671 = vmatmul.mubr.f32.vlgmr.msra.gmra.mrb[12].mxu1 %v8197_v6 }
 0xef6   :  { %18753 = vmatpush3.bf16.msra.mxu1 %v20256_v27  ;;  %17681 = vmatprep.mubr.f32.mxu1 %v8188_v56 }
 0xef7   :  { %18755 = vmatprep.subr.bf16.mxu1 %v20258_v49 }
 0xefa   :  { %18757 = vmatpush3.bf16.msra.mxu1 %v20258_v49 }
 0xefb   :  { %18759 = vmatprep.subr.bf16.mxu1 %v20264_v18 }
 0xefd   :  { %17682 = vmatmul.mubr.f32.vlgmr.msra.gmra.mrb[12].mxu1 %v8198_v41 }
 0xefe   :  { %18761 = vmatpush3.bf16.msra.mxu1 %v20264_v18  ;;  %17692 = vmatprep.mubr.f32.mxu1 %v8186_v40 }
 0xeff   :  { %18763 = vmatprep.subr.bf16.mxu1 %v20266_v19 }
 0xf02   :  { %18765 = vmatpush3.bf16.msra.mxu1 %v20266_v19 }
 0xf03   :  { %18767 = vmatprep.subr.bf16.mxu1 %v20256_v27 }
 0xf05   :  { %17693 = vmatmul.mubr.f32.vlgmr.msra.gmra.mrb[12].mxu1 %v8196_v52 }
 0xf06   :  { %18769 = vmatpush3.bf16.msra.mxu1 %v20256_v27  ;;  %17703 = vmatprep.mubr.f32.mxu1 %v8186_v40 }
 0xf07   :  { %18771 = vmatprep.subr.bf16.mxu1 %v20258_v49 }
 0xf0a   :  { %18773 = vmatpush3.bf16.msra.mxu1 %v20258_v49 }
 0xf0d   :  { %17704 = vmatmul.mubr.f32.vlgmr.msra.gmra.mrb[12].mxu1 %v8196_v52 }
 0xfe0   :  { %v17705_v7 = vpop.f32.mrb[12].mxu1 }
 0xfe1   :  { %v20292_v45 = vadd.f32 %v17705_v7, %v8110_v0  ;;  %v8635_v4 = vpop.f32.mrb[13].mxu1 }
 0xfe2   :  { %v20294_v61 = vadd.f32 %v8635_v4, %v8110_v0 }
 0xfe3   :  { %8654 = vrot.lane.b32.xlu1 %v20292_v45, %s19596_s25  ;;  %v8658_v54 = vsel %vm649_vm5, %v20292_v45, 0 }
 0xfe4   :  { %8652 = vrot.lane.b32.xlu0 %v20294_v61, %s19596_s25  ;;  %v8656_v27 = vsel %vm649_vm5, %v20294_v61, 0  ;;  %v20315_v17 = vand.u32 4294901760, %v8658_v54 }
 0xfe5   :  { %v20302_v62 = vand.u32 4294901760, %v8656_v27 }
 0xfe6   :  { %v8742_v9 = vsub.f32 %v8658_v54, %v20315_v17 }
 0xfe7   :  { %9708 = vrot.lane.b32.xlu1 %v20292_v45, %s19597_s26  ;;  %v8732_v49 = vsub.f32 %v8656_v27, %v20302_v62 }
 0xfe8   :  { %9702 = vrot.lane.b32.xlu0 %v20294_v61, %s19598_s27  ;;  %v8743_v25 = vand.u32 4294901760, %v8742_v9 }
 0xfe9   :  { %v8733_v48 = vand.u32 4294901760, %v8732_v49 }
 0xfea   :  { %v8744_v12 = vsub.f32 %v8742_v9, %v8743_v25 }
 0xfeb   :  { %9706 = vrot.lane.b32.xlu1 %v20294_v61, %s19597_s26  ;;  %v8734_v16 = vsub.f32 %v8732_v49, %v8733_v48 }
 0xfec   :  { %v8745_v1 = vand.u32 4294901760, %v8744_v12 }
 0xfed   :  { %v8735_v46 = vand.u32 4294901760, %v8734_v16 }
 0xfef   :  { %9704 = vrot.lane.b32.xlu1 %v20292_v45, %s19598_s27  ;;  %17710 = vmatprep.mubr.f32.mxu1 %v8735_v46 }
0x1055   :  { %v8655_v50 = vpop.permute.xlu1 %8654 }
0x1056   :  { %v8662_v18 = vsel %vm649_vm5, %v8655_v50, 0  ;;  %v8653_v19 = vpop.permute.xlu0 %8652 }
0x1057   :  { %v8668_v51 = vand.u32 4294901760, %v8662_v18  ;;  %v8660_v55 = vsel %vm649_vm5, %v8653_v19, 0  ;;  %v20333_v19 = vld [vmem:[%s20747_s2 + $0x8] sm:$0xff] }
0x1058   :  { %v8665_v23 = vand.u32 4294901760, %v8660_v55 }
0x1059   :  { %v8760_v42 = vsub.f32 %v8662_v18, %v8668_v51  ;;  %v9709_v34 = vpop.permute.xlu1 %9708 }
0x105a   :  { %v18774_v20 = vpack.c.bf16 %v8668_v51, %v8665_v23  ;;  %v8753_v24 = vsub.f32 %v8660_v55, %v8665_v23  ;;  %v9703_v26 = vpop.permute.xlu0 %9702  ;;  %v9716_v38 = vsel %vm649_vm5, %v9709_v34, 0  ;;  %v20339_v55 = vld [vmem:[%s20747_s2] sm:$0xff] }
0x105b   :  { %v8761_v28 = vand.u32 4294901760, %v8760_v42  ;;  %v9710_v47 = vsel %vm649_vm5, %v9703_v26, 0  ;;  %v9722_v3 = vand.u32 4294901760, %v9716_v38 }
0x105c   :  { %v8754_v29 = vand.u32 4294901760, %v8753_v24  ;;  %18775 = vmatprep.subr.bf16.mxu1 %v18774_v20  ;;  %v18782_v33 = vpack.c.bf16 %v8760_v42, %v8753_v24  ;;  %v9785_v11 = vand.u32 4294901760, %v9710_v47 }
0x105d   :  { %v8762_v58 = vsub.f32 %v8760_v42, %v8761_v28  ;;  %18777 = vmatpush3.bf16.xpose.msra.mxu1 %v18774_v20  ;;  %v9707_v35 = vpop.permute.xlu1 %9706  ;;  %v9814_v40 = vsub.f32 %v9716_v38, %v9722_v3 }
0x105e   :  { %v8755_v30 = vsub.f32 %v8753_v24, %v8754_v29  ;;  %v18790_v37 = vpack.c.bf16 %v8761_v28, %v8754_v29  ;;  %v9714_v39 = vsel %vm649_vm5, %v9707_v35, 0  ;;  %v9786_v6 = vsub.f32 %v9710_v47, %v9785_v11 }
0x105f   :  { %v8763_v31 = vand.u32 4294901760, %v8762_v58  ;;  %v9719_v5 = vand.u32 4294901760, %v9714_v39  ;;  %v9815_v56 = vand.u32 4294901760, %v9814_v40 }
0x1060   :  { %v8756_v32 = vand.u32 4294901760, %v8755_v30  ;;  %v9787_v8 = vand.u32 4294901760, %v9786_v6 }
0x1061   :  { %v9807_v10 = vsub.f32 %v9714_v39, %v9719_v5  ;;  %v9705_v52 = vpop.permute.xlu1 %9704  ;;  %v18822_v63 = vpack.c.bf16 %v9722_v3, %v9719_v5  ;;  %v9816_v0 = vsub.f32 %v9814_v40, %v9815_v56 }
0x1062   :  { %v18778_v44 = vpack.c.bf16 %v8763_v31, %v8756_v32  ;;  %v9712_v36 = vsel %vm649_vm5, %v9705_v52, 0  ;;  %v9788_v4 = vsub.f32 %v9786_v6, %v9787_v8 }
0x1063   :  { %v9808_v41 = vand.u32 4294901760, %v9807_v10  ;;  %v9795_v59 = vand.u32 4294901760, %v9712_v36  ;;  %v18830_v18 = vpack.c.bf16 %v9814_v40, %v9807_v10 }
0x1064   :  { %17711 = vmatmul.mubr.f32.vlgmr.msra.gmra.mrb[14].mxu1 %v8745_v1  ;;  %18779 = vmatprep.subr.bf16.mxu1 %v18778_v44  ;;  %v9789_v16 = vand.u32 4294901760, %v9788_v4 }
0x1065   :  { %18781 = vmatpush3.bf16.xpose.msra.mxu1 %v18778_v44  ;;  %17717 = vmatprep.mubr.f32.mxu1 %v20302_v62  ;;  %v9809_v15 = vsub.f32 %v9807_v10, %v9808_v41  ;;  %v9796_v7 = vsub.f32 %v9712_v36, %v9795_v59 }
0x1066   :  { %18783 = vmatprep.subr.bf16.mxu1 %v18782_v33 }
0x1067   :  { %v9810_v27 = vand.u32 4294901760, %v9809_v15 }
0x106c   :  { %17718 = vmatmul.mubr.f32.vlgmr.msra.gmra.mrb[14].mxu1 %v20315_v17 }
0x106d   :  { %18785 = vmatpush3.bf16.xpose.msra.mxu1 %v18782_v33  ;;  %17724 = vmatprep.mubr.f32.mxu1 %v8732_v49  ;;  %v9797_v49 = vand.u32 4294901760, %v9796_v7 }
0x106e   :  { %18787 = vmatprep.subr.bf16.mxu1 %v18774_v20 }
0x106f   :  { %v9798_v54 = vsub.f32 %v9796_v7, %v9797_v49 }
0x1071   :  { %v9799_v50 = vand.u32 4294901760, %v9798_v54 }
0x1074   :  { %17725 = vmatmul.mubr.f32.vlgmr.msra.gmra.mrb[14].mxu1 %v8742_v9 }
0x1075   :  { %18789 = vmatpush3.bf16.xpose.msra.mxu1 %v18774_v20  ;;  %17731 = vmatprep.mubr.f32.mxu1 %v8733_v48  ;;  %v9817_v48 = vand.u32 4294901760, %v9816_v0 }
0x1076   :  { %18791 = vmatprep.subr.bf16.mxu1 %v18790_v37 }
0x1077   :  { %v18826_v46 = vpack.c.bf16 %v9817_v48, %v9810_v27 }
0x107c   :  { %17732 = vmatmul.mubr.f32.vlgmr.msra.gmra.mrb[14].mxu1 %v8743_v25 }
0x107d   :  { %18793 = vmatpush3.bf16.xpose.msra.mxu1 %v18790_v37  ;;  %17738 = vmatprep.mubr.f32.mxu1 %v20302_v62 }
0x107e   :  { %18795 = vmatprep.subr.bf16.mxu1 %v18774_v20 }
0x1084   :  { %17739 = vmatmul.mubr.f32.vlgmr.msra.gmra.mrb[14].mxu1 %v20315_v17 }
0x1085   :  { %18797 = vmatpush3.bf16.xpose.msra.mxu1 %v18774_v20  ;;  %17745 = vmatprep.mubr.f32.mxu1 %v20302_v62  ;;  %v18838_v62 = vpack.c.bf16 %v9815_v56, %v9808_v41 }
0x1086   :  { %18823 = vmatprep.subr.bf16.mxu1 %v18822_v63 }
0x108c   :  { %17746 = vmatmul.mubr.f32.vlgmr.msra.gmra.mrb[14].mxu1 %v20315_v17 }
0x108d   :  { %18825 = vmatpush3.bf16.xpose.msra.mxu1 %v18822_v63  ;;  %17794 = vmatprep.mubr.f32.mxu1 %v9789_v16 }
0x108e   :  { %18827 = vmatprep.subr.bf16.mxu1 %v18826_v46 }
0x1094   :  { %17795 = vmatmul.mubr.f32.vlgmr.msra.gmra.mrb[16].mxu1 %v9799_v50 }
0x1095   :  { %18829 = vmatpush3.bf16.xpose.msra.mxu1 %v18826_v46  ;;  %17801 = vmatprep.mubr.f32.mxu1 %v9785_v11 }
0x1096   :  { %18831 = vmatprep.subr.bf16.mxu1 %v18830_v18 }
0x109c   :  { %17802 = vmatmul.mubr.f32.vlgmr.msra.gmra.mrb[16].mxu1 %v9795_v59 }
0x109d   :  { %18833 = vmatpush3.bf16.xpose.msra.mxu1 %v18830_v18  ;;  %17808 = vmatprep.mubr.f32.mxu1 %v9786_v6 }
0x109e   :  { %18835 = vmatprep.subr.bf16.mxu1 %v18822_v63 }
0x10a4   :  { %17809 = vmatmul.mubr.f32.vlgmr.msra.gmra.mrb[16].mxu1 %v9796_v7 }
0x10a5   :  { %18837 = vmatpush3.bf16.xpose.msra.mxu1 %v18822_v63  ;;  %17815 = vmatprep.mubr.f32.mxu1 %v9787_v8 }
0x10a6   :  { %18839 = vmatprep.subr.bf16.mxu1 %v18838_v62 }
0x10ac   :  { %17816 = vmatmul.mubr.f32.vlgmr.msra.gmra.mrb[16].mxu1 %v9797_v49 }
0x10ad   :  { %18841 = vmatpush3.bf16.xpose.msra.mxu1 %v18838_v62  ;;  %17822 = vmatprep.mubr.f32.mxu1 %v9785_v11 }
0x10ae   :  { %18843 = vmatprep.subr.bf16.mxu1 %v18822_v63 }
0x10b4   :  { %17823 = vmatmul.mubr.f32.vlgmr.msra.gmra.mrb[16].mxu1 %v9795_v59 }
0x10b5   :  { %18845 = vmatpush3.bf16.xpose.msra.mxu1 %v18822_v63  ;;  %17829 = vmatprep.mubr.f32.mxu1 %v9785_v11 }
0x10bc   :  { %17830 = vmatmul.mubr.f32.vlgmr.msra.gmra.mrb[16].mxu1 %v9795_v59 }
0x115f   :  { %v17747_v17 = vpop.f32.mrb[14].mxu1 }
0x1160   :  { %v19128_v9 = vadd.f32 %v20333_v19, %v17747_v17  ;;  %v9156_v51 = vpop.f32.mrb[15].mxu1 }
0x1161   :  { %v19129_v23 = vadd.f32 %v20339_v55, %v9156_v51 }
0x1162   :  { %v9169_v42 = vsel %vm1160_vm6, %v19128_v9, -inf }
0x1163   :  { %9170 = vmax.xlane.f32.xlu1 %v9169_v42  ;;  %v9166_v20 = vsel %vm1160_vm6, %v19129_v23, -inf }
0x1164   :  { %9167 = vmax.xlane.f32.xlu0 %v9166_v20 }
0x1174   :  { %11752 = vrot.lane.b32.xlu1 %v20292_v45, %s19599_s11 }
0x1178   :  { %11746 = vrot.lane.b32.xlu1 %v20294_v61, %s19600_s12 }
0x117c   :  { %11748 = vrot.lane.b32.xlu1 %v20292_v45, %s19600_s12 }
0x118f   :  { %v17831_v24 = vpop.f32.mrb[16].mxu1 }
0x1190   :  { %v19130_v25 = vadd.f32 %v20333_v19, %v17831_v24  ;;  %v10210_v28 = vpop.f32.mrb[17].mxu1 }
0x1191   :  { %v19131_v29 = vadd.f32 %v20339_v55, %v10210_v28 }
0x1192   :  { %v10223_v58 = vsel %vm1160_vm6, %v19130_v25, -inf }
0x1193   :  { %10224 = vmax.xlane.f32.xlu0 %v10223_v58  ;;  %v10220_v30 = vsel %vm1160_vm6, %v19131_v29, -inf }
0x1197   :  { %10221 = vmax.xlane.f32.xlu0 %v10220_v30 }
0x11ad   :  { %11750 = vrot.lane.b32.xlu0 %v20294_v61, %s19599_s11 }
0x11f0   :  { %v9171_v12 = vpop.xlane.xlu1 %9170 }
0x11f1   :  { %v9173_v31 = vsub.f32 %v19128_v9, %v9171_v12  ;;  %v9168_v32 = vpop.xlane.xlu0 %9167 }
0x11f2   :  { %v9172_v1 = vsub.f32 %v19129_v23, %v9168_v32 }
0x11f3   :  { %v9176_v44 = vmul.f32 1.442695, %v9173_v31 }
0x11f4   :  { %v9174_v33 = vmul.f32 1.442695, %v9172_v1  ;;  %v11753_v34 = vpop.permute.xlu1 %11752 }
0x11f5   :  { %19520 = vpow2.f32 %v9176_v44  ;;  %v11760_v6 = vsel %vm649_vm5, %v11753_v34, 0 }
0x11f6   :  { %19522 = vpow2.f32 %v9174_v33  ;;  %v11766_v59 = vand.u32 4294901760, %v11760_v6 }
0x11f8   :  { %v11747_v35 = vpop.permute.xlu1 %11746  ;;  %v11858_v7 = vsub.f32 %v11760_v6, %v11766_v59 }
0x11f9   :  { %v11754_v37 = vsel %vm649_vm5, %v11747_v35, 0 }
0x11fa   :  { %v20357_v26 = vand.u32 4294901760, %v11754_v37  ;;  %v11859_v16 = vand.u32 4294901760, %v11858_v7 }
0x11fc   :  { %v20360_v39 = vsub.f32 %v11754_v37, %v20357_v26  ;;  %v11749_v40 = vpop.permute.xlu1 %11748  ;;  %v11860_v62 = vsub.f32 %v11858_v7, %v11859_v16 }
0x11fd   :  { %v11756_v41 = vsel %vm649_vm5, %v11749_v40, 0 }
0x11fe   :  { %v11831_v38 = vand.u32 4294901760, %v20360_v39  ;;  %v11839_v8 = vand.u32 4294901760, %v11756_v41  ;;  %v11861_v20 = vand.u32 4294901760, %v11860_v62 }
0x11ff   :  { %v20363_v47 = vpop.eup %19520 }
0x1200   :  { %v20365_v5 = vpop.eup %19522  ;;  %v9181_v3 = vsel %vm1160_vm6, %v20363_v47, 0.0  ;;  %v11832_v11 = vsub.f32 %v20360_v39, %v11831_v38  ;;  %v11840_v27 = vsub.f32 %v11756_v41, %v11839_v8 }
0x1201   :  { %9182 = vadd.xlane.f32.xlu1 %v9181_v3  ;;  %v9178_v10 = vsel %vm1160_vm6, %v20365_v5, 0.0 }
0x1202   :  { %9179 = vadd.xlane.f32.xlu0 %v9178_v10  ;;  %v11833_v52 = vand.u32 4294901760, %v11832_v11  ;;  %v11841_v54 = vand.u32 4294901760, %v11840_v27 }
0x1204   :  { %17938 = vmatprep.mubr.f32.mxu1 %v11833_v52  ;;  %v11842_v9 = vsub.f32 %v11840_v27, %v11841_v54 }
0x1212   :  { %9190 = vrot.lane.b32.xlu1 %v20292_v45, %s19601_s13 }
0x1218   :  { %9188 = vrot.lane.b32.xlu0 %v20294_v61, %s19601_s13 }
0x1220   :  { %v10225_v36 = vpop.xlane.xlu0 %10224 }
0x1221   :  { %v10227_v56 = vsub.f32 %v19130_v25, %v10225_v36  ;;  %v11843_v25 = vand.u32 4294901760, %v11842_v9 }
0x1223   :  { %v10230_v63 = vmul.f32 1.442695, %v10227_v56 }
0x1224   :  { %v10222_v15 = vpop.xlane.xlu0 %10221 }
0x1225   :  { %v10226_v0 = vsub.f32 %v19131_v29, %v10222_v15  ;;  %19524 = vpow2.f32 %v10230_v63 }
0x1227   :  { %v10228_v4 = vmul.f32 1.442695, %v10226_v0 }
0x1228   :  { %v11751_v49 = vpop.permute.xlu0 %11750 }
0x1229   :  { %19526 = vpow2.f32 %v10228_v4  ;;  %v11758_v48 = vsel %vm649_vm5, %v11751_v49, 0 }
0x122a   :  { %v11763_v46 = vand.u32 4294901760, %v11758_v48 }
0x122c   :  { %v18870_v50 = vpack.c.bf16 %v11766_v59, %v11763_v46  ;;  %v11851_v18 = vsub.f32 %v11758_v48, %v11763_v46 }
0x122e   :  { %v11852_v17 = vand.u32 4294901760, %v11851_v18  ;;  %18871 = vmatprep.subr.bf16.mxu1 %v18870_v50  ;;  %v18878_v30 = vpack.c.bf16 %v11858_v7, %v11851_v18 }
0x122f   :  { %18873 = vmatpush3.bf16.xpose.msra.mxu1 %v18870_v50  ;;  %v20381_v23 = vpop.eup %19524 }
0x1230   :  { %v11853_v51 = vsub.f32 %v11851_v18, %v11852_v17  ;;  %v10235_v29 = vsel %vm1160_vm6, %v20381_v23, 0.0  ;;  %v18886_v12 = vpack.c.bf16 %v11859_v16, %v11852_v17 }
0x1232   :  { %v11854_v42 = vand.u32 4294901760, %v11853_v51 }
0x1233   :  { %v20383_v24 = vpop.eup %19526 }
0x1234   :  { %v18874_v28 = vpack.c.bf16 %v11861_v20, %v11854_v42  ;;  %v10232_v58 = vsel %vm1160_vm6, %v20383_v24, 0.0 }
0x1236   :  { %10236 = vadd.xlane.f32.xlu1 %v10235_v29  ;;  %17939 = vmatmul.mubr.f32.vlgmr.msra.gmra.mrb[18].mxu1 %v11843_v25 }
0x1237   :  { %18875 = vmatprep.subr.bf16.mxu1 %v18874_v28  ;;  %10233 = vadd.xlane.f32.xlu0 %v10232_v58 }
0x1238   :  { %18877 = vmatpush3.bf16.xpose.msra.mxu1 %v18874_v28  ;;  %17945 = vmatprep.mubr.f32.mxu1 %v20357_v26 }
0x1239   :  { %18879 = vmatprep.subr.bf16.mxu1 %v18878_v30 }
0x123f   :  { %17946 = vmatmul.mubr.f32.vlgmr.msra.gmra.mrb[18].mxu1 %v11839_v8 }
0x1240   :  { %18881 = vmatpush3.bf16.xpose.msra.mxu1 %v18878_v30  ;;  %17952 = vmatprep.mubr.f32.mxu1 %v20360_v39 }
0x1241   :  { %18883 = vmatprep.subr.bf16.mxu1 %v18870_v50 }
0x1247   :  { %17953 = vmatmul.mubr.f32.vlgmr.msra.gmra.mrb[18].mxu1 %v11840_v27  ;;  %10244 = vrot.lane.b32.xlu1 %v20292_v45, %s19602_s14 }
0x1248   :  { %18885 = vmatpush3.bf16.xpose.msra.mxu1 %v18870_v50  ;;  %17959 = vmatprep.mubr.f32.mxu1 %v11831_v38 }
0x1249   :  { %18887 = vmatprep.subr.bf16.mxu1 %v18886_v12 }
0x124b   :  { %13303 = vrot.lane.b32.xlu1 %v20292_v45, %s19603_s15 }
0x124d   :  { %10242 = vrot.lane.b32.xlu0 %v20294_v61, %s19602_s14 }
0x124f   :  { %17960 = vmatmul.mubr.f32.vlgmr.msra.gmra.mrb[18].mxu1 %v11841_v54  ;;  %13299 = vrot.lane.b32.xlu1 %v20292_v45, %s19604_s16 }
0x1250   :  { %18889 = vmatpush3.bf16.xpose.msra.mxu1 %v18886_v12  ;;  %17966 = vmatprep.mubr.f32.mxu1 %v20357_v26 }
0x1251   :  { %18891 = vmatprep.subr.bf16.mxu1 %v18870_v50  ;;  %13301 = vrot.lane.b32.xlu0 %v20294_v61, %s19603_s15 }
0x1255   :  { %13297 = vrot.lane.b32.xlu0 %v20294_v61, %s19604_s16 }
0x1257   :  { %17967 = vmatmul.mubr.f32.vlgmr.msra.gmra.mrb[18].mxu1 %v11839_v8 }
0x1258   :  { %18893 = vmatpush3.bf16.xpose.msra.mxu1 %v18870_v50  ;;  %17973 = vmatprep.mubr.f32.mxu1 %v20357_v26 }
0x125f   :  { %17974 = vmatmul.mubr.f32.vlgmr.msra.gmra.mrb[18].mxu1 %v11839_v8 }
0x128e   :  { %v9183_v31 = vpop.xlane.xlu1 %9182 }
0x128f   :  { %19528 = vrcp.f32 %v9183_v31  ;;  %v9180_v32 = vpop.xlane.xlu0 %9179 }
0x1290   :  { %19530 = vrcp.f32 %v9180_v32 }
0x1292   :  { %v9191_v1 = vpop.permute.xlu1 %9190 }
0x1293   :  { %v9204_v44 = vand.u32 4294901760, %v9191_v1  ;;  %v9189_v33 = vpop.permute.xlu0 %9188 }
0x1294   :  { %v9201_v34 = vand.u32 4294901760, %v9189_v33 }
0x1295   :  { %v9296_v35 = vsub.f32 %v9191_v1, %v9204_v44 }
0x1296   :  { %v18798_v37 = vpack.c.bf16 %v9204_v44, %v9201_v34  ;;  %v9289_v39 = vsub.f32 %v9189_v33, %v9201_v34 }
0x1297   :  { %v9297_v38 = vand.u32 4294901760, %v9296_v35 }
0x1298   :  { %v9290_v3 = vand.u32 4294901760, %v9289_v39  ;;  %18799 = vmatprep.subr.bf16.mxu0 %v18798_v37  ;;  %v18806_v16 = vpack.c.bf16 %v9296_v35, %v9289_v39 }
0x1299   :  { %v19529_v11 = vpop.eup %19528  ;;  %v9298_v10 = vsub.f32 %v9296_v35, %v9297_v38  ;;  %18801 = vmatpush3.bf16.msra.mxu0 %v18798_v37 }
0x129a   :  { %v19531_v52 = vpop.eup %19530  ;;  %v9187_v26 = vmul.f32 %v19529_v11, %v20363_v47  ;;  %v9291_v40 = vsub.f32 %v9289_v39, %v9290_v3  ;;  %v18814_v46 = vpack.c.bf16 %v9297_v38, %v9290_v3 }
0x129b   :  { %v9185_v6 = vmul.f32 %v19531_v52, %v20365_v5  ;;  %v9299_v36 = vand.u32 4294901760, %v9298_v10 }
0x129c   :  { %v9292_v41 = vand.u32 4294901760, %v9291_v40  ;;  %v9198_v56 = vsel %vm1160_vm6, %v9187_v26, 0 }
0x129d   :  { %v9195_v59 = vsel %vm1160_vm6, %v9185_v6, 0  ;;  %v20411_v8 = vand.u32 4294901760, %v9198_v56 }
0x129e   :  { %v18802_v63 = vpack.c.bf16 %v9299_v36, %v9292_v41  ;;  %v9267_v15 = vand.u32 4294901760, %v9195_v59 }
0x129f   :  { %v9278_v0 = vsub.f32 %v9198_v56, %v20411_v8 }
0x12a0   :  { %18803 = vmatprep.subr.bf16.mxu0 %v18802_v63  ;;  %v9268_v7 = vsub.f32 %v9195_v59, %v9267_v15 }
0x12a1   :  { %v9279_v4 = vand.u32 4294901760, %v9278_v0 }
0x12a2   :  { %v9269_v27 = vand.u32 4294901760, %v9268_v7 }
0x12a3   :  { %v9280_v47 = vsub.f32 %v9278_v0, %v9279_v4 }
0x12a4   :  { %v9270_v49 = vsub.f32 %v9268_v7, %v9269_v27 }
0x12a5   :  { %v9281_v5 = vand.u32 4294901760, %v9280_v47 }
0x12a6   :  { %v9271_v48 = vand.u32 4294901760, %v9270_v49 }
0x12a8   :  { %17752 = vmatprep.mubr.f32.mxu0 %v9271_v48 }
0x12a9   :  { %17753 = vmatmul.mubr.f32.vlgmr.msra.gmra.mrb[14].mxu0 %v9281_v5 }
0x12aa   :  { %18805 = vmatpush3.bf16.msra.mxu0 %v18802_v63  ;;  %17759 = vmatprep.mubr.f32.mxu0 %v9267_v15 }
0x12ab   :  { %18807 = vmatprep.subr.bf16.mxu0 %v18806_v16 }
0x12b1   :  { %17760 = vmatmul.mubr.f32.vlgmr.msra.gmra.mrb[14].mxu0 %v20411_v8 }
0x12b2   :  { %18809 = vmatpush3.bf16.msra.mxu0 %v18806_v16  ;;  %17766 = vmatprep.mubr.f32.mxu0 %v9268_v7 }
0x12b3   :  { %18811 = vmatprep.subr.bf16.mxu0 %v18798_v37 }
0x12b9   :  { %17767 = vmatmul.mubr.f32.vlgmr.msra.gmra.mrb[14].mxu0 %v9278_v0 }
0x12ba   :  { %18813 = vmatpush3.bf16.msra.mxu0 %v18798_v37  ;;  %17773 = vmatprep.mubr.f32.mxu0 %v9269_v27 }
0x12bb   :  { %18815 = vmatprep.subr.bf16.mxu0 %v18814_v46 }
0x12c1   :  { %17774 = vmatmul.mubr.f32.vlgmr.msra.gmra.mrb[14].mxu0 %v9279_v4 }
0x12c2   :  { %18817 = vmatpush3.bf16.msra.mxu0 %v18814_v46  ;;  %17780 = vmatprep.mubr.f32.mxu0 %v9267_v15 }
0x12c3   :  { %18819 = vmatprep.subr.bf16.mxu0 %v18798_v37  ;;  %v10237_v54 = vpop.xlane.xlu1 %10236 }
0x12c4   :  { %19532 = vrcp.f32 %v10237_v54  ;;  %v10234_v50 = vpop.xlane.xlu0 %10233 }
0x12c5   :  { %19534 = vrcp.f32 %v10234_v50 }
0x12c7   :  { %v10245_v18 = vpop.permute.xlu1 %10244 }
0x12c8   :  { %v10258_v62 = vand.u32 4294901760, %v10245_v18  ;;  %v10243_v17 = vpop.permute.xlu0 %10242 }
0x12c9   :  { %v10255_v9 = vand.u32 4294901760, %v10243_v17  ;;  %17781 = vmatmul.mubr.f32.vlgmr.msra.gmra.mrb[14].mxu0 %v20411_v8 }
0x12ca   :  { %v20416_v51 = vsub.f32 %v10245_v18, %v10258_v62  ;;  %18821 = vmatpush3.bf16.msra.mxu0 %v18798_v37  ;;  %17787 = vmatprep.mubr.f32.mxu0 %v9267_v15 }
0x12cb   :  { %v20418_v42 = vpack.c.bf16 %v10258_v62, %v10255_v9  ;;  %v20420_v20 = vsub.f32 %v10243_v17, %v10255_v9  ;;  %v13304_v25 = vpop.permute.xlu1 %13303 }
0x12cc   :  { %v10351_v28 = vand.u32 4294901760, %v20416_v51  ;;  %v13311_v29 = vsel %vm649_vm5, %v13304_v25, 0  ;;  %v13302_v58 = vpop.permute.xlu0 %13301 }
0x12cd   :  { %v10344_v30 = vand.u32 4294901760, %v20420_v20  ;;  %v13317_v12 = vand.u32 4294901760, %v13311_v29  ;;  %v13309_v31 = vsel %vm649_vm5, %v13302_v58, 0  ;;  %18847 = vmatprep.subr.bf16.mxu0 %v20418_v42 }
0x12ce   :  { %v19533_v32 = vpop.eup %19532  ;;  %v10352_v1 = vsub.f32 %v20416_v51, %v10351_v28  ;;  %v13314_v44 = vand.u32 4294901760, %v13309_v31 }
0x12cf   :  { %v19535_v33 = vpop.eup %19534  ;;  %v10241_v34 = vmul.f32 %v19533_v32, %v20381_v23  ;;  %v10345_v35 = vsub.f32 %v20420_v20, %v10344_v30  ;;  %v20434_v37 = vsub.f32 %v13311_v29, %v13317_v12  ;;  %v13300_v39 = vpop.permute.xlu1 %13299 }
0x12d0   :  { %v10239_v38 = vmul.f32 %v19535_v33, %v20383_v24  ;;  %v20437_v3 = vpack.c.bf16 %v13317_v12, %v13314_v44  ;;  %v20439_v11 = vsub.f32 %v13309_v31, %v13314_v44  ;;  %v13307_v10 = vsel %vm649_vm5, %v13300_v39, 0  ;;  %v13298_v52 = vpop.permute.xlu0 %13297 }
0x12d1   :  { %v13410_v26 = vand.u32 4294901760, %v20434_v37  ;;  %v20443_v40 = vand.u32 4294901760, %v13307_v10  ;;  %v13305_v23 = vsel %vm649_vm5, %v13298_v52, 0  ;;  %17788 = vmatmul.mubr.f32.vlgmr.msra.gmra.mrb[14].mxu0 %v20411_v8  ;;  %v10346_v6 = vand.u32 4294901760, %v10345_v35 }
0x12d2   :  { %v13403_v36 = vand.u32 4294901760, %v20439_v11  ;;  %v20448_v41 = vand.u32 4294901760, %v13305_v23  ;;  %18849 = vmatpush3.bf16.msra.mxu0 %v20418_v42  ;;  %18919 = vmatprep.subr.bf16.mxu1 %v20437_v3  ;;  %v10353_v24 = vand.u32 4294901760, %v10352_v1  ;;  %v10249_v56 = vsel %vm1160_vm6, %v10239_v38, 0 }
0x12d3   :  { %v13411_v59 = vsub.f32 %v20434_v37, %v13410_v26  ;;  %v13391_v63 = vsub.f32 %v13307_v10, %v20443_v40  ;;  %18921 = vmatpush3.bf16.xpose.msra.mxu1 %v20437_v3  ;;  %v20456_v15 = vand.u32 4294901760, %v10249_v56  ;;  %v10252_v8 = vsel %vm1160_vm6, %v10241_v34, 0 }
0x12d4   :  { %v13404_v0 = vsub.f32 %v20439_v11, %v13403_v36  ;;  %v13381_v7 = vsub.f32 %v13305_v23, %v20448_v41  ;;  %v18850_v4 = vpack.c.bf16 %v10353_v24, %v10346_v6  ;;  %v20461_v27 = vand.u32 4294901760, %v10252_v8 }
0x12d5   :  { %v13392_v47 = vand.u32 4294901760, %v13391_v63  ;;  %v13412_v49 = vand.u32 4294901760, %v13411_v59  ;;  %v10322_v48 = vsub.f32 %v10249_v56, %v20456_v15  ;;  %v18926_v32 = vpack.c.bf16 %v20434_v37, %v20439_v11 }
0x12d6   :  { %v13382_v5 = vand.u32 4294901760, %v13381_v7  ;;  %18851 = vmatprep.subr.bf16.mxu0 %v18850_v4  ;;  %v13405_v16 = vand.u32 4294901760, %v13404_v0  ;;  %v10332_v46 = vsub.f32 %v10252_v8, %v20461_v27  ;;  %v18854_v1 = vpack.c.bf16 %v20416_v51, %v20420_v20 }
0x12d7   :  { %v13393_v54 = vsub.f32 %v13391_v63, %v13392_v47  ;;  %v10323_v50 = vand.u32 4294901760, %v10322_v48  ;;  %v18934_v44 = vpack.c.bf16 %v13410_v26, %v13403_v36  ;;  %v18862_v33 = vpack.c.bf16 %v10351_v28, %v10344_v30 }
0x12d8   :  { %v18922_v18 = vpack.c.bf16 %v13412_v49, %v13405_v16  ;;  %v13383_v62 = vsub.f32 %v13381_v7, %v13382_v5  ;;  %v10333_v17 = vand.u32 4294901760, %v10332_v46 }
0x12d9   :  { %v10324_v9 = vsub.f32 %v10322_v48, %v10323_v50  ;;  %v13394_v58 = vand.u32 4294901760, %v13393_v54 }
0x12da   :  { %18923 = vmatprep.subr.bf16.mxu1 %v18922_v18  ;;  %v13384_v25 = vand.u32 4294901760, %v13383_v62  ;;  %v10334_v29 = vsub.f32 %v10332_v46, %v10333_v17 }
0x12db   :  { %v10325_v12 = vand.u32 4294901760, %v10324_v9 }
0x12dc   :  { %18052 = vmatprep.mubr.f32.mxu1 %v13384_v25  ;;  %v10335_v31 = vand.u32 4294901760, %v10334_v29 }
0x12dd   :  { %17836 = vmatprep.mubr.f32.mxu0 %v10325_v12  ;;  %18053 = vmatmul.mubr.f32.vlgmr.msra.gmra.mrb[20].mxu1 %v13394_v58 }
0x12de   :  { %18925 = vmatpush3.bf16.xpose.msra.mxu1 %v18922_v18  ;;  %17837 = vmatmul.mubr.f32.vlgmr.msra.gmra.mrb[16].mxu0 %v10335_v31 }
0x12df   :  { %18853 = vmatpush3.bf16.msra.mxu0 %v18850_v4  ;;  %18059 = vmatprep.mubr.f32.mxu1 %v20448_v41 }
0x12e0   :  { %18927 = vmatprep.subr.bf16.mxu1 %v18926_v32  ;;  %17843 = vmatprep.mubr.f32.mxu0 %v20456_v15 }
0x12e1   :  { %18855 = vmatprep.subr.bf16.mxu0 %v18854_v1 }
0x12e5   :  { %18060 = vmatmul.mubr.f32.vlgmr.msra.gmra.mrb[20].mxu1 %v20443_v40 }
0x12e6   :  { %18929 = vmatpush3.bf16.xpose.msra.mxu1 %v18926_v32  ;;  %17844 = vmatmul.mubr.f32.vlgmr.msra.gmra.mrb[16].mxu0 %v20461_v27 }
0x12e7   :  { %18857 = vmatpush3.bf16.msra.mxu0 %v18854_v1  ;;  %18066 = vmatprep.mubr.f32.mxu1 %v13381_v7 }
0x12e8   :  { %18931 = vmatprep.subr.bf16.mxu1 %v20437_v3  ;;  %17850 = vmatprep.mubr.f32.mxu0 %v10322_v48 }
0x12e9   :  { %18859 = vmatprep.subr.bf16.mxu0 %v20418_v42 }
0x12ed   :  { %18067 = vmatmul.mubr.f32.vlgmr.msra.gmra.mrb[20].mxu1 %v13391_v63 }
0x12ee   :  { %18933 = vmatpush3.bf16.xpose.msra.mxu1 %v20437_v3  ;;  %17851 = vmatmul.mubr.f32.vlgmr.msra.gmra.mrb[16].mxu0 %v10332_v46 }
0x12ef   :  { %18861 = vmatpush3.bf16.msra.mxu0 %v20418_v42  ;;  %18073 = vmatprep.mubr.f32.mxu1 %v13382_v5 }
0x12f0   :  { %18935 = vmatprep.subr.bf16.mxu1 %v18934_v44  ;;  %17857 = vmatprep.mubr.f32.mxu0 %v10323_v50 }
0x12f1   :  { %18863 = vmatprep.subr.bf16.mxu0 %v18862_v33 }
0x12f5   :  { %18074 = vmatmul.mubr.f32.vlgmr.msra.gmra.mrb[20].mxu1 %v13392_v47 }
0x12f6   :  { %18937 = vmatpush3.bf16.xpose.msra.mxu1 %v18934_v44  ;;  %17858 = vmatmul.mubr.f32.vlgmr.msra.gmra.mrb[16].mxu0 %v10333_v17 }
0x12f7   :  { %18865 = vmatpush3.bf16.msra.mxu0 %v18862_v33  ;;  %18080 = vmatprep.mubr.f32.mxu1 %v20448_v41 }
0x12f8   :  { %18939 = vmatprep.subr.bf16.mxu1 %v20437_v3  ;;  %17864 = vmatprep.mubr.f32.mxu0 %v20456_v15 }
0x12f9   :  { %18867 = vmatprep.subr.bf16.mxu0 %v20418_v42 }
0x12fd   :  { %18081 = vmatmul.mubr.f32.vlgmr.msra.gmra.mrb[20].mxu1 %v20443_v40 }
0x12fe   :  { %18941 = vmatpush3.bf16.xpose.msra.mxu1 %v20437_v3  ;;  %17865 = vmatmul.mubr.f32.vlgmr.msra.gmra.mrb[16].mxu0 %v20461_v27 }
0x12ff   :  { %18869 = vmatpush3.bf16.msra.mxu0 %v20418_v42  ;;  %18087 = vmatprep.mubr.f32.mxu1 %v20448_v41  ;;  %v16131_v42 = vld [vmem:[%s20749_s4 + $0x28] sm:$0xff] }
0x1300   :  { %17871 = vmatprep.mubr.f32.mxu0 %v20456_v15  ;;  %v20502_v37 = vand.u32 4294901760, %v16131_v42 }
0x1302   :  { %17874 = vmatprep.subr.mxu0 %v20502_v37  ;;  %v10850_v39 = vsub.f32 %v16131_v42, %v20502_v37 }
0x1304   :  { %v10851_v38 = vand.u32 4294901760, %v10850_v39 }
0x1305   :  { %18088 = vmatmul.mubr.f32.vlgmr.msra.gmra.mrb[20].mxu1 %v20443_v40 }
0x1306   :  { %17872 = vmatmul.mubr.f32.vlgmr.msra.gmra.mrb[16].mxu0 %v20461_v27  ;;  %v10852_v3 = vsub.f32 %v10850_v39, %v10851_v38 }
0x1307   :  { %17875 = vmatpush3.msra.mxu0 %v20502_v37 }
0x1308   :  { %v10853_v11 = vand.u32 4294901760, %v10852_v3 }
0x130a   :  { %17879 = vmatprep.subr.mxu0 %v10853_v11 }
0x1332   :  { %v17975_v51 = vpop.f32.mrb[18].mxu1 }
0x1333   :  { %v19132_v20 = vadd.f32 %v20333_v19, %v17975_v51  ;;  %v12254_v28 = vpop.f32.mrb[19].mxu1 }
0x1334   :  { %v19133_v30 = vadd.f32 %v20339_v55, %v12254_v28 }
0x1335   :  { %v12267_v34 = vsel %vm1160_vm6, %v19132_v20, -inf }
0x1336   :  { %12268 = vmax.xlane.f32.xlu1 %v12267_v34  ;;  %v12264_v35 = vsel %vm1160_vm6, %v19133_v30, -inf }
0x1337   :  { %12265 = vmax.xlane.f32.xlu0 %v12264_v35 }
0x1347   :  { %12288 = vrot.lane.b32.xlu1 %v20292_v45, %s19605_s0 }
0x13a4   :  { %v17789_v10 = vpop.f32.mrb[14].mxu0 }
0x13a5   :  { %v9692_v52 = vpop.f32.mrb[15].mxu0  ;;  %v11255_v31 = vsel %vm649_vm5, %v17789_v10, 0 }
0x13a6   :  { %v11252_v25 = vsel %vm649_vm5, %v9692_v52, 0  ;;  %v11333_v1 = vand.u32 4294901760, %v11255_v31 }
0x13a7   :  { %v11323_v58 = vand.u32 4294901760, %v11252_v25 }
0x13a9   :  { %v11324_v32 = vsub.f32 %v11252_v25, %v11323_v58 }
0x13ab   :  { %v11325_v33 = vand.u32 4294901760, %v11324_v32 }
0x13c3   :  { %v12269_v26 = vpop.xlane.xlu1 %12268 }
0x13c4   :  { %v12271_v40 = vsub.f32 %v19132_v20, %v12269_v26  ;;  %v12266_v23 = vpop.xlane.xlu0 %12265  ;;  %v11334_v20 = vsub.f32 %v11255_v31, %v11333_v1 }
0x13c5   :  { %v12270_v6 = vsub.f32 %v19133_v30, %v12266_v23  ;;  %v11326_v30 = vsub.f32 %v11324_v32, %v11325_v33 }
0x13c6   :  { %v12274_v36 = vmul.f32 1.442695, %v12271_v40  ;;  %v11335_v35 = vand.u32 4294901760, %v11334_v20 }
0x13c7   :  { %v12272_v41 = vmul.f32 1.442695, %v12270_v6 }
0x13c8   :  { %19536 = vpow2.f32 %v12274_v36 }
0x13c9   :  { %19538 = vpow2.f32 %v12272_v41 }
0x13d2   :  { %v20507_v24 = vpop.eup %19536 }
0x13d3   :  { %v12279_v56 = vsel %vm1160_vm6, %v20507_v24, 0.0  ;;  %v20511_v59 = vpop.eup %19538 }
0x13d4   :  { %12280 = vadd.xlane.f32.xlu0 %v12279_v56  ;;  %v12276_v63 = vsel %vm1160_vm6, %v20511_v59, 0.0 }
0x13d8   :  { %12277 = vadd.xlane.f32.xlu0 %v12276_v63  ;;  %v18089_v15 = vpop.f32.mrb[20].mxu1 }
0x13d9   :  { %v17873_v8 = vpop.f32.mrb[16].mxu0  ;;  %v13805_v0 = vpop.f32.mrb[21].mxu1  ;;  %v20533_v51 = vadd.f32 %v20333_v19, %v18089_v15 }
0x13da   :  { %v10760_v7 = vsel %vm649_vm5, %v17873_v8, 0  ;;  %v20517_v4 = vadd.f32 %v20339_v55, %v13805_v0  ;;  %v10746_v27 = vpop.f32.mrb[17].mxu0  ;;  %v16130_v55 = vld [vmem:[%s20749_s4 + $0x20] sm:$0xff] }
0x13db   :  { %v10838_v47 = vand.u32 4294901760, %v10760_v7  ;;  %v10757_v49 = vsel %vm649_vm5, %v10746_v27, 0  ;;  %v11258_v29 = vand.u32 4294901760, %v16130_v55  ;;  %v13818_v34 = vsel %vm1160_vm6, %v20533_v51, -inf }
0x13dc   :  { %v10828_v48 = vand.u32 4294901760, %v10757_v49  ;;  %v13815_v5 = vsel %vm1160_vm6, %v20517_v4, -inf }
0x13dd   :  { %v10839_v16 = vsub.f32 %v10760_v7, %v10838_v47  ;;  %13816 = vmax.xlane.f32.xlu1 %v13815_v5  ;;  %v11345_v12 = vsub.f32 %v16130_v55, %v11258_v29 }
0x13de   :  { %v10829_v46 = vsub.f32 %v10757_v49, %v10828_v48 }
0x13df   :  { %v10840_v54 = vand.u32 4294901760, %v10839_v16  ;;  %v11346_v44 = vand.u32 4294901760, %v11345_v12 }
0x13e0   :  { %v10830_v50 = vand.u32 4294901760, %v10829_v46 }
0x13e1   :  { %v10841_v18 = vsub.f32 %v10839_v16, %v10840_v54  ;;  %v11347_v28 = vsub.f32 %v11345_v12, %v11346_v44 }
0x13e2   :  { %v10831_v62 = vsub.f32 %v10829_v46, %v10830_v50 }
0x13e3   :  { %v10842_v9 = vand.u32 4294901760, %v10841_v18  ;;  %v11348_v42 = vand.u32 4294901760, %v11347_v28 }
0x13e4   :  { %v10832_v17 = vand.u32 4294901760, %v10831_v62 }
0x13e6   :  { %17876 = vmatprep.mubr.f32.mxu0 %v10832_v17 }
0x13e7   :  { %17877 = vmatmul.mubr.f32.vlgmr.msra.gmra.mrb[18].mxu0 %v10842_v9 }
0x13e8   :  { %17881 = vmatprep.mubr.f32.mxu0 %v10828_v48  ;;  %17880 = vmatpush3.msra.mxu0 %v10853_v11 }
0x13e9   :  { %17884 = vmatprep.subr.mxu0 %v10850_v39 }
0x13ee   :  { %12286 = vrot.lane.b32.xlu0 %v20294_v61, %s19605_s0  ;;  %s19607_s0 = smov [#allocation2]  }
0x13ef   :  { %17882 = vmatmul.mubr.f32.vlgmr.msra.gmra.mrb[18].mxu0 %v10838_v47 }
0x13f0   :  { %17886 = vmatprep.mubr.f32.mxu0 %v10829_v46  ;;  %17885 = vmatpush3.msra.mxu0 %v10850_v39  ;;  %v11327_v39 = vand.u32 4294901760, %v11326_v30 }
0x13f1   :  { %17889 = vmatprep.subr.mxu0 %v20502_v37 }
0x13f7   :  { %17887 = vmatmul.mubr.f32.vlgmr.msra.gmra.mrb[18].mxu0 %v10839_v16 }
0x13f8   :  { %17891 = vmatprep.mubr.f32.mxu0 %v10830_v50  ;;  %17890 = vmatpush3.msra.mxu0 %v20502_v37 }
0x13f9   :  { %17894 = vmatprep.subr.mxu0 %v10851_v38 }
0x13ff   :  { %17892 = vmatmul.mubr.f32.vlgmr.msra.gmra.mrb[18].mxu0 %v10840_v54 }
0x1400   :  { %17896 = vmatprep.mubr.f32.mxu0 %v10828_v48  ;;  %17895 = vmatpush3.msra.mxu0 %v10851_v38  ;;  %v11336_v38 = vsub.f32 %v11334_v20, %v11335_v35 }
0x1401   :  { %17899 = vmatprep.subr.mxu0 %v20502_v37 }
0x1402   :  { %v11337_v19 = vand.u32 4294901760, %v11336_v38 }
0x1407   :  { %17897 = vmatmul.mubr.f32.vlgmr.msra.gmra.mrb[18].mxu0 %v10838_v47 }
0x1408   :  { %17901 = vmatprep.mubr.f32.mxu0 %v10828_v48  ;;  %17900 = vmatpush3.msra.mxu0 %v20502_v37  ;;  %v12289_v37 = vpop.permute.xlu1 %12288 }
0x1409   :  { %17904 = vmatprep.subr.mxu0 %v11258_v29  ;;  %v12302_v11 = vand.u32 4294901760, %v12289_v37 }
0x140b   :  { %v12394_v52 = vsub.f32 %v12289_v37, %v12302_v11 }
0x140d   :  { %13819 = vmax.xlane.f32.xlu0 %v13818_v34  ;;  %v12395_v40 = vand.u32 4294901760, %v12394_v52 }
0x140f   :  { %17902 = vmatmul.mubr.f32.vlgmr.msra.gmra.mrb[18].mxu0 %v10838_v47  ;;  %v12396_v0 = vsub.f32 %v12394_v52, %v12395_v40 }
0x1410   :  { %17906 = vmatprep.mubr.f32.mxu0 %v11327_v39  ;;  %17905 = vmatpush3.msra.mxu0 %v11258_v29 }
0x1411   :  { %17909 = vmatprep.subr.mxu0 %v11348_v42 }
0x1417   :  { %17907 = vmatmul.mubr.f32.vlgmr.msra.gmra.mrb[18].mxu0 %v11337_v19 }
0x1418   :  { %17911 = vmatprep.mubr.f32.mxu0 %v11323_v58  ;;  %17910 = vmatpush3.msra.mxu0 %v11348_v42 }
0x1419   :  { %17914 = vmatprep.subr.mxu0 %v11345_v12 }
0x141f   :  { %17912 = vmatmul.mubr.f32.vlgmr.msra.gmra.mrb[18].mxu0 %v11333_v1 }
0x1420   :  { %17916 = vmatprep.mubr.f32.mxu0 %v11324_v32  ;;  %17915 = vmatpush3.msra.mxu0 %v11345_v12 }
0x1421   :  { %17919 = vmatprep.subr.mxu0 %v11258_v29 }
0x1427   :  { %17917 = vmatmul.mubr.f32.vlgmr.msra.gmra.mrb[18].mxu0 %v11334_v20 }
0x1428   :  { %17921 = vmatprep.mubr.f32.mxu0 %v11325_v33  ;;  %17920 = vmatpush3.msra.mxu0 %v11258_v29 }
0x1429   :  { %17924 = vmatprep.subr.mxu0 %v11346_v44 }
0x142f   :  { %17922 = vmatmul.mubr.f32.vlgmr.msra.gmra.mrb[18].mxu0 %v11335_v35 }
0x1430   :  { %17926 = vmatprep.mubr.f32.mxu0 %v11323_v58  ;;  %17925 = vmatpush3.msra.mxu0 %v11346_v44 }
0x1431   :  { %17929 = vmatprep.subr.mxu0 %v11258_v29 }
0x1437   :  { %17927 = vmatmul.mubr.f32.vlgmr.msra.gmra.mrb[18].mxu0 %v11333_v1 }
0x1438   :  { %17931 = vmatprep.mubr.f32.mxu0 %v11323_v58  ;;  %17930 = vmatpush3.msra.mxu0 %v11258_v29 }
0x143f   :  { %17932 = vmatmul.mubr.f32.vlgmr.msra.gmra.mrb[18].mxu0 %v11333_v1 }
0x1461   :  { %v12281_v3 = vpop.xlane.xlu0 %12280 }
0x1462   :  { %19540 = vrcp.f32 %v12281_v3 }
0x1465   :  { %v12278_v10 = vpop.xlane.xlu0 %12277 }
0x1466   :  { %19542 = vrcp.f32 %v12278_v10 }
0x1469   :  { %v12287_v26 = vpop.permute.xlu0 %12286 }
0x146a   :  { %v12299_v23 = vand.u32 4294901760, %v12287_v26  ;;  %v13817_v6 = vpop.xlane.xlu1 %13816 }
0x146b   :  { %v13821_v36 = vsub.f32 %v20517_v4, %v13817_v6  ;;  %v12397_v4 = vand.u32 4294901760, %v12396_v0 }
0x146c   :  { %v19541_v41 = vpop.eup %19540  ;;  %v18894_v56 = vpack.c.bf16 %v12302_v11, %v12299_v23  ;;  %v12387_v63 = vsub.f32 %v12287_v26, %v12299_v23 }
0x146d   :  { %v12285_v15 = vmul.f32 %v19541_v41, %v20507_v24  ;;  %v13823_v8 = vmul.f32 1.442695, %v13821_v36 }
0x146e   :  { %v12388_v7 = vand.u32 4294901760, %v12387_v63  ;;  %18895 = vmatprep.subr.bf16.mxu0 %v18894_v56  ;;  %v18902_v12 = vpack.c.bf16 %v12394_v52, %v12387_v63 }
0x146f   :  { %19544 = vpow2.f32 %v13823_v8  ;;  %18897 = vmatpush3.bf16.msra.mxu0 %v18894_v56  ;;  %v12296_v27 = vsel %vm1160_vm6, %v12285_v15, 0 }
0x1470   :  { %v19543_v47 = vpop.eup %19542  ;;  %v12389_v49 = vsub.f32 %v12387_v63, %v12388_v7  ;;  %v12375_v48 = vand.u32 4294901760, %v12296_v27  ;;  %v18910_v31 = vpack.c.bf16 %v12395_v40, %v12388_v7 }
0x1471   :  { %v12283_v5 = vmul.f32 %v19543_v47, %v20511_v59 }
0x1472   :  { %v12390_v16 = vand.u32 4294901760, %v12389_v49  ;;  %v12376_v46 = vsub.f32 %v12296_v27, %v12375_v48 }
0x1473   :  { %v12293_v54 = vsel %vm1160_vm6, %v12283_v5, 0 }
0x1474   :  { %v18898_v50 = vpack.c.bf16 %v12397_v4, %v12390_v16  ;;  %v12365_v24 = vand.u32 4294901760, %v12293_v54  ;;  %v12377_v18 = vand.u32 4294901760, %v12376_v46 }
0x1476   :  { %18899 = vmatprep.subr.bf16.mxu0 %v18898_v50  ;;  %v12366_v62 = vsub.f32 %v12293_v54, %v12365_v24  ;;  %v12378_v55 = vsub.f32 %v12376_v46, %v12377_v18 }
0x1478   :  { %v12367_v17 = vand.u32 4294901760, %v12366_v62  ;;  %v12379_v58 = vand.u32 4294901760, %v12378_v55 }
0x1479   :  { %v20543_v9 = vpop.eup %19544 }
0x147a   :  { %v13827_v25 = vsel %vm1160_vm6, %v20543_v9, 0.0  ;;  %v12368_v29 = vsub.f32 %v12366_v62, %v12367_v17 }
0x147b   :  { %13828 = vadd.xlane.f32.xlu0 %v13827_v25 }
0x147c   :  { %v12369_v59 = vand.u32 4294901760, %v12368_v29 }
0x147e   :  { %17980 = vmatprep.mubr.f32.mxu0 %v12369_v59 }
0x147f   :  { %17981 = vmatmul.mubr.f32.vlgmr.msra.gmra.mrb[20].mxu0 %v12379_v58 }
0x1480   :  { %18901 = vmatpush3.bf16.msra.mxu0 %v18898_v50  ;;  %17987 = vmatprep.mubr.f32.mxu0 %v12365_v24 }
0x1481   :  { %18903 = vmatprep.subr.bf16.mxu0 %v18902_v12 }
0x1487   :  { %17988 = vmatmul.mubr.f32.vlgmr.msra.gmra.mrb[20].mxu0 %v12375_v48 }
0x1488   :  { %18905 = vmatpush3.bf16.msra.mxu0 %v18902_v12  ;;  %17994 = vmatprep.mubr.f32.mxu0 %v12366_v62 }
0x1489   :  { %18907 = vmatprep.subr.bf16.mxu0 %v18894_v56 }
0x148f   :  { %17995 = vmatmul.mubr.f32.vlgmr.msra.gmra.mrb[20].mxu0 %v12376_v46 }
0x1490   :  { %18909 = vmatpush3.bf16.msra.mxu0 %v18894_v56  ;;  %18001 = vmatprep.mubr.f32.mxu0 %v12367_v17 }
0x1491   :  { %18911 = vmatprep.subr.bf16.mxu0 %v18910_v31  ;;  %13837 = vrot.lane.b32.xlu0 %v20294_v61, %s19606_s20  ;;  %v16132_v61 = vld [vmem:[%s20749_s4 + $0x30] sm:$0xff] }
0x1492   :  { %v20556_v28 = vand.u32 4294901760, %v16132_v61 }
0x1497   :  { %18002 = vmatmul.mubr.f32.vlgmr.msra.gmra.mrb[20].mxu0 %v12377_v18 }
0x1498   :  { %18913 = vmatpush3.bf16.msra.mxu0 %v18910_v31  ;;  %18008 = vmatprep.mubr.f32.mxu0 %v12365_v24 }
0x1499   :  { %18915 = vmatprep.subr.bf16.mxu0 %v18894_v56 }
0x149a   :  { %v13820_v32 = vpop.xlane.xlu0 %13819 }
0x149b   :  { %v13822_v1 = vsub.f32 %v20533_v51, %v13820_v32  ;;  %v12894_v51 = vsub.f32 %v16132_v61, %v20556_v28 }
0x149d   :  { %v13825_v44 = vmul.f32 1.442695, %v13822_v1  ;;  %v12895_v30 = vand.u32 4294901760, %v12894_v51 }
0x149f   :  { %19546 = vpow2.f32 %v13825_v44  ;;  %18009 = vmatmul.mubr.f32.vlgmr.msra.gmra.mrb[20].mxu0 %v12375_v48  ;;  %v12896_v34 = vsub.f32 %v12894_v51, %v12895_v30 }
0x14a0   :  { %18917 = vmatpush3.bf16.msra.mxu0 %v18894_v56  ;;  %18015 = vmatprep.mubr.f32.mxu0 %v12365_v24 }
0x14a1   :  { %18018 = vmatprep.subr.mxu0 %v20556_v28  ;;  %v12897_v35 = vand.u32 4294901760, %v12896_v34 }
0x14a7   :  { %18016 = vmatmul.mubr.f32.vlgmr.msra.gmra.mrb[20].mxu0 %v12375_v48 }
0x14a8   :  { %18019 = vmatpush3.msra.mxu0 %v20556_v28 }
0x14a9   :  { %v19547_v33 = vpop.eup %19546  ;;  %18023 = vmatprep.subr.mxu0 %v12897_v35 }
0x14aa   :  { %v13830_v20 = vsel %vm1160_vm6, %v19547_v33, 0.0 }
0x14ab   :  { %13831 = vadd.xlane.f32.xlu1 %v13830_v20  ;;  %v16133_v20 = vld [vmem:[%s20749_s4 + $0x38] sm:$0xff]  ;;  %s16114_s4 = sshll.u32 %s19607_s0, 4  ;;  %s16115_s4 = int_to_ptr.vmem [resolvable:$true] %s16114_s4 }
0x14ac   :  { %v14358_v61 = vand.u32 4294901760, %v16133_v20  ;;  %p19577_p1 = scmp.lt.s32.totalorder %s16115_s4, %s16115_s4 }
0x14bc   :  { %13839 = vrot.lane.b32.xlu1 %v20292_v45, %s19606_s20 }
0x1508   :  { %v13829_v36 = vpop.xlane.xlu0 %13828 }
0x1509   :  { %19548 = vrcp.f32 %v13829_v36 }
0x150c   :  { %v13838_v0 = vpop.permute.xlu0 %13837 }
0x150d   :  { %v13850_v49 = vand.u32 4294901760, %v13838_v0 }
0x150f   :  { %v13938_v4 = vsub.f32 %v13838_v0, %v13850_v49 }
0x1511   :  { %v13939_v24 = vand.u32 4294901760, %v13938_v4 }
0x1513   :  { %v19549_v56 = vpop.eup %19548  ;;  %v13940_v55 = vsub.f32 %v13938_v4, %v13939_v24 }
0x1514   :  { %v13834_v15 = vmul.f32 %v19549_v56, %v20543_v9 }
0x1515   :  { %v13941_v58 = vand.u32 4294901760, %v13940_v55 }
0x1516   :  { %v13844_v47 = vsel %vm1160_vm6, %v13834_v15, 0 }
0x1517   :  { %v13916_v48 = vand.u32 4294901760, %v13844_v47 }
0x1519   :  { %v13917_v54 = vsub.f32 %v13844_v47, %v13916_v48 }
0x151b   :  { %v13918_v62 = vand.u32 4294901760, %v13917_v54 }
0x151d   :  { %v13919_v29 = vsub.f32 %v13917_v54, %v13918_v62 }
0x151f   :  { %v13920_v31 = vand.u32 4294901760, %v13919_v29 }
0x1538   :  { %v13832_v41 = vpop.xlane.xlu1 %13831 }
0x1539   :  { %19550 = vrcp.f32 %v13832_v41 }
0x153c   :  { %v13840_v8 = vpop.permute.xlu1 %13839 }
0x153d   :  { %v13853_v27 = vand.u32 4294901760, %v13840_v8 }
0x153f   :  { %v13945_v16 = vsub.f32 %v13840_v8, %v13853_v27  ;;  %v18942_v17 = vpack.c.bf16 %v13853_v27, %v13850_v49 }
0x1541   :  { %v13946_v50 = vand.u32 4294901760, %v13945_v16  ;;  %v18950_v44 = vpack.c.bf16 %v13945_v16, %v13938_v4 }
0x1543   :  { %v19551_v63 = vpop.eup %19550  ;;  %v13947_v9 = vsub.f32 %v13945_v16, %v13946_v50 }
0x1544   :  { %v13836_v7 = vmul.f32 %v19551_v63, %v19547_v33  ;;  %v18958_v33 = vpack.c.bf16 %v13946_v50, %v13939_v24  ;;  %v16134_v50 = vld [vmem:[%s20750_s5 + $0x20] sm:$0xff]  ;;  %v16135_v24 = vld [vmem:[%s20750_s5 + $0x28] sm:$0xff] }
0x1545   :  { %v13948_v59 = vand.u32 4294901760, %v13947_v9  ;;  %v16137_v9 = vld [vmem:[%s20750_s5 + $0x38] sm:$0xff] }
0x1546   :  { %v13847_v5 = vsel %vm1160_vm6, %v13836_v7, 0 }
0x1547   :  { %v13926_v46 = vand.u32 4294901760, %v13847_v5  ;;  %v18946_v32 = vpack.c.bf16 %v13948_v59, %v13941_v58 }
0x1549   :  { %v13927_v18 = vsub.f32 %v13847_v5, %v13926_v46 }
0x154b   :  { %v13928_v25 = vand.u32 4294901760, %v13927_v18 }
0x154d   :  { %v13929_v12 = vsub.f32 %v13927_v18, %v13928_v25 }
0x154f   :  { %v13930_v1 = vand.u32 4294901760, %v13929_v12 }
0x157a   :  { %v18017_v42 = vpop.f32.mrb[20].mxu0 }
0x157b   :  { %v12804_v39 = vsel %vm649_vm5, %v18017_v42, 0  ;;  %v12790_v45 = vpop.f32.mrb[21].mxu0 }
0x157c   :  { %v20562_v38 = vand.u32 4294901760, %v12804_v39  ;;  %v12801_v19 = vsel %vm649_vm5, %v12790_v45, 0 }
0x157d   :  { %v12872_v37 = vand.u32 4294901760, %v12801_v19 }
0x157e   :  { %v12883_v3 = vsub.f32 %v12804_v39, %v20562_v38 }
0x157f   :  { %v12873_v11 = vsub.f32 %v12801_v19, %v12872_v37 }
0x1580   :  { %v12884_v10 = vand.u32 4294901760, %v12883_v3 }
0x1581   :  { %v12874_v52 = vand.u32 4294901760, %v12873_v11 }
0x1582   :  { %v12885_v26 = vsub.f32 %v12883_v3, %v12884_v10 }
0x1583   :  { %v12875_v40 = vsub.f32 %v12873_v11, %v12874_v52 }
0x1584   :  { %v12886_v6 = vand.u32 4294901760, %v12885_v26 }
0x1585   :  { %v12876_v23 = vand.u32 4294901760, %v12875_v40 }
0x1587   :  { %18020 = vmatprep.mubr.f32.mxu0 %v12876_v23 }
0x1588   :  { %18021 = vmatmul.mubr.f32.vlgmr.msra.gmra.mrb[18].mxu0 %v12886_v6  ;;  %v20584_v6 = vld [vmem:[%s20752_s7 + $0x8] sm:$0xff] }
0x1589   :  { %18024 = vmatpush3.msra.mxu0 %v12897_v35  ;;  %18025 = vmatprep.mubr.f32.mxu0 %v12872_v37  ;;  %v14853_v36 = vrot.slane %v20584_v6, %v20045_v57 }
0x158a   :  { %18028 = vmatprep.subr.mxu0 %v12894_v51 }
0x1590   :  { %18026 = vmatmul.mubr.f32.vlgmr.msra.gmra.mrb[18].mxu0 %v20562_v38 }
0x1591   :  { %18029 = vmatpush3.msra.mxu0 %v12894_v51  ;;  %18030 = vmatprep.mubr.f32.mxu0 %v12873_v11 }
0x1592   :  { %18033 = vmatprep.subr.mxu0 %v20556_v28 }
0x1598   :  { %18031 = vmatmul.mubr.f32.vlgmr.msra.gmra.mrb[18].mxu0 %v12883_v3 }
0x1599   :  { %18034 = vmatpush3.msra.mxu0 %v20556_v28  ;;  %18035 = vmatprep.mubr.f32.mxu0 %v12874_v52 }
0x159a   :  { %18038 = vmatprep.subr.mxu0 %v12895_v30 }
0x15a0   :  { %18036 = vmatmul.mubr.f32.vlgmr.msra.gmra.mrb[18].mxu0 %v12884_v10 }
0x15a1   :  { %18039 = vmatpush3.msra.mxu0 %v12895_v30  ;;  %18040 = vmatprep.mubr.f32.mxu0 %v12872_v37 }
0x15a2   :  { %18043 = vmatprep.subr.mxu0 %v20556_v28 }
0x15a8   :  { %18041 = vmatmul.mubr.f32.vlgmr.msra.gmra.mrb[18].mxu0 %v20562_v38 }
0x15a9   :  { %18044 = vmatpush3.msra.mxu0 %v20556_v28  ;;  %18045 = vmatprep.mubr.f32.mxu0 %v12872_v37  ;;  %v14445_v28 = vsub.f32 %v16133_v20, %v14358_v61 }
0x15aa   :  { %18943 = vmatprep.subr.bf16.mxu0 %v18942_v17 }
0x15ab   :  { %v14446_v51 = vand.u32 4294901760, %v14445_v28 }
0x15ad   :  { %v14447_v30 = vsub.f32 %v14445_v28, %v14446_v51 }
0x15af   :  { %v14448_v34 = vand.u32 4294901760, %v14447_v30 }
0x15b0   :  { %18046 = vmatmul.mubr.f32.vlgmr.msra.gmra.mrb[18].mxu0 %v20562_v38 }
0x15b1   :  { %18945 = vmatpush3.bf16.msra.mxu0 %v18942_v17  ;;  %18094 = vmatprep.mubr.f32.mxu0 %v13920_v31 }
0x15b2   :  { %18947 = vmatprep.subr.bf16.mxu0 %v18946_v32 }
0x15b4   :  { %18095 = vmatmul.mubr.f32.vlgmr.msra.gmra.mrb[22].mxu0 %v13930_v1 }
0x15b5   :  { %18949 = vmatpush3.bf16.msra.mxu0 %v18946_v32  ;;  %18101 = vmatprep.mubr.f32.mxu0 %v13916_v48 }
0x15b6   :  { %18951 = vmatprep.subr.bf16.mxu0 %v18950_v44 }
0x15bc   :  { %18102 = vmatmul.mubr.f32.vlgmr.msra.gmra.mrb[22].mxu0 %v13926_v46 }
0x15bd   :  { %18953 = vmatpush3.bf16.msra.mxu0 %v18950_v44  ;;  %18108 = vmatprep.mubr.f32.mxu0 %v13917_v54 }
0x15be   :  { %18955 = vmatprep.subr.bf16.mxu0 %v18942_v17 }
0x15c4   :  { %18109 = vmatmul.mubr.f32.vlgmr.msra.gmra.mrb[22].mxu0 %v13927_v18  ;;  %v16136_v18 = vld [vmem:[%s20750_s5 + $0x30] sm:$0xff] }
0x15c5   :  { %18957 = vmatpush3.bf16.msra.mxu0 %v18942_v17  ;;  %18115 = vmatprep.mubr.f32.mxu0 %v13918_v62  ;;  %v14924_v62 = vand.u32 4294901760, %v16134_v50  ;;  %v14930_v55 = vand.u32 4294901760, %v16136_v18 }
0x15c6   :  { %18959 = vmatprep.subr.bf16.mxu0 %v18958_v33 }
0x15c7   :  { %v15014_v58 = vsub.f32 %v16134_v50, %v14924_v62 }
0x15c9   :  { %v15015_v31 = vand.u32 4294901760, %v15014_v58 }
0x15cb   :  { %v15016_v1 = vsub.f32 %v15014_v58, %v15015_v31 }
0x15cc   :  { %18116 = vmatmul.mubr.f32.vlgmr.msra.gmra.mrb[22].mxu0 %v13928_v25  ;;  %v14933_v25 = vand.u32 4294901760, %v16137_v9 }
0x15cd   :  { %18961 = vmatpush3.bf16.msra.mxu0 %v18958_v33  ;;  %18122 = vmatprep.mubr.f32.mxu0 %v13916_v48  ;;  %v15028_v33 = vsub.f32 %v16136_v18, %v14930_v55 }
0x15ce   :  { %18963 = vmatprep.subr.bf16.mxu0 %v18942_v17  ;;  %v20624_v59 = vpack.c.bf16 %v14933_v25, %v14930_v55  ;;  %v15035_v20 = vsub.f32 %v16137_v9, %v14933_v25 }
0x15d0   :  { %v15036_v30 = vand.u32 4294901760, %v15035_v20 }
0x15d4   :  { %18123 = vmatmul.mubr.f32.vlgmr.msra.gmra.mrb[22].mxu0 %v13926_v46 }
0x15d5   :  { %18965 = vmatpush3.bf16.msra.mxu0 %v18942_v17  ;;  %18129 = vmatprep.mubr.f32.mxu0 %v13916_v48  ;;  %v14927_v17 = vand.u32 4294901760, %v16135_v24 }
0x15d6   :  { %18132 = vmatprep.subr.mxu0 %v14358_v61 }
0x15d7   :  { %v20622_v29 = vpack.c.bf16 %v14927_v17, %v14924_v62  ;;  %v15021_v12 = vsub.f32 %v16135_v24, %v14927_v17 }
0x15d9   :  { %18967 = vmatprep.subr.bf16.mxu1 %v20622_v29  ;;  %v15022_v32 = vand.u32 4294901760, %v15021_v12 }
0x15da   :  { %18969 = vmatpush3.bf16.msra.mxu1 %v20622_v29 }
0x15db   :  { %18971 = vmatprep.subr.bf16.mxu1 %v20624_v59  ;;  %v15023_v44 = vsub.f32 %v15021_v12, %v15022_v32 }
0x15dc   :  { %18130 = vmatmul.mubr.f32.vlgmr.msra.gmra.mrb[22].mxu0 %v13926_v46 }
0x15dd   :  { %18133 = vmatpush3.msra.mxu0 %v14358_v61 }
0x15de   :  { %18137 = vmatprep.subr.mxu0 %v14448_v34  ;;  %18973 = vmatpush3.bf16.msra.mxu1 %v20624_v59 }
0x16af   :  { %v18131_v35 = vpop.f32.mrb[22].mxu0 }
0x16b0   :  { %v14355_v42 = vsel %vm649_vm5, %v18131_v35, 0  ;;  %v14341_v39 = vpop.f32.mrb[23].mxu0 }
0x16b1   :  { %v14433_v45 = vand.u32 4294901760, %v14355_v42  ;;  %v14352_v38 = vsel %vm649_vm5, %v14341_v39, 0 }
0x16b2   :  { %v14423_v19 = vand.u32 4294901760, %v14352_v38 }
0x16b3   :  { %v14434_v37 = vsub.f32 %v14355_v42, %v14433_v45  ;;  %v15037_v42 = vsub.f32 %v15035_v20, %v15036_v30 }
0x16b4   :  { %v14424_v3 = vsub.f32 %v14352_v38, %v14423_v19 }
0x16b5   :  { %v14435_v11 = vand.u32 4294901760, %v14434_v37 }
0x16b6   :  { %v14425_v10 = vand.u32 4294901760, %v14424_v3 }
0x16b7   :  { %v14436_v52 = vsub.f32 %v14434_v37, %v14435_v11 }
0x16b8   :  { %v14426_v26 = vsub.f32 %v14424_v3, %v14425_v10 }
0x16b9   :  { %v14437_v23 = vand.u32 4294901760, %v14436_v52 }
0x16ba   :  { %v14427_v40 = vand.u32 4294901760, %v14426_v26 }
0x16bc   :  { %18134 = vmatprep.mubr.f32.mxu0 %v14427_v40 }
0x16bd   :  { %18135 = vmatmul.mubr.f32.vlgmr.msra.gmra.mrb[18].mxu0 %v14437_v23 }
0x16be   :  { %18138 = vmatpush3.msra.mxu0 %v14448_v34  ;;  %18139 = vmatprep.mubr.f32.mxu0 %v14423_v19 }
0x16bf   :  { %18142 = vmatprep.subr.mxu0 %v14445_v28 }
0x16c5   :  { %18140 = vmatmul.mubr.f32.vlgmr.msra.gmra.mrb[18].mxu0 %v14433_v45 }
0x16c6   :  { %18143 = vmatpush3.msra.mxu0 %v14445_v28  ;;  %18144 = vmatprep.mubr.f32.mxu0 %v14424_v3  ;;  %v15024_v28 = vand.u32 4294901760, %v15023_v44  ;;  %v20630_v3 = vpack.c.bf16 %v15022_v32, %v15015_v31 }
0x16c7   :  { %18147 = vmatprep.subr.mxu0 %v14358_v61 }
0x16cd   :  { %18145 = vmatmul.mubr.f32.vlgmr.msra.gmra.mrb[18].mxu0 %v14434_v37  ;;  %v18986_v37 = vpack.c.bf16 %v15035_v20, %v15028_v33  ;;  %v16139_v20 = vld [vmem:[%s20751_s6 + $0x48] sm:$0xff] }
0x16ce   :  { %18148 = vmatpush3.msra.mxu0 %v14358_v61  ;;  %18149 = vmatprep.mubr.f32.mxu0 %v14425_v10 }
0x16cf   :  { %18152 = vmatprep.subr.mxu0 %v14446_v51 }
0x16d5   :  { %18150 = vmatmul.mubr.f32.vlgmr.msra.gmra.mrb[18].mxu0 %v14435_v11 }
0x16d6   :  { %18153 = vmatpush3.msra.mxu0 %v14446_v51  ;;  %18154 = vmatprep.mubr.f32.mxu0 %v14423_v19  ;;  %v15029_v51 = vand.u32 4294901760, %v15028_v33 }
0x16d7   :  { %18157 = vmatprep.subr.mxu0 %v14358_v61 }
0x16d8   :  { %v15030_v35 = vsub.f32 %v15028_v33, %v15029_v51  ;;  %v20632_v11 = vpack.c.bf16 %v15036_v30, %v15029_v51 }
0x16da   :  { %v15031_v39 = vand.u32 4294901760, %v15030_v35 }
0x16dd   :  { %18155 = vmatmul.mubr.f32.vlgmr.msra.gmra.mrb[18].mxu0 %v14433_v45 }
0x16de   :  { %18158 = vmatpush3.msra.mxu0 %v14358_v61  ;;  %18159 = vmatprep.mubr.f32.mxu0 %v14423_v19  ;;  %v15017_v61 = vand.u32 4294901760, %v15016_v1  ;;  %v18982_v19 = vpack.c.bf16 %v15021_v12, %v15014_v58 }
0x16e0   :  { %v18974_v34 = vpack.c.bf16 %v15024_v28, %v15017_v61  ;;  %v15476_v28 = vand.u32 4294901760, %v16139_v20 }
0x16e2   :  { %18975 = vmatprep.subr.bf16.mxu1 %v18974_v34 }
0x16e5   :  { %18160 = vmatmul.mubr.f32.vlgmr.msra.gmra.mrb[18].mxu0 %v14433_v45  ;;  %v15038_v45 = vand.u32 4294901760, %v15037_v42  ;;  %v16142_v42 = vld [vmem:[%s20751_s6 + $0x60] sm:$0xff] }
0x16e7   :  { %v18978_v38 = vpack.c.bf16 %v15038_v45, %v15031_v39  ;;  %v16143_v39 = vld [vmem:[%s20751_s6 + $0x68] sm:$0xff]  ;;  %v15485_v45 = vand.u32 4294901760, %v16142_v42 }
0x17b8   :  { %v18161_v41 = vpop.f32.mrb[18].mxu0 }
0x17b9   :  { %v14849_v56 = vadd.f32 %v18161_v41, %v20223_v60  ;;  %v14836_v63 = vpop.f32.mrb[19].mxu0 }
0x17ba   :  { %v14848_v15 = vadd.f32 %v14836_v63, %v20226_v13 }
0x17bb   :  { %v20590_v8 = vadd.f32 %v14853_v36, %v14849_v56 }
0x17bc   :  { %v20592_v0 = vadd.f32 %v14853_v36, %v14848_v15 }
0x17bd   :  { %v14859_v7 = vsel %vm42_vm0, %v20590_v8, 0.0 }
0x17be   :  { %14860 = vadd.xlane.f32.xlu0 %v14859_v7  ;;  %v14856_v27 = vsel %vm42_vm0, %v20592_v0, 0.0 }
0x17bf   :  { %14857 = vadd.xlane.f32.xlu1 %v14856_v27 }
0x184b   :  { %v14861_v47 = vpop.xlane.xlu0 %14860 }
0x184c   :  { %v14863_v49 = vmul.f32 0.03125, %v14861_v47  ;;  %v14858_v48 = vpop.xlane.xlu1 %14857 }
0x184d   :  { %v14862_v5 = vmul.f32 0.03125, %v14858_v48 }
0x184e   :  { %v20599_v60 = vsub.f32 %v20590_v8, %v14863_v49 }
0x184f   :  { %v20602_v13 = vsub.f32 %v20592_v0, %v14862_v5 }
0x1850   :  { %v14867_v16 = vmul.f32 %v20599_v60, %v20599_v60 }
0x1851   :  { %v14866_v4 = vmul.f32 %v20602_v13, %v20602_v13 }
0x1852   :  { %v14871_v46 = vsel %vm42_vm0, %v14867_v16, 0.0  ;;  %v14899_v16 = vrot.slane %v20584_v6, %v6893_v21 }
0x1853   :  { %14872 = vadd.xlane.f32.xlu1 %v14871_v46  ;;  %v14868_v54 = vsel %vm42_vm0, %v14866_v4, 0.0 }
0x1854   :  { %14869 = vadd.xlane.f32.xlu0 %v14868_v54  ;;  %v14905_v54 = vrot.slane %v20584_v6, %v6899_v22 }
0x18e0   :  { %v14873_v10 = vpop.xlane.xlu1 %14872 }
0x18e1   :  { %v14875_v52 = vmul.f32 0.032258064, %v14873_v10  ;;  %v14870_v26 = vpop.xlane.xlu0 %14869  ;;  %v16145_v10 = vld [vmem:[%s20751_s6 + $0x78] sm:$0xff] }
0x18e2   :  { %v14874_v40 = vmul.f32 0.032258064, %v14870_v26  ;;  %v15494_v26 = vand.u32 4294901760, %v16145_v10 }
0x18e3   :  { %19552 = vrsqrt.f32 %v14875_v52  ;;  %vm14885_vm1 = vcmp.eq.f32.partialorder %v14875_v52, inf  ;;  %v14888_v56 = vand.u32 2147483648, %v14875_v52  ;;  %vm14887_vm2 = vcmp.eq.f32.partialorder %v14875_v52, 0.0 }
0x18e4   :  { %19554 = vrsqrt.f32 %v14874_v40  ;;  %vm14878_vm3 = vcmp.eq.f32.partialorder %v14874_v40, inf  ;;  %v14881_v7 = vand.u32 2147483648, %v14874_v40  ;;  %vm14880_vm4 = vcmp.eq.f32.partialorder %v14874_v40, 0.0 }
0x18ed   :  { %v19553_v23 = vpop.eup %19552 }
0x18ee   :  { %v19555_v36 = vpop.eup %19554  ;;  %v14884_v41 = vmul.f32 %v19553_v23, %v14875_v52 }
0x18ef   :  { %v14877_v63 = vmul.f32 %v19555_v36, %v14874_v40 }
0x18f0   :  { %v14886_v15 = vsel %vm14885_vm1, %v14875_v52, %v14884_v41 }
0x18f1   :  { %v14889_v27 = vsel %vm14887_vm2, %v14888_v56, %v14886_v15  ;;  %v14879_v47 = vsel %vm14878_vm3, %v14874_v40, %v14877_v63 }
0x18f2   :  { %v14891_v49 = vadd.f32 1e-06, %v14889_v27  ;;  %v14882_v48 = vsel %vm14880_vm4, %v14881_v7, %v14879_v47 }
0x18f3   :  { %v14890_v5 = vadd.f32 1e-06, %v14882_v48 }
0x18f4   :  { %19556 = vrcp.f32 %v14891_v49 }
0x18f5   :  { %19558 = vrcp.f32 %v14890_v5 }
0x18fe   :  { %v19557_v4 = vpop.eup %19556 }
0x18ff   :  { %v19559_v46 = vpop.eup %19558  ;;  %v14895_v50 = vmul.f32 %v19557_v4, %v20599_v60 }
0x1900   :  { %v14893_v24 = vmul.f32 %v19559_v46, %v20602_v13  ;;  %v16138_v13 = vld [vmem:[%s20751_s6 + $0x40] sm:$0xff] }
0x1901   :  { %v14901_v18 = vmul.f32 %v14899_v16, %v14895_v50  ;;  %v15473_v61 = vand.u32 4294901760, %v16138_v13 }
0x1902   :  { %v14900_v62 = vmul.f32 %v14899_v16, %v14893_v24  ;;  %v15595_v16 = vsub.f32 %v16142_v42, %v15485_v45  ;;  %v14916_v42 = vrot.slane %v20584_v6, %v6909_v53 }
0x1903   :  { %v14907_v17 = vadd.f32 %v14905_v54, %v14901_v18  ;;  %v20662_v51 = vpack.c.bf16 %v15476_v28, %v15473_v61 }
0x1904   :  { %v14906_v9 = vadd.f32 %v14905_v54, %v14900_v62  ;;  %v15596_v50 = vand.u32 4294901760, %v15595_v16 }
0x1905   :  { %v14921_v55 = vsel %vm42_vm0, %v14907_v17, 0  ;;  %19015 = vmatprep.subr.bf16.mxu0 %v20662_v51 }
0x1906   :  { %v14918_v25 = vsel %vm42_vm0, %v14906_v9, 0  ;;  %v15002_v58 = vand.u32 4294901760, %v14921_v55  ;;  %19017 = vmatpush3.bf16.msra.mxu0 %v20662_v51  ;;  %v15597_v62 = vsub.f32 %v15595_v16, %v15596_v50 }
0x1907   :  { %v14992_v21 = vand.u32 4294901760, %v14918_v25 }
0x1908   :  { %v15003_v12 = vsub.f32 %v14921_v55, %v15002_v58  ;;  %v15616_v55 = vsub.f32 %v16145_v10, %v15494_v26 }
0x1909   :  { %v14993_v31 = vsub.f32 %v14918_v25, %v14992_v21 }
0x190a   :  { %v15004_v32 = vand.u32 4294901760, %v15003_v12 }
0x190b   :  { %v14994_v1 = vand.u32 4294901760, %v14993_v31 }
0x190c   :  { %v15005_v44 = vsub.f32 %v15003_v12, %v15004_v32 }
0x190d   :  { %v14995_v22 = vsub.f32 %v14993_v31, %v14994_v1 }
0x190e   :  { %v15006_v60 = vand.u32 4294901760, %v15005_v44 }
0x190f   :  { %v14996_v33 = vand.u32 4294901760, %v14995_v22 }
0x1911   :  { %18170 = vmatprep.mubr.f32.mxu1 %v14996_v33 }
0x1912   :  { %18171 = vmatmul.mubr.f32.vlgmr.msra.gmra.mrb[22].mxu1 %v15006_v60 }
0x1913   :  { %18977 = vmatpush3.bf16.msra.mxu1 %v18974_v34  ;;  %18181 = vmatprep.mubr.f32.mxu1 %v14992_v21 }
0x1914   :  { %18979 = vmatprep.subr.bf16.mxu1 %v18978_v38 }
0x1917   :  { %18981 = vmatpush3.bf16.msra.mxu1 %v18978_v38  ;;  %v15488_v38 = vand.u32 4294901760, %v16143_v39 }
0x1918   :  { %18983 = vmatprep.subr.bf16.mxu1 %v18982_v19 }
0x1919   :  { %v15602_v4 = vsub.f32 %v16143_v39, %v15488_v38 }
0x191a   :  { %18182 = vmatmul.mubr.f32.vlgmr.msra.gmra.mrb[22].mxu1 %v15002_v58 }
0x191b   :  { %18985 = vmatpush3.bf16.msra.mxu1 %v18982_v19  ;;  %18192 = vmatprep.mubr.f32.mxu1 %v14993_v31  ;;  %v20682_v19 = vpack.c.bf16 %v15488_v38, %v15485_v45  ;;  %v15603_v24 = vand.u32 4294901760, %v15602_v4  ;;  %v15617_v31 = vand.u32 4294901760, %v15616_v55 }
0x191c   :  { %18987 = vmatprep.subr.bf16.mxu1 %v18986_v37 }
0x191d   :  { %v15604_v17 = vsub.f32 %v15602_v4, %v15603_v24  ;;  %v15618_v44 = vsub.f32 %v15616_v55, %v15617_v31 }
0x191f   :  { %18989 = vmatpush3.bf16.msra.mxu1 %v18986_v37  ;;  %v15567_v37 = vsub.f32 %v16138_v13, %v15473_v61  ;;  %v15619_v33 = vand.u32 4294901760, %v15618_v44  ;;  %v19054_v61 = vpack.c.bf16 %v15602_v4, %v15595_v16 }
0x1920   :  { %18991 = vmatprep.subr.bf16.mxu1 %v20622_v29 }
0x1921   :  { %v15568_v40 = vand.u32 4294901760, %v15567_v37 }
0x1922   :  { %18193 = vmatmul.mubr.f32.vlgmr.msra.gmra.mrb[22].mxu1 %v15003_v12 }
0x1923   :  { %18993 = vmatpush3.bf16.msra.mxu1 %v20622_v29  ;;  %18203 = vmatprep.mubr.f32.mxu1 %v14994_v1  ;;  %v15569_v41 = vsub.f32 %v15567_v37, %v15568_v40 }
0x1924   :  { %18995 = vmatprep.subr.bf16.mxu1 %v20624_v59 }
0x1925   :  { %v15570_v7 = vand.u32 4294901760, %v15569_v41 }
0x1927   :  { %18997 = vmatpush3.bf16.msra.mxu1 %v20624_v59 }
0x1928   :  { %18999 = vmatprep.subr.bf16.mxu1 %v20630_v3 }
0x192a   :  { %18204 = vmatmul.mubr.f32.vlgmr.msra.gmra.mrb[22].mxu1 %v15004_v32 }
0x192b   :  { %19001 = vmatpush3.bf16.msra.mxu1 %v20630_v3  ;;  %18214 = vmatprep.mubr.f32.mxu1 %v14992_v21  ;;  %v15574_v3 = vsub.f32 %v16139_v20, %v15476_v28 }
0x192c   :  { %19003 = vmatprep.subr.bf16.mxu1 %v20632_v11 }
0x192d   :  { %v15575_v23 = vand.u32 4294901760, %v15574_v3  ;;  %v19046_v13 = vpack.c.bf16 %v15574_v3, %v15567_v37 }
0x192f   :  { %19005 = vmatpush3.bf16.msra.mxu1 %v20632_v11  ;;  %v16144_v11 = vld [vmem:[%s20751_s6 + $0x70] sm:$0xff]  ;;  %v15576_v56 = vsub.f32 %v15574_v3, %v15575_v23 }
0x1930   :  { %19007 = vmatprep.subr.bf16.mxu1 %v20622_v29  ;;  %v15491_v52 = vand.u32 4294901760, %v16144_v11 }
0x1931   :  { %v15577_v27 = vand.u32 4294901760, %v15576_v56 }
0x1932   :  { %18215 = vmatmul.mubr.f32.vlgmr.msra.gmra.mrb[22].mxu1 %v15002_v58  ;;  %v20692_v36 = vpack.c.bf16 %v15494_v26, %v15491_v52  ;;  %v15609_v9 = vsub.f32 %v16144_v11, %v15491_v52 }
0x1933   :  { %19009 = vmatpush3.bf16.msra.mxu1 %v20622_v29  ;;  %18225 = vmatprep.mubr.f32.mxu1 %v14992_v21  ;;  %v16140_v29 = vld [vmem:[%s20751_s6 + $0x50] sm:$0xff]  ;;  %v19030_v48 = vpack.c.bf16 %v15577_v27, %v15570_v7  ;;  %v15605_v21 = vand.u32 4294901760, %v15604_v17 }
0x1934   :  { %19011 = vmatprep.subr.bf16.mxu1 %v20624_v59  ;;  %v15479_v30 = vand.u32 4294901760, %v16140_v29  ;;  %v15610_v12 = vand.u32 4294901760, %v15609_v9  ;;  %v19058_v28 = vpack.c.bf16 %v15616_v55, %v15609_v9 }
0x1936   :  { %v15581_v63 = vsub.f32 %v16140_v29, %v15479_v30  ;;  %v15611_v1 = vsub.f32 %v15609_v9, %v15610_v12  ;;  %v19078_v29 = vpack.c.bf16 %v15575_v23, %v15568_v40 }
0x1937   :  { %19013 = vmatpush3.bf16.msra.mxu1 %v20624_v59  ;;  %v16141_v59 = vld [vmem:[%s20751_s6 + $0x58] sm:$0xff] }
0x1938   :  { %v15482_v34 = vand.u32 4294901760, %v16141_v59  ;;  %v15582_v47 = vand.u32 4294901760, %v15581_v63  ;;  %v15612_v22 = vand.u32 4294901760, %v15611_v1 }
0x193a   :  { %18226 = vmatmul.mubr.f32.vlgmr.msra.gmra.mrb[22].mxu1 %v15002_v58  ;;  %v20672_v35 = vpack.c.bf16 %v15482_v34, %v15479_v30  ;;  %v15588_v15 = vsub.f32 %v16141_v59, %v15482_v34  ;;  %v15583_v5 = vsub.f32 %v15581_v63, %v15582_v47  ;;  %v15598_v58 = vand.u32 4294901760, %v15597_v62 }
0x193b   :  { %v19042_v60 = vpack.c.bf16 %v15619_v33, %v15612_v22  ;;  %v19086_v30 = vpack.c.bf16 %v15603_v24, %v15596_v50  ;;  %v19090_v34 = vpack.c.bf16 %v15617_v31, %v15610_v12 }
0x193c   :  { %19019 = vmatprep.subr.bf16.mxu0 %v20672_v35  ;;  %v15589_v49 = vand.u32 4294901760, %v15588_v15  ;;  %v15584_v54 = vand.u32 4294901760, %v15583_v5  ;;  %v19038_v32 = vpack.c.bf16 %v15605_v21, %v15598_v58  ;;  %v19050_v20 = vpack.c.bf16 %v15588_v15, %v15581_v63 }
0x193d   :  { %19021 = vmatpush3.bf16.msra.mxu0 %v20672_v35 }
0x193e   :  { %19023 = vmatprep.subr.bf16.mxu0 %v20682_v19  ;;  %v15590_v46 = vsub.f32 %v15588_v15, %v15589_v49  ;;  %v19082_v59 = vpack.c.bf16 %v15589_v49, %v15582_v47  ;;  %v15465_v47 = vrot.slane %v20584_v6, %v7457_v43 }
0x1940   :  { %v15591_v18 = vand.u32 4294901760, %v15590_v46 }
0x1941   :  { %19025 = vmatpush3.bf16.msra.mxu0 %v20682_v19 }
0x1942   :  { %19027 = vmatprep.subr.bf16.mxu0 %v20692_v36  ;;  %v19034_v25 = vpack.c.bf16 %v15591_v18, %v15584_v54 }
0x1945   :  { %19029 = vmatpush3.bf16.msra.mxu0 %v20692_v36 }
0x1946   :  { %19031 = vmatprep.subr.bf16.mxu0 %v19030_v48 }
0x1a0d   :  { %v18227_v39 = vpop.f32.mrb[22].mxu1 }
0x1a0e   :  { %v19136_v45 = vadd.f32 %v18227_v39, %v14916_v42  ;;  %v15441_v38 = vpop.f32.mrb[23].mxu1 }
0x1a0f   :  { %v19137_v11 = vadd.f32 %v15441_v38, %v14916_v42 }
0x1a10   :  { %v15452_v10 = vmax.f32 %v19136_v45, 0.0 }
0x1a11   :  { %v15451_v52 = vmax.f32 %v19137_v11, 0.0 }
0x1a12   :  { %v15470_v26 = vsel %vm7459_vm11, %v15452_v10, 0 }
0x1a13   :  { %v15555_v37 = vand.u32 4294901760, %v15470_v26  ;;  %v15467_v3 = vsel %vm7459_vm11, %v15451_v52, 0 }
0x1a14   :  { %v15545_v41 = vand.u32 4294901760, %v15467_v3 }
0x1a15   :  { %v15556_v40 = vsub.f32 %v15470_v26, %v15555_v37 }
0x1a16   :  { %v15546_v23 = vsub.f32 %v15467_v3, %v15545_v41 }
0x1a17   :  { %v15557_v56 = vand.u32 4294901760, %v15556_v40 }
0x1a18   :  { %v15547_v63 = vand.u32 4294901760, %v15546_v23 }
0x1a19   :  { %v15558_v15 = vsub.f32 %v15556_v40, %v15557_v56 }
0x1a1a   :  { %v15548_v7 = vsub.f32 %v15546_v23, %v15547_v63 }
0x1a1b   :  { %v15559_v53 = vand.u32 4294901760, %v15558_v15 }
0x1a1c   :  { %v15549_v27 = vand.u32 4294901760, %v15548_v7 }
0x1a1e   :  { %18244 = vmatprep.mubr.f32.mxu0 %v15549_v27 }
0x1a1f   :  { %18245 = vmatmul.mubr.f32.vlgmr.msra.gmra.mrb[24].mxu0 %v15559_v53 }
0x1a20   :  { %19033 = vmatpush3.bf16.msra.mxu0 %v19030_v48  ;;  %18263 = vmatprep.mubr.f32.mxu0 %v15545_v41 }
0x1a21   :  { %19035 = vmatprep.subr.bf16.mxu0 %v19034_v25 }
0x1a24   :  { %19037 = vmatpush3.bf16.msra.mxu0 %v19034_v25 }
0x1a25   :  { %19039 = vmatprep.subr.bf16.mxu0 %v19038_v32 }
0x1a28   :  { %19041 = vmatpush3.bf16.msra.mxu0 %v19038_v32 }
0x1a29   :  { %19043 = vmatprep.subr.bf16.mxu0 %v19042_v60 }
0x1a2c   :  { %19045 = vmatpush3.bf16.msra.mxu0 %v19042_v60 }
0x1a2d   :  { %19047 = vmatprep.subr.bf16.mxu0 %v19046_v13 }
0x1a2f   :  { %18264 = vmatmul.mubr.f32.vlgmr.msra.gmra.mrb[24].mxu0 %v15555_v37 }
0x1a30   :  { %19049 = vmatpush3.bf16.msra.mxu0 %v19046_v13  ;;  %18282 = vmatprep.mubr.f32.mxu0 %v15546_v23  ;;  %v16054_v13 = vld [vmem:[%s20753_s8] sm:$0x3]  ;;  %s19572_s8 = scalar_lea.vmem %s16115_s4, 256 }
0x1a31   :  { %19051 = vmatprep.subr.bf16.mxu0 %v19050_v20  ;;  %p19573_p0 = scmp.ne.s32.totalorder %s16115_s4, %s19572_s8  ;;  %p19578_p2 = scmp.lt.s32.totalorder %s19572_s8, %s19572_s8 }
0x1a33   :  { %p19579_p3 = por %p19578_p2, %p19577_p1 }
0x1a34   :  { %19053 = vmatpush3.bf16.msra.mxu0 %v19050_v20  ;;  %v16098_v20 = vrot.slane %v16054_v13, %v19752_v14 }
0x1a35   :  { %19055 = vmatprep.subr.bf16.mxu0 %v19054_v61  ;;  %p19580_p4 = pnand %p19579_p3, %p19573_p0 }
0x1a38   :  { %19057 = vmatpush3.bf16.msra.mxu0 %v19054_v61 }
0x1a39   :  { %19059 = vmatprep.subr.bf16.mxu0 %v19058_v28 }
0x1a3c   :  { %19061 = vmatpush3.bf16.msra.mxu0 %v19058_v28 }
0x1a3d   :  { %19063 = vmatprep.subr.bf16.mxu0 %v20662_v51 }
0x1a3f   :  { %18283 = vmatmul.mubr.f32.vlgmr.msra.gmra.mrb[24].mxu0 %v15556_v40 }
0x1a40   :  { %19065 = vmatpush3.bf16.msra.mxu0 %v20662_v51  ;;  %18301 = vmatprep.mubr.f32.mxu0 %v15547_v63 }
0x1a41   :  { %19067 = vmatprep.subr.bf16.mxu0 %v20672_v35 }
0x1a44   :  { %19069 = vmatpush3.bf16.msra.mxu0 %v20672_v35 }
0x1a45   :  { %19071 = vmatprep.subr.bf16.mxu0 %v20682_v19 }
0x1a48   :  { %19073 = vmatpush3.bf16.msra.mxu0 %v20682_v19 }
0x1a49   :  { %19075 = vmatprep.subr.bf16.mxu0 %v20692_v36 }
0x1a4c   :  { %19077 = vmatpush3.bf16.msra.mxu0 %v20692_v36 }
0x1a4d   :  { %19079 = vmatprep.subr.bf16.mxu0 %v19078_v29 }
0x1a4f   :  { %18302 = vmatmul.mubr.f32.vlgmr.msra.gmra.mrb[24].mxu0 %v15557_v56 }
0x1a50   :  { %19081 = vmatpush3.bf16.msra.mxu0 %v19078_v29  ;;  %18320 = vmatprep.mubr.f32.mxu0 %v15545_v41 }
0x1a51   :  { %19083 = vmatprep.subr.bf16.mxu0 %v19082_v59 }
0x1a54   :  { %19085 = vmatpush3.bf16.msra.mxu0 %v19082_v59  ;;  %v16104_v59 = vrot.slane %v16054_v13, %v20045_v57 }
0x1a55   :  { %19087 = vmatprep.subr.bf16.mxu0 %v19086_v30 }
0x1a58   :  { %19089 = vmatpush3.bf16.msra.mxu0 %v19086_v30 }
0x1a59   :  { %19091 = vmatprep.subr.bf16.mxu0 %v19090_v34 }
0x1a5c   :  { %19093 = vmatpush3.bf16.msra.mxu0 %v19090_v34 }
0x1a5d   :  { %19095 = vmatprep.subr.bf16.mxu0 %v20662_v51 }
0x1a5f   :  { %18321 = vmatmul.mubr.f32.vlgmr.msra.gmra.mrb[24].mxu0 %v15555_v37 }
0x1a60   :  { %19097 = vmatpush3.bf16.msra.mxu0 %v20662_v51  ;;  %18339 = vmatprep.mubr.f32.mxu0 %v15545_v41 }
0x1a61   :  { %19099 = vmatprep.subr.bf16.mxu0 %v20672_v35 }
0x1a64   :  { %19101 = vmatpush3.bf16.msra.mxu0 %v20672_v35 }
0x1a65   :  { %19103 = vmatprep.subr.bf16.mxu0 %v20682_v19 }
0x1a68   :  { %19105 = vmatpush3.bf16.msra.mxu0 %v20682_v19 }
0x1a69   :  { %19107 = vmatprep.subr.bf16.mxu0 %v20692_v36 }
0x1a6c   :  { %19109 = vmatpush3.bf16.msra.mxu0 %v20692_v36 }
0x1a6f   :  { %18340 = vmatmul.mubr.f32.vlgmr.msra.gmra.mrb[24].mxu0 %v15555_v37 }
0x1b42   :  { %v18341_v49 = vpop.f32.mrb[24].mxu0 }
0x1b43   :  { %v19138_v51 = vadd.f32 %v18341_v49, %v15465_v47  ;;  %v16042_v48 = vpop.f32.mrb[25].mxu0 }
0x1b44   :  { %v19139_v5 = vadd.f32 %v16042_v48, %v15465_v47 }
0x1b45   :  { %v16053_v16 = vadd.f32 %v19138_v51, %v20590_v8 }
0x1b46   :  { %v16052_v35 = vadd.f32 %v19139_v5, %v20592_v0 }
0x1b47   :  { %v16058_v4 = vsel %vm42_vm0, %v16053_v16, 0.0 }
0x1b48   :  { %16059 = vadd.xlane.f32.xlu1 %v16058_v4  ;;  %v16055_v19 = vsel %vm42_vm0, %v16052_v35, 0.0 }
0x1b49   :  { %16056 = vadd.xlane.f32.xlu0 %v16055_v19 }
0x1bd5   :  { %v16060_v36 = vpop.xlane.xlu1 %16059 }
0x1bd6   :  { %v16062_v46 = vmul.f32 0.03125, %v16060_v36  ;;  %v16057_v54 = vpop.xlane.xlu0 %16056 }
0x1bd7   :  { %v16061_v2 = vmul.f32 0.03125, %v16057_v54 }
0x1bd8   :  { %v16064_v50 = vsub.f32 %v16053_v16, %v16062_v46 }
0x1bd9   :  { %v16063_v43 = vsub.f32 %v16052_v35, %v16061_v2 }
0x1bda   :  { %v16066_v6 = vmul.f32 %v16064_v50, %v16064_v50 }
0x1bdb   :  { %v16065_v24 = vmul.f32 %v16063_v43, %v16063_v43 }
0x1bdc   :  { %v16070_v18 = vsel %vm42_vm0, %v16066_v6, 0.0 }
0x1bdd   :  { %16071 = vadd.xlane.f32.xlu1 %v16070_v18  ;;  %v16067_v8 = vsel %vm42_vm0, %v16065_v24, 0.0 }
0x1bde   :  { %16068 = vadd.xlane.f32.xlu0 %v16067_v8 }
0x1c6a   :  { %v16072_v0 = vpop.xlane.xlu1 %16071 }
0x1c6b   :  { %v16074_v62 = vmul.f32 0.032258064, %v16072_v0  ;;  %v16069_v17 = vpop.xlane.xlu0 %16068 }
0x1c6c   :  { %v16073_v9 = vmul.f32 0.032258064, %v16069_v17 }
0x1c6d   :  { %19560 = vrsqrt.f32 %v16074_v62  ;;  %vm16084_vm5 = vcmp.eq.f32.partialorder %v16074_v62, inf  ;;  %v16087_v21 = vand.u32 2147483648, %v16074_v62  ;;  %vm16086_vm6 = vcmp.eq.f32.partialorder %v16074_v62, 0.0 }
0x1c6e   :  { %19562 = vrsqrt.f32 %v16073_v9  ;;  %vm16077_vm7 = vcmp.eq.f32.partialorder %v16073_v9, inf  ;;  %v16080_v32 = vand.u32 2147483648, %v16073_v9  ;;  %vm16079_vm8 = vcmp.eq.f32.partialorder %v16073_v9, 0.0 }
0x1c77   :  { %v19561_v55 = vpop.eup %19560 }
0x1c78   :  { %v19563_v25 = vpop.eup %19562  ;;  %v16083_v58 = vmul.f32 %v19561_v55, %v16074_v62 }
0x1c79   :  { %v16076_v12 = vmul.f32 %v19563_v25, %v16073_v9 }
0x1c7a   :  { %v16085_v31 = vsel %vm16084_vm5, %v16074_v62, %v16083_v58 }
0x1c7b   :  { %v16088_v1 = vsel %vm16086_vm6, %v16087_v21, %v16085_v31  ;;  %v16078_v44 = vsel %vm16077_vm7, %v16073_v9, %v16076_v12 }
0x1c7c   :  { %v16090_v22 = vadd.f32 1e-06, %v16088_v1  ;;  %v16081_v33 = vsel %vm16079_vm8, %v16080_v32, %v16078_v44 }
0x1c7d   :  { %v16089_v60 = vadd.f32 1e-06, %v16081_v33 }
0x1c7e   :  { %19564 = vrcp.f32 %v16090_v22 }
0x1c7f   :  { %19566 = vrcp.f32 %v16089_v60 }
0x1c88   :  { %v19565_v61 = vpop.eup %19564 }
0x1c89   :  { %v19567_v28 = vpop.eup %19566  ;;  %v16094_v29 = vmul.f32 %v19565_v61, %v16064_v50 }
0x1c8a   :  { %v16092_v30 = vmul.f32 %v19567_v28, %v16063_v43 }
0x1c8b   :  { %v16100_v34 = vmul.f32 %v16098_v20, %v16094_v29 }
0x1c8c   :  { %v16099_v42 = vmul.f32 %v16098_v20, %v16092_v30 }
0x1c8d   :  { %v16106_v39 = vadd.f32 %v16104_v59, %v16100_v34 }
0x1c8e   :  { %v16105_v45 = vadd.f32 %v16104_v59, %v16099_v42 }
0x1c8f   :  { %16108 = vst.msk [vmem:[#allocation2 + $0x8] sm:$0xff] %vm42_vm0, %v16106_v39 }
0x1c90   :  { %16107 = vst.msk [vmem:[#allocation2] sm:$0xff] %vm42_vm0, %v16105_v45 }
0x1c91   :  { %19583 = shalt.err (!%p19580_p4)
}
0x1c92   :  { %s19584_s28 = scalar_lea.hbm %s20754_s9, 256 }
0x1c93   :  { %p19585_p5 = scmp.ne.s32.totalorder %s20754_s9, %s19584_s28  ;;  %p19588_p6 = scmp.lt.u32.totalorder %s19584_s28, %s20754_s9 }
0x1c95   :  { %p19590_p7 = pnand %p19588_p6, %p19585_p5 }
0x1c97   :  { %19593 = shalt.err (!%p19590_p7)
}
0x1c98   :  { %s19608_s17 = smov 128   ;;  %s19609_s18 = smov 8  }
0x1c99   :  { %16120 = dma.vmem_to_hbm [thread:$0]  %s16115_s4, 256, %s20754_s9, [#allocation3], %s19608_s17, %s19608_s17, %s19609_s18  }
0x1c9a   :  { %19594 = dma.done.wait [#allocation3], 256  }
0x1c9b   :  { %19595 = vsyncadd [#allocation3], 4294967040 }
0x1c9c   :  { %16124 = vsyncpa [#allocation3], 1 }

</bundles_post_ra>
